<compile_context>
chip_gen: v5e
topology: v5e:2x2
jax: 0.10.0
libtpu: 0.0.40
codegen_flags: <defaults>
</compile_context>

<pallas_src>
import functools
import math

import jax
import jax.numpy as jnp
from jax.experimental import pallas as pl
from jax.experimental.pallas import tpu as pltpu

_PAD_Z = 1.0e4                       # z-gate pre-activation for padded steps -> z==1 -> h unchanged
_VMEM_LIMIT = 48 * 1024 * 1024       # explicit scoped-VMEM limit, safe on v5e/v6e/v7x
_VMEM_BLOCK_BUDGET = 32 * 1024 * 1024


def _round_up(x, m):
    return ((x + m - 1) // m) * m


def _pick_time_block(T, Bp, Hp, gi_bytes=2, out_bytes=4, cap=16,
                     budget=_VMEM_BLOCK_BUDGET):
    """Timesteps per grid step: largest Tb <= cap whose double-buffered gi/out
    blocks (plus resident weights/state) fit the VMEM block budget.  T is then
    padded up to a multiple of Tb (pad steps are exact no-ops), so prime /
    awkward T no longer degrades to Tb == 1."""
    fixed = 2 * (Hp * 3 * Hp * 2 + 3 * Hp * 4 + Bp * Hp * 4) + Bp * Hp * 4
    per_step = 2 * (Bp * 3 * Hp * gi_bytes + Bp * Hp * out_bytes)
    avail = max(budget - fixed, per_step)
    tb = int(max(1, min(cap, avail // per_step)))
    return T if T <= tb else tb


def _gru_dir_kernel(gi_ref, whh_ref, bhh_ref, h0_ref, out_ref, hN_ref,
                    h_scratch, *, time_block, hidden_pad, num_dirs):
    """One (direction, time-block) grid step of the GRU recurrence.

    grid = (dirs, Tp // Tb); direction axis "parallel", time axis "arbitrary".
    Kernel views (direction dim squeezed by the BlockSpecs):
      gi_ref : (Tb, Bp, 3*Hp) bf16  precomputed x @ W_ih^T + b_ih (gate slabs)
      whh_ref: (Hp, 3*Hp)     bf16  hidden->gates weight (transposed, padded)
      bhh_ref: (1, 3*Hp)      f32
      h0_ref : (Bp, Hp)       f32
      out_ref: (Tb, Bp, Hp)   bf16 (intermediate layer) / f32 (last layer)
      hN_ref : (Bp, Hp)       f32   (resident across the time axis)
      h_scratch: (Bp, Hp) f32 VMEM  recurrent state carried across grid steps
    Invariant: the time ("arbitrary") axis is the innermost grid axis and the
    scratch is per-core when the direction axis is sharded across cores.
    """
    Tb = time_block
    Hp = hidden_pad
    d = pl.program_id(0)
    t = pl.program_id(1)

    @pl.when(t == 0)
    def _():
        h_scratch[...] = h0_ref[...]

    bhh = bhh_ref[...]                       # (1, 3Hp) f32, tiny

    def run(reverse):
        # h carried in vregs across the unrolled steps; scratch written once.
        h = h_scratch[...]
        for i in range(Tb):
            j = (Tb - 1 - i) if reverse else i        # static local time index
            gi = gi_ref[j].astype(jnp.float32)        # (Bp, 3Hp)
            # TODO(synk): weight-stationary MXU driving (matmul_push_rhs /
            # matmul_acc_lhs / matmul_pop) would avoid re-pushing W_hh every
            # step at tiny M; keep the portable jnp.dot form for now.
            gh = jnp.dot(h.astype(whh_ref.dtype), whh_ref[...],
                         preferred_element_type=jnp.float32) + bhh
            # gate order r, z, n ; slices are 128-lane aligned (Hp % 128 == 0)
            r = jax.nn.sigmoid(gi[:, 0 * Hp:1 * Hp] + gh[:, 0 * Hp:1 * Hp])
            z = jax.nn.sigmoid(gi[:, 1 * Hp:2 * Hp] + gh[:, 1 * Hp:2 * Hp])
            n = jnp.tanh(gi[:, 2 * Hp:3 * Hp] + r * gh[:, 2 * Hp:3 * Hp])
            h = (1.0 - z) * n + z * h
            out_ref[j] = h.astype(out_ref.dtype)
        h_scratch[...] = h

    if num_dirs == 1:
        run(False)
    else:
        # Static per-direction bodies: all gi loads / out stores use static
        # addresses; within-block time reversal costs no scalar address math.
        @pl.when(d == 0)
        def _():
            run(False)

        @pl.when(d == 1)
        def _():
            run(True)

    @pl.when(t == pl.num_programs(1) - 1)
    def _():
        hN_ref[...] = h_scratch[...]


def _run_gru_layer(gi, whh, bhh, h0, *, time_block, out_dtype):
    """gi: (dirs, Tp, Bp, 3Hp) bf16; whh: (dirs, Hp, 3Hp) bf16;
    bhh: (dirs, 1, 3Hp) f32; h0: (dirs, Bp, Hp) f32.
    Returns out (dirs, Tp, Bp, Hp) in out_dtype and hN (dirs, Bp, Hp) f32."""
    dirs, Tp, Bp, G = gi.shape
    Hp = G // 3
    Tb = time_block
    assert Tp % Tb == 0
    nTb = Tp // Tb

    def time_map(d, t):
        # forward: block t ; backward: block nTb-1-t (time reversal at the
        # index_map level; in-block reversal is static inside the kernel).
        return (d, t + d * (nTb - 1 - 2 * t), 0, 0)

    kernel = functools.partial(_gru_dir_kernel, time_block=Tb, hidden_pad=Hp,
                               num_dirs=dirs)

    # TODO(synk): single-buffer the resident whh/bhh/h0 inputs
    # (pipeline_mode=pl.Buffered(1)) once that path is verified on this
    # pallas_call pipeline; also consider fusing both directions into one grid
    # step on single-TC chips (v5e/v6e) to overlap the two tiny-M matmuls.
    out, hN = pl.pallas_call(
        kernel,
        out_shape=(
            jax.ShapeDtypeStruct((dirs, Tp, Bp, Hp), out_dtype),
            jax.ShapeDtypeStruct((dirs, Bp, Hp), jnp.float32),
        ),
        grid_spec=pltpu.PrefetchScalarGridSpec(
            num_scalar_prefetch=0,
            grid=(dirs, nTb),
            in_specs=[
                pl.BlockSpec((None, Tb, Bp, 3 * Hp), time_map),
                pl.BlockSpec((None, Hp, 3 * Hp), lambda d, t: (d, 0, 0)),
                pl.BlockSpec((None, 1, 3 * Hp), lambda d, t: (d, 0, 0)),
                pl.BlockSpec((None, Bp, Hp), lambda d, t: (d, 0, 0)),
            ],
            out_specs=[
                pl.BlockSpec((None, Tb, Bp, Hp), time_map),
                pl.BlockSpec((None, Bp, Hp), lambda d, t: (d, 0, 0)),
            ],
            scratch_shapes=[pltpu.VMEM((Bp, Hp), jnp.float32)],
        ),
        compiler_params=pltpu.CompilerParams(
            # directions are independent -> shardable across TCs on v7x;
            # time axis carries the recurrence -> sequential.
            dimension_semantics=("parallel", "arbitrary"),
            vmem_limit_bytes=_VMEM_LIMIT),
    )(gi, whh, bhh, h0)
    return out, hN


class EncDecBasePallas:
    """JAX/Pallas port of EncDecBase (GRU cell type, batch_first=False)."""

    def __init__(self, emb_size, hidden_size, cell_type="GRU", layers=2,
                 bidir=True, key=None, mxu_dtype=jnp.bfloat16):
        assert cell_type == "GRU", "only GRU implemented"
        # TODO(synk): LSTM cell variant not implemented (module defaults to GRU).
        self.emb_size = emb_size
        self.hidden_size = hidden_size
        self.layers = layers
        self.bidir = bidir
        self.dirs = 2 if bidir else 1
        self.mxu_dtype = mxu_dtype
        self.Hp = _round_up(hidden_size, 128)   # lane-aligned gate slab width

        if key is None:
            key = jax.random.PRNGKey(0)
        H = hidden_size
        bound = 1.0 / math.sqrt(H)
        self.params = []                        # per (layer, dir), PyTorch layout
        for layer in range(layers):
            in_dim = emb_size if layer == 0 else H * self.dirs
            for _ in range(self.dirs):
                key, k1, k2, k3, k4 = jax.random.split(key, 5)
                self.params.append(dict(
                    w_ih=jax.random.uniform(k1, (3 * H, in_dim), jnp.float32,
                                            -bound, bound),
                    w_hh=jax.random.uniform(k2, (3 * H, H), jnp.float32,
                                            -bound, bound),
                    b_ih=jax.random.uniform(k3, (3 * H,), jnp.float32,
                                            -bound, bound),
                    b_hh=jax.random.uniform(k4, (3 * H,), jnp.float32,
                                            -bound, bound),
                ))
        self._prepare_padded_params()

    # ---- lane-aligned, direction-stacked parameter layout ------------------
    def _pad_gate_cols(self, w_t):
        """(in, 3H) -> (in, 3*Hp): each r/z/n slab padded to Hp lanes."""
        H, Hp = self.hidden_size, self.Hp
        out = jnp.zeros((w_t.shape[0], 3 * Hp), jnp.float32)
        for g in range(3):
            out = out.at[:, g * Hp:g * Hp + H].set(w_t[:, g * H:(g + 1) * H])
        return out

    def _pad_gate_vec(self, b):
        H, Hp = self.hidden_size, self.Hp
        out = jnp.zeros((3 * Hp,), jnp.float32)
        for g in range(3):
            out = out.at[g * Hp:g * Hp + H].set(b[g * H:(g + 1) * H])
        return out

    def _prepare_padded_params(self):
        H, Hp, dirs = self.hidden_size, self.Hp, self.dirs
        self.wih_pad, self.bih_pad, self.whh_pad, self.bhh_pad = [], [], [], []
        for layer in range(self.layers):
            wih_d, bih_d, whh_d, bhh_d = [], [], [], []
            for d in range(dirs):
                p = self.params[layer * dirs + d]
                w_t = self._pad_gate_cols(p["w_ih"].T)          # (in, 3Hp)
                if layer == 0:
                    wih_d.append(w_t)                           # (emb, 3Hp)
                else:
                    # Fold "take first H cols per direction + concat" into the
                    # weight: rows H..Hp of each input-direction block are 0,
                    # so the padded (dirs, Hp) activation feeds it directly.
                    w_fold = jnp.zeros((dirs, Hp, 3 * Hp), jnp.float32)
                    for e in range(dirs):
                        w_fold = w_fold.at[e, :H, :].set(
                            w_t[e * H:(e + 1) * H, :])
                    wih_d.append(w_fold)                        # (dirs, Hp, 3Hp)
                bih_d.append(self._pad_gate_vec(p["b_ih"]))
                whh = self._pad_gate_cols(p["w_hh"].T)          # (H, 3Hp)
                whh = jnp.pad(whh, ((0, Hp - H), (0, 0)))       # (Hp, 3Hp)
                whh_d.append(whh)
                bhh_d.append(self._pad_gate_vec(p["b_hh"]))
            self.wih_pad.append(jnp.stack(wih_d).astype(self.mxu_dtype))
            self.bih_pad.append(jnp.stack(bih_d)[:, None, None, :])        # (dirs,1,1,3Hp)
            self.whh_pad.append(jnp.stack(whh_d).astype(self.mxu_dtype))   # (dirs,Hp,3Hp)
            self.bhh_pad.append(jnp.stack(bhh_d)[:, None, :])              # (dirs,1,3Hp)

    def initHidden(self, batch_size):
        return jnp.zeros((self.layers * self.dirs, batch_size, self.hidden_size),
                         jnp.float32)

    def rnn(self, x, hidden):
        """x: (T, B, emb); hidden: (layers*dirs, B, H).
        Returns output (T, B, dirs*H) and h_n (layers*dirs, B, H),
        matching torch.nn.GRU semantics."""
        T, B, _ = x.shape
        H, Hp, dirs = self.hidden_size, self.Hp, self.dirs
        # NOTE: for large real batches raise Bp toward 64-256 (the recurrent
        # matmul's M dim) as VMEM allows, instead of adding a batch grid axis.
        Bp = _round_up(max(B, 8), 8)            # fill >= 8 sublanes per vreg
        Tb = _pick_time_block(T, Bp, Hp)
        Tp = _round_up(T, Tb)

        layer_in = jnp.pad(x, ((0, Tp - T), (0, Bp - B), (0, 0)))   # (Tp,Bp,emb)
        finals = []
        for layer in range(self.layers):
            # Hoisted, time-parallel input projection: one large MXU matmul
            # for all Tp timesteps and both directions (bf16 operands, f32 acc).
            if layer == 0:
                gi = jnp.einsum("tbi,dig->dtbg",
                                layer_in.astype(self.mxu_dtype),
                                self.wih_pad[layer],
                                preferred_element_type=jnp.float32)
            else:
                # layer_in is the previous layer's padded bf16 output
                # (dirs, Tp, Bp, Hp); zero weight rows absorb the pad columns.
                gi = jnp.einsum("etbh,dehg->dtbg", layer_in,
                                self.wih_pad[layer],
                                preferred_element_type=jnp.float32)
            gi = gi + self.bih_pad[layer]
            # Padded timesteps: force z == 1 so h passes through unchanged.
            gi = gi.at[:, T:, :, Hp:2 * Hp].set(_PAD_Z)
            gi = gi.astype(self.mxu_dtype)      # bf16 HBM stream to the kernel

            h0 = hidden[layer * dirs:(layer + 1) * dirs]        # (dirs, B, H)
            h0 = jnp.pad(h0, ((0, 0), (0, Bp - B), (0, Hp - H)))

            last = layer == self.layers - 1
            out, hN = _run_gru_layer(
                gi, self.whh_pad[layer], self.bhh_pad[layer], h0,
                time_block=Tb,
                out_dtype=jnp.float32 if last else self.mxu_dtype)
            finals.append(hN[:, :B, :H])
            layer_in = out                       # (dirs, Tp, Bp, Hp)

        output = jnp.concatenate(
            [layer_in[d, :T, :B, :H] for d in range(dirs)], axis=-1)
        h_n = jnp.concatenate(finals, axis=0)
        return output, h_n


def _gru_reference(x, params, hidden, layers, dirs, H, mxu_dtype):
    """Pure-JAX reference (torch.nn.GRU semantics); matmul operands cast to
    mxu_dtype to mirror the kernel's MXU precision, everything else f32."""
    def mm(a, b):
        return jnp.dot(a.astype(mxu_dtype), b.astype(mxu_dtype),
                       preferred_element_type=jnp.float32)

    layer_in = x
    finals = []
    for layer in range(layers):
        outs = []
        for d in range(dirs):
            p = params[layer * dirs + d]
            h = hidden[layer * dirs + d]
            xin = layer_in if d == 0 else layer_in[::-1]
            seq = []
            for t in range(xin.shape[0]):
                gi = mm(xin[t], p["w_ih"].T) + p["b_ih"]
                gh = mm(h, p["w_hh"].T) + p["b_hh"]
                r = jax.nn.sigmoid(gi[:, :H] + gh[:, :H])
                z = jax.nn.sigmoid(gi[:, H:2 * H] + gh[:, H:2 * H])
                n = jnp.tanh(gi[:, 2 * H:] + r * gh[:, 2 * H:])
                h = (1.0 - z) * n + z * h
                seq.append(h)
            out = jnp.stack(seq)
            if d == 1:
                out = out[::-1]
            outs.append(out)
            finals.append(h)
        layer_in = jnp.concatenate(outs, axis=-1)
    return layer_in, jnp.stack(finals)


if __name__ == "__main__":
    emb_size, hidden_size, layers = 16, 32, 2
    enc = EncDecBasePallas(emb_size, hidden_size, cell_type="GRU",
                           layers=layers, bidir=True,
                           key=jax.random.PRNGKey(0))

    def check(T, B, xkey, tol=4e-2):
        x = jax.random.normal(xkey, (T, B, emb_size), jnp.float32)
        h0 = enc.initHidden(B)
        out, h_n = enc.rnn(x, h0)
        out = jax.block_until_ready(out)
        h_n = jax.block_until_ready(h_n)
        assert out.shape == (T, B, 2 * hidden_size), out.shape
        assert h_n.shape == (layers * 2, B, hidden_size), h_n.shape
        assert bool(jnp.all(jnp.isfinite(out))) and bool(jnp.all(jnp.isfinite(h_n)))
        ref_out, ref_hn = _gru_reference(x, enc.params, h0, layers, 2,
                                         hidden_size, enc.mxu_dtype)
        assert float(jnp.max(jnp.abs(out - ref_out))) < tol
        assert float(jnp.max(jnp.abs(h_n - ref_hn))) < tol

    k1, k2 = jax.random.split(jax.random.PRNGKey(0))
    check(T=8, B=2, xkey=k1)    # Tb == T: single time block per direction
    check(T=19, B=3, xkey=k2)   # Tb = 16: time padded to 32, multi-block carry
    print("KERNEL_OK")
</pallas_src>

<mosaic_0001>
module attributes {stable_mosaic.version = 11 : i64} {
  func.func @_gru_dir_kernel(%arg0: i32, %arg1: i32, %arg2: memref<1x8x8x384xbf16, #tpu.memory_space<vmem>>, %arg3: memref<1x128x384xbf16, #tpu.memory_space<vmem>>, %arg4: memref<1x1x384xf32, #tpu.memory_space<vmem>>, %arg5: memref<1x8x128xf32, #tpu.memory_space<vmem>>, %arg6: memref<1x8x8x128xbf16, #tpu.memory_space<vmem>>, %arg7: memref<1x8x128xf32, #tpu.memory_space<vmem>>, %arg8: memref<8x128xf32, #tpu.memory_space<vmem>>) attributes {dimension_semantics = [#tpu.dimension_semantics<parallel>, #tpu.dimension_semantics<arbitrary>], iteration_bounds = array<i64: 2, 1>, scalar_prefetch = 0 : i64, scratch_operands = 1 : i64, tpu.core_type = #tpu.core_type<tc>, window_params = [{transform_indices = @transform_0, window_bounds = array<i64: 1, 8, 8, 384>}, {transform_indices = @transform_1, window_bounds = array<i64: 1, 128, 384>}, {transform_indices = @transform_2, window_bounds = array<i64: 1, 1, 384>}, {transform_indices = @transform_3, window_bounds = array<i64: 1, 8, 128>}, {transform_indices = @transform_4, window_bounds = array<i64: 1, 8, 8, 128>}, {transform_indices = @transform_5, window_bounds = array<i64: 1, 8, 128>}]} {
    %c0_i32 = arith.constant 0 : i32
    %0 = arith.cmpi eq, %arg1, %c0_i32 : i32
    %1 = arith.extui %0 : i1 to i32
    %c0_i32_0 = arith.constant 0 : i32
    %2 = arith.cmpi ne, %1, %c0_i32_0 : i32
    scf.if %2 {
      %c0_8 = arith.constant 0 : index
      %c0_9 = arith.constant 0 : index
      %c0_10 = arith.constant 0 : index
      %14 = vector.load %arg5[%c0_8, %c0_9, %c0_10] : memref<1x8x128xf32, #tpu.memory_space<vmem>>, vector<1x8x128xf32>
      %15 = vector.shape_cast %14 : vector<1x8x128xf32> to vector<8x128xf32>
      %c0_11 = arith.constant 0 : index
      %c0_12 = arith.constant 0 : index
      %16 = vector.load %arg8[%c0_11, %c0_12] : memref<8x128xf32, #tpu.memory_space<vmem>>, vector<8x128xf32>
      tpu.vector_store %arg8[%c0_11, %c0_12], %15 {strides = array<i32>} : memref<8x128xf32, #tpu.memory_space<vmem>>, vector<8x128xf32>,
    } else {
    }
    %c0 = arith.constant 0 : index
    %c0_1 = arith.constant 0 : index
    %c0_2 = arith.constant 0 : index
    %3 = vector.load %arg4[%c0, %c0_1, %c0_2] : memref<1x1x384xf32, #tpu.memory_space<vmem>>, vector<1x1x384xf32>
    %4 = vector.shape_cast %3 : vector<1x1x384xf32> to vector<1x384xf32>
    %c0_i32_3 = arith.constant 0 : i32
    %5 = arith.cmpi eq, %arg0, %c0_i32_3 : i32
    %6 = arith.extui %5 : i1 to i32
    %c0_i32_4 = arith.constant 0 : i32
    %7 = arith.cmpi ne, %6, %c0_i32_4 : i32
    scf.if %7 {
      %c0_8 = arith.constant 0 : index
      %c0_9 = arith.constant 0 : index
      %14 = vector.load %arg8[%c0_8, %c0_9] : memref<8x128xf32, #tpu.memory_space<vmem>>, vector<8x128xf32>
      %c0_10 = arith.constant 0 : index
      %c0_11 = arith.constant 0 : index
      %c0_12 = arith.constant 0 : index
      %c0_13 = arith.constant 0 : index
      %15 = vector.load %arg2[%c0_10, %c0_11, %c0_12, %c0_13] : memref<1x8x8x384xbf16, #tpu.memory_space<vmem>>, vector<1x1x8x384xbf16>
      %16 = vector.shape_cast %15 : vector<1x1x8x384xbf16> to vector<8x384xbf16>
      %17 = arith.extf %16 : vector<8x384xbf16> to vector<8x384xf32>
      %18 = arith.truncf %14 : vector<8x128xf32> to vector<8x128xbf16>
      %c0_14 = arith.constant 0 : index
      %c0_15 = arith.constant 0 : index
      %c0_16 = arith.constant 0 : index
      %19 = vector.load %arg3[%c0_14, %c0_15, %c0_16] : memref<1x128x384xbf16, #tpu.memory_space<vmem>>, vector<1x128x384xbf16>
      %20 = vector.shape_cast %19 : vector<1x128x384xbf16> to vector<128x384xbf16>
      %cst = arith.constant dense<0.000000e+00> : vector<8x384xf32>
      %21 = tpu.matmul %18, %20, %cst {dimension_numbers = #tpu.dot_dimension_numbers<[1], [0], [0], [1], [0, 0, 1, 1], [], []>} : vector<8x128xbf16>, vector<128x384xbf16>, vector<8x384xf32> -> vector<8x384xf32>
      %22 = vector.broadcast %4 : vector<1x384xf32> to vector<8x384xf32>
      %23 = arith.addf %21, %22 : vector<8x384xf32>
      %24 = vector.extract_strided_slice %17 {offsets = [0, 0], sizes = [8, 128], strides = [1, 1]} : vector<8x384xf32> to vector<8x128xf32>
      %25 = vector.extract_strided_slice %23 {offsets = [0, 0], sizes = [8, 128], strides = [1, 1]} : vector<8x384xf32> to vector<8x128xf32>
      %26 = arith.addf %24, %25 : vector<8x128xf32>
      %27 = arith.negf %26 : vector<8x128xf32>
      %28 = math.exp %27 : vector<8x128xf32>
      %cst_17 = arith.constant 1.000000e+00 : f32
      %29 = vector.broadcast %cst_17 : f32 to vector<8x128xf32>
      %30 = arith.addf %29, %28 : vector<8x128xf32>
      %31 = arith.divf %29, %30 : vector<8x128xf32>
      %32 = vector.extract_strided_slice %17 {offsets = [0, 128], sizes = [8, 128], strides = [1, 1]} : vector<8x384xf32> to vector<8x128xf32>
      %33 = vector.extract_strided_slice %23 {offsets = [0, 128], sizes = [8, 128], strides = [1, 1]} : vector<8x384xf32> to vector<8x128xf32>
      %34 = arith.addf %32, %33 : vector<8x128xf32>
      %35 = arith.negf %34 : vector<8x128xf32>
      %36 = math.exp %35 : vector<8x128xf32>
      %cst_18 = arith.constant 1.000000e+00 : f32
      %37 = vector.broadcast %cst_18 : f32 to vector<8x128xf32>
      %38 = arith.addf %37, %36 : vector<8x128xf32>
      %39 = arith.divf %37, %38 : vector<8x128xf32>
      %40 = vector.extract_strided_slice %17 {offsets = [0, 256], sizes = [8, 128], strides = [1, 1]} : vector<8x384xf32> to vector<8x128xf32>
      %41 = vector.extract_strided_slice %23 {offsets = [0, 256], sizes = [8, 128], strides = [1, 1]} : vector<8x384xf32> to vector<8x128xf32>
      %42 = arith.mulf %31, %41 : vector<8x128xf32>
      %43 = arith.addf %40, %42 : vector<8x128xf32>
      %44 = math.tanh %43 : vector<8x128xf32>
      %cst_19 = arith.constant 1.000000e+00 : f32
      %45 = vector.broadcast %cst_19 : f32 to vector<8x128xf32>
      %46 = arith.subf %45, %39 : vector<8x128xf32>
      %47 = arith.mulf %46, %44 : vector<8x128xf32>
      %48 = arith.mulf %39, %14 : vector<8x128xf32>
      %49 = arith.addf %47, %48 : vector<8x128xf32>
      %50 = arith.truncf %49 : vector<8x128xf32> to vector<8x128xbf16>
      %c0_20 = arith.constant 0 : index
      %c0_21 = arith.constant 0 : index
      %c0_22 = arith.constant 0 : index
      %c0_23 = arith.constant 0 : index
      %51 = vector.load %arg6[%c0_20, %c0_21, %c0_22, %c0_23] : memref<1x8x8x128xbf16, #tpu.memory_space<vmem>>, vector<1x1x8x128xbf16>
      %52 = vector.shape_cast %51 : vector<1x1x8x128xbf16> to vector<8x128xbf16>
      %53 = vector.shape_cast %50 : vector<8x128xbf16> to vector<1x1x8x128xbf16>
      tpu.vector_store %arg6[%c0_20, %c0_21, %c0_22, %c0_23], %53 {strides = array<i32>} : memref<1x8x8x128xbf16, #tpu.memory_space<vmem>>, vector<1x1x8x128xbf16>,
      %c0_24 = arith.constant 0 : index
      %c1 = arith.constant 1 : index
      %c0_25 = arith.constant 0 : index
      %c0_26 = arith.constant 0 : index
      %54 = vector.load %arg2[%c0_24, %c1, %c0_25, %c0_26] : memref<1x8x8x384xbf16, #tpu.memory_space<vmem>>, vector<1x1x8x384xbf16>
      %55 = vector.shape_cast %54 : vector<1x1x8x384xbf16> to vector<8x384xbf16>
      %56 = arith.extf %55 : vector<8x384xbf16> to vector<8x384xf32>
      %57 = arith.truncf %49 : vector<8x128xf32> to vector<8x128xbf16>
      %c0_27 = arith.constant 0 : index
      %c0_28 = arith.constant 0 : index
      %c0_29 = arith.constant 0 : index
      %58 = vector.load %arg3[%c0_27, %c0_28, %c0_29] : memref<1x128x384xbf16, #tpu.memory_space<vmem>>, vector<1x128x384xbf16>
      %59 = vector.shape_cast %58 : vector<1x128x384xbf16> to vector<128x384xbf16>
      %cst_30 = arith.constant dense<0.000000e+00> : vector<8x384xf32>
      %60 = tpu.matmul %57, %59, %cst_30 {dimension_numbers = #tpu.dot_dimension_numbers<[1], [0], [0], [1], [0, 0, 1, 1], [], []>} : vector<8x128xbf16>, vector<128x384xbf16>, vector<8x384xf32> -> vector<8x384xf32>
      %61 = vector.broadcast %4 : vector<1x384xf32> to vector<8x384xf32>
      %62 = arith.addf %60, %61 : vector<8x384xf32>
      %63 = vector.extract_strided_slice %56 {offsets = [0, 0], sizes = [8, 128], strides = [1, 1]} : vector<8x384xf32> to vector<8x128xf32>
      %64 = vector.extract_strided_slice %62 {offsets = [0, 0], sizes = [8, 128], strides = [1, 1]} : vector<8x384xf32> to vector<8x128xf32>
      %65 = arith.addf %63, %64 : vector<8x128xf32>
      %66 = arith.negf %65 : vector<8x128xf32>
      %67 = math.exp %66 : vector<8x128xf32>
      %cst_31 = arith.constant 1.000000e+00 : f32
      %68 = vector.broadcast %cst_31 : f32 to vector<8x128xf32>
      %69 = arith.addf %68, %67 : vector<8x128xf32>
      %70 = arith.divf %68, %69 : vector<8x128xf32>
      %71 = vector.extract_strided_slice %56 {offsets = [0, 128], sizes = [8, 128], strides = [1, 1]} : vector<8x384xf32> to vector<8x128xf32>
      %72 = vector.extract_strided_slice %62 {offsets = [0, 128], sizes = [8, 128], strides = [1, 1]} : vector<8x384xf32> to vector<8x128xf32>
      %73 = arith.addf %71, %72 : vector<8x128xf32>
      %74 = arith.negf %73 : vector<8x128xf32>
      %75 = math.exp %74 : vector<8x128xf32>
      %cst_32 = arith.constant 1.000000e+00 : f32
      %76 = vector.broadcast %cst_32 : f32 to vector<8x128xf32>
      %77 = arith.addf %76, %75 : vector<8x128xf32>
      %78 = arith.divf %76, %77 : vector<8x128xf32>
      %79 = vector.extract_strided_slice %56 {offsets = [0, 256], sizes = [8, 128], strides = [1, 1]} : vector<8x384xf32> to vector<8x128xf32>
      %80 = vector.extract_strided_slice %62 {offsets = [0, 256], sizes = [8, 128], strides = [1, 1]} : vector<8x384xf32> to vector<8x128xf32>
      %81 = arith.mulf %70, %80 : vector<8x128xf32>
      %82 = arith.addf %79, %81 : vector<8x128xf32>
      %83 = math.tanh %82 : vector<8x128xf32>
      %cst_33 = arith.constant 1.000000e+00 : f32
      %84 = vector.broadcast %cst_33 : f32 to vector<8x128xf32>
      %85 = arith.subf %84, %78 : vector<8x128xf32>
      %86 = arith.mulf %85, %83 : vector<8x128xf32>
      %87 = arith.mulf %78, %49 : vector<8x128xf32>
      %88 = arith.addf %86, %87 : vector<8x128xf32>
      %89 = arith.truncf %88 : vector<8x128xf32> to vector<8x128xbf16>
      %c0_34 = arith.constant 0 : index
      %c1_35 = arith.constant 1 : index
      %c0_36 = arith.constant 0 : index
      %c0_37 = arith.constant 0 : index
      %90 = vector.load %arg6[%c0_34, %c1_35, %c0_36, %c0_37] : memref<1x8x8x128xbf16, #tpu.memory_space<vmem>>, vector<1x1x8x128xbf16>
      %91 = vector.shape_cast %90 : vector<1x1x8x128xbf16> to vector<8x128xbf16>
      %92 = vector.shape_cast %89 : vector<8x128xbf16> to vector<1x1x8x128xbf16>
      tpu.vector_store %arg6[%c0_34, %c1_35, %c0_36, %c0_37], %92 {strides = array<i32>} : memref<1x8x8x128xbf16, #tpu.memory_space<vmem>>, vector<1x1x8x128xbf16>,
      %c0_38 = arith.constant 0 : index
      %c2 = arith.constant 2 : index
      %c0_39 = arith.constant 0 : index
      %c0_40 = arith.constant 0 : index
      %93 = vector.load %arg2[%c0_38, %c2, %c0_39, %c0_40] : memref<1x8x8x384xbf16, #tpu.memory_space<vmem>>, vector<1x1x8x384xbf16>
      %94 = vector.shape_cast %93 : vector<1x1x8x384xbf16> to vector<8x384xbf16>
      %95 = arith.extf %94 : vector<8x384xbf16> to vector<8x384xf32>
      %96 = arith.truncf %88 : vector<8x128xf32> to vector<8x128xbf16>
      %c0_41 = arith.constant 0 : index
      %c0_42 = arith.constant 0 : index
      %c0_43 = arith.constant 0 : index
      %97 = vector.load %arg3[%c0_41, %c0_42, %c0_43] : memref<1x128x384xbf16, #tpu.memory_space<vmem>>, vector<1x128x384xbf16>
      %98 = vector.shape_cast %97 : vector<1x128x384xbf16> to vector<128x384xbf16>
      %cst_44 = arith.constant dense<0.000000e+00> : vector<8x384xf32>
      %99 = tpu.matmul %96, %98, %cst_44 {dimension_numbers = #tpu.dot_dimension_numbers<[1], [0], [0], [1], [0, 0, 1, 1], [], []>} : vector<8x128xbf16>, vector<128x384xbf16>, vector<8x384xf32> -> vector<8x384xf32>
      %100 = vector.broadcast %4 : vector<1x384xf32> to vector<8x384xf32>
      %101 = arith.addf %99, %100 : vector<8x384xf32>
      %102 = vector.extract_strided_slice %95 {offsets = [0, 0], sizes = [8, 128], strides = [1, 1]} : vector<8x384xf32> to vector<8x128xf32>
      %103 = vector.extract_strided_slice %101 {offsets = [0, 0], sizes = [8, 128], strides = [1, 1]} : vector<8x384xf32> to vector<8x128xf32>
      %104 = arith.addf %102, %103 : vector<8x128xf32>
      %105 = arith.negf %104 : vector<8x128xf32>
      %106 = math.exp %105 : vector<8x128xf32>
      %cst_45 = arith.constant 1.000000e+00 : f32
      %107 = vector.broadcast %cst_45 : f32 to vector<8x128xf32>
      %108 = arith.addf %107, %106 : vector<8x128xf32>
      %109 = arith.divf %107, %108 : vector<8x128xf32>
      %110 = vector.extract_strided_slice %95 {offsets = [0, 128], sizes = [8, 128], strides = [1, 1]} : vector<8x384xf32> to vector<8x128xf32>
      %111 = vector.extract_strided_slice %101 {offsets = [0, 128], sizes = [8, 128], strides = [1, 1]} : vector<8x384xf32> to vector<8x128xf32>
      %112 = arith.addf %110, %111 : vector<8x128xf32>
      %113 = arith.negf %112 : vector<8x128xf32>
      %114 = math.exp %113 : vector<8x128xf32>
      %cst_46 = arith.constant 1.000000e+00 : f32
      %115 = vector.broadcast %cst_46 : f32 to vector<8x128xf32>
      %116 = arith.addf %115, %114 : vector<8x128xf32>
      %117 = arith.divf %115, %116 : vector<8x128xf32>
      %118 = vector.extract_strided_slice %95 {offsets = [0, 256], sizes = [8, 128], strides = [1, 1]} : vector<8x384xf32> to vector<8x128xf32>
      %119 = vector.extract_strided_slice %101 {offsets = [0, 256], sizes = [8, 128], strides = [1, 1]} : vector<8x384xf32> to vector<8x128xf32>
      %120 = arith.mulf %109, %119 : vector<8x128xf32>
      %121 = arith.addf %118, %120 : vector<8x128xf32>
      %122 = math.tanh %121 : vector<8x128xf32>
      %cst_47 = arith.constant 1.000000e+00 : f32
      %123 = vector.broadcast %cst_47 : f32 to vector<8x128xf32>
      %124 = arith.subf %123, %117 : vector<8x128xf32>
      %125 = arith.mulf %124, %122 : vector<8x128xf32>
      %126 = arith.mulf %117, %88 : vector<8x128xf32>
      %127 = arith.addf %125, %126 : vector<8x128xf32>
      %128 = arith.truncf %127 : vector<8x128xf32> to vector<8x128xbf16>
      %c0_48 = arith.constant 0 : index
      %c2_49 = arith.constant 2 : index
      %c0_50 = arith.constant 0 : index
      %c0_51 = arith.constant 0 : index
      %129 = vector.load %arg6[%c0_48, %c2_49, %c0_50, %c0_51] : memref<1x8x8x128xbf16, #tpu.memory_space<vmem>>, vector<1x1x8x128xbf16>
      %130 = vector.shape_cast %129 : vector<1x1x8x128xbf16> to vector<8x128xbf16>
      %131 = vector.shape_cast %128 : vector<8x128xbf16> to vector<1x1x8x128xbf16>
      tpu.vector_store %arg6[%c0_48, %c2_49, %c0_50, %c0_51], %131 {strides = array<i32>} : memref<1x8x8x128xbf16, #tpu.memory_space<vmem>>, vector<1x1x8x128xbf16>,
      %c0_52 = arith.constant 0 : index
      %c3 = arith.constant 3 : index
      %c0_53 = arith.constant 0 : index
      %c0_54 = arith.constant 0 : index
      %132 = vector.load %arg2[%c0_52, %c3, %c0_53, %c0_54] : memref<1x8x8x384xbf16, #tpu.memory_space<vmem>>, vector<1x1x8x384xbf16>
      %133 = vector.shape_cast %132 : vector<1x1x8x384xbf16> to vector<8x384xbf16>
      %134 = arith.extf %133 : vector<8x384xbf16> to vector<8x384xf32>
      %135 = arith.truncf %127 : vector<8x128xf32> to vector<8x128xbf16>
      %c0_55 = arith.constant 0 : index
      %c0_56 = arith.constant 0 : index
      %c0_57 = arith.constant 0 : index
      %136 = vector.load %arg3[%c0_55, %c0_56, %c0_57] : memref<1x128x384xbf16, #tpu.memory_space<vmem>>, vector<1x128x384xbf16>
      %137 = vector.shape_cast %136 : vector<1x128x384xbf16> to vector<128x384xbf16>
      %cst_58 = arith.constant dense<0.000000e+00> : vector<8x384xf32>
      %138 = tpu.matmul %135, %137, %cst_58 {dimension_numbers = #tpu.dot_dimension_numbers<[1], [0], [0], [1], [0, 0, 1, 1], [], []>} : vector<8x128xbf16>, vector<128x384xbf16>, vector<8x384xf32> -> vector<8x384xf32>
      %139 = vector.broadcast %4 : vector<1x384xf32> to vector<8x384xf32>
      %140 = arith.addf %138, %139 : vector<8x384xf32>
      %141 = vector.extract_strided_slice %134 {offsets = [0, 0], sizes = [8, 128], strides = [1, 1]} : vector<8x384xf32> to vector<8x128xf32>
      %142 = vector.extract_strided_slice %140 {offsets = [0, 0], sizes = [8, 128], strides = [1, 1]} : vector<8x384xf32> to vector<8x128xf32>
      %143 = arith.addf %141, %142 : vector<8x128xf32>
      %144 = arith.negf %143 : vector<8x128xf32>
      %145 = math.exp %144 : vector<8x128xf32>
      %cst_59 = arith.constant 1.000000e+00 : f32
      %146 = vector.broadcast %cst_59 : f32 to vector<8x128xf32>
      %147 = arith.addf %146, %145 : vector<8x128xf32>
      %148 = arith.divf %146, %147 : vector<8x128xf32>
      %149 = vector.extract_strided_slice %134 {offsets = [0, 128], sizes = [8, 128], strides = [1, 1]} : vector<8x384xf32> to vector<8x128xf32>
      %150 = vector.extract_strided_slice %140 {offsets = [0, 128], sizes = [8, 128], strides = [1, 1]} : vector<8x384xf32> to vector<8x128xf32>
      %151 = arith.addf %149, %150 : vector<8x128xf32>
      %152 = arith.negf %151 : vector<8x128xf32>
      %153 = math.exp %152 : vector<8x128xf32>
      %cst_60 = arith.constant 1.000000e+00 : f32
      %154 = vector.broadcast %cst_60 : f32 to vector<8x128xf32>
      %155 = arith.addf %154, %153 : vector<8x128xf32>
      %156 = arith.divf %154, %155 : vector<8x128xf32>
      %157 = vector.extract_strided_slice %134 {offsets = [0, 256], sizes = [8, 128], strides = [1, 1]} : vector<8x384xf32> to vector<8x128xf32>
      %158 = vector.extract_strided_slice %140 {offsets = [0, 256], sizes = [8, 128], strides = [1, 1]} : vector<8x384xf32> to vector<8x128xf32>
      %159 = arith.mulf %148, %158 : vector<8x128xf32>
      %160 = arith.addf %157, %159 : vector<8x128xf32>
      %161 = math.tanh %160 : vector<8x128xf32>
      %cst_61 = arith.constant 1.000000e+00 : f32
      %162 = vector.broadcast %cst_61 : f32 to vector<8x128xf32>
      %163 = arith.subf %162, %156 : vector<8x128xf32>
      %164 = arith.mulf %163, %161 : vector<8x128xf32>
      %165 = arith.mulf %156, %127 : vector<8x128xf32>
      %166 = arith.addf %164, %165 : vector<8x128xf32>
      %167 = arith.truncf %166 : vector<8x128xf32> to vector<8x128xbf16>
      %c0_62 = arith.constant 0 : index
      %c3_63 = arith.constant 3 : index
      %c0_64 = arith.constant 0 : index
      %c0_65 = arith.constant 0 : index
      %168 = vector.load %arg6[%c0_62, %c3_63, %c0_64, %c0_65] : memref<1x8x8x128xbf16, #tpu.memory_space<vmem>>, vector<1x1x8x128xbf16>
      %169 = vector.shape_cast %168 : vector<1x1x8x128xbf16> to vector<8x128xbf16>
      %170 = vector.shape_cast %167 : vector<8x128xbf16> to vector<1x1x8x128xbf16>
      tpu.vector_store %arg6[%c0_62, %c3_63, %c0_64, %c0_65], %170 {strides = array<i32>} : memref<1x8x8x128xbf16, #tpu.memory_space<vmem>>, vector<1x1x8x128xbf16>,
      %c0_66 = arith.constant 0 : index
      %c4 = arith.constant 4 : index
      %c0_67 = arith.constant 0 : index
      %c0_68 = arith.constant 0 : index
      %171 = vector.load %arg2[%c0_66, %c4, %c0_67, %c0_68] : memref<1x8x8x384xbf16, #tpu.memory_space<vmem>>, vector<1x1x8x384xbf16>
      %172 = vector.shape_cast %171 : vector<1x1x8x384xbf16> to vector<8x384xbf16>
      %173 = arith.extf %172 : vector<8x384xbf16> to vector<8x384xf32>
      %174 = arith.truncf %166 : vector<8x128xf32> to vector<8x128xbf16>
      %c0_69 = arith.constant 0 : index
      %c0_70 = arith.constant 0 : index
      %c0_71 = arith.constant 0 : index
      %175 = vector.load %arg3[%c0_69, %c0_70, %c0_71] : memref<1x128x384xbf16, #tpu.memory_space<vmem>>, vector<1x128x384xbf16>
      %176 = vector.shape_cast %175 : vector<1x128x384xbf16> to vector<128x384xbf16>
      %cst_72 = arith.constant dense<0.000000e+00> : vector<8x384xf32>
      %177 = tpu.matmul %174, %176, %cst_72 {dimension_numbers = #tpu.dot_dimension_numbers<[1], [0], [0], [1], [0, 0, 1, 1], [], []>} : vector<8x128xbf16>, vector<128x384xbf16>, vector<8x384xf32> -> vector<8x384xf32>
      %178 = vector.broadcast %4 : vector<1x384xf32> to vector<8x384xf32>
      %179 = arith.addf %177, %178 : vector<8x384xf32>
      %180 = vector.extract_strided_slice %173 {offsets = [0, 0], sizes = [8, 128], strides = [1, 1]} : vector<8x384xf32> to vector<8x128xf32>
      %181 = vector.extract_strided_slice %179 {offsets = [0, 0], sizes = [8, 128], strides = [1, 1]} : vector<8x384xf32> to vector<8x128xf32>
      %182 = arith.addf %180, %181 : vector<8x128xf32>
      %183 = arith.negf %182 : vector<8x128xf32>
      %184 = math.exp %183 : vector<8x128xf32>
      %cst_73 = arith.constant 1.000000e+00 : f32
      %185 = vector.broadcast %cst_73 : f32 to vector<8x128xf32>
      %186 = arith.addf %185, %184 : vector<8x128xf32>
      %187 = arith.divf %185, %186 : vector<8x128xf32>
      %188 = vector.extract_strided_slice %173 {offsets = [0, 128], sizes = [8, 128], strides = [1, 1]} : vector<8x384xf32> to vector<8x128xf32>
      %189 = vector.extract_strided_slice %179 {offsets = [0, 128], sizes = [8, 128], strides = [1, 1]} : vector<8x384xf32> to vector<8x128xf32>
      %190 = arith.addf %188, %189 : vector<8x128xf32>
      %191 = arith.negf %190 : vector<8x128xf32>
      %192 = math.exp %191 : vector<8x128xf32>
      %cst_74 = arith.constant 1.000000e+00 : f32
      %193 = vector.broadcast %cst_74 : f32 to vector<8x128xf32>
      %194 = arith.addf %193, %192 : vector<8x128xf32>
      %195 = arith.divf %193, %194 : vector<8x128xf32>
      %196 = vector.extract_strided_slice %173 {offsets = [0, 256], sizes = [8, 128], strides = [1, 1]} : vector<8x384xf32> to vector<8x128xf32>
      %197 = vector.extract_strided_slice %179 {offsets = [0, 256], sizes = [8, 128], strides = [1, 1]} : vector<8x384xf32> to vector<8x128xf32>
      %198 = arith.mulf %187, %197 : vector<8x128xf32>
      %199 = arith.addf %196, %198 : vector<8x128xf32>
      %200 = math.tanh %199 : vector<8x128xf32>
      %cst_75 = arith.constant 1.000000e+00 : f32
      %201 = vector.broadcast %cst_75 : f32 to vector<8x128xf32>
      %202 = arith.subf %201, %195 : vector<8x128xf32>
      %203 = arith.mulf %202, %200 : vector<8x128xf32>
      %204 = arith.mulf %195, %166 : vector<8x128xf32>
      %205 = arith.addf %203, %204 : vector<8x128xf32>
      %206 = arith.truncf %205 : vector<8x128xf32> to vector<8x128xbf16>
      %c0_76 = arith.constant 0 : index
      %c4_77 = arith.constant 4 : index
      %c0_78 = arith.constant 0 : index
      %c0_79 = arith.constant 0 : index
      %207 = vector.load %arg6[%c0_76, %c4_77, %c0_78, %c0_79] : memref<1x8x8x128xbf16, #tpu.memory_space<vmem>>, vector<1x1x8x128xbf16>
      %208 = vector.shape_cast %207 : vector<1x1x8x128xbf16> to vector<8x128xbf16>
      %209 = vector.shape_cast %206 : vector<8x128xbf16> to vector<1x1x8x128xbf16>
      tpu.vector_store %arg6[%c0_76, %c4_77, %c0_78, %c0_79], %209 {strides = array<i32>} : memref<1x8x8x128xbf16, #tpu.memory_space<vmem>>, vector<1x1x8x128xbf16>,
      %c0_80 = arith.constant 0 : index
      %c5 = arith.constant 5 : index
      %c0_81 = arith.constant 0 : index
      %c0_82 = arith.constant 0 : index
      %210 = vector.load %arg2[%c0_80, %c5, %c0_81, %c0_82] : memref<1x8x8x384xbf16, #tpu.memory_space<vmem>>, vector<1x1x8x384xbf16>
      %211 = vector.shape_cast %210 : vector<1x1x8x384xbf16> to vector<8x384xbf16>
      %212 = arith.extf %211 : vector<8x384xbf16> to vector<8x384xf32>
      %213 = arith.truncf %205 : vector<8x128xf32> to vector<8x128xbf16>
      %c0_83 = arith.constant 0 : index
      %c0_84 = arith.constant 0 : index
      %c0_85 = arith.constant 0 : index
      %214 = vector.load %arg3[%c0_83, %c0_84, %c0_85] : memref<1x128x384xbf16, #tpu.memory_space<vmem>>, vector<1x128x384xbf16>
      %215 = vector.shape_cast %214 : vector<1x128x384xbf16> to vector<128x384xbf16>
      %cst_86 = arith.constant dense<0.000000e+00> : vector<8x384xf32>
      %216 = tpu.matmul %213, %215, %cst_86 {dimension_numbers = #tpu.dot_dimension_numbers<[1], [0], [0], [1], [0, 0, 1, 1], [], []>} : vector<8x128xbf16>, vector<128x384xbf16>, vector<8x384xf32> -> vector<8x384xf32>
      %217 = vector.broadcast %4 : vector<1x384xf32> to vector<8x384xf32>
      %218 = arith.addf %216, %217 : vector<8x384xf32>
      %219 = vector.extract_strided_slice %212 {offsets = [0, 0], sizes = [8, 128], strides = [1, 1]} : vector<8x384xf32> to vector<8x128xf32>
      %220 = vector.extract_strided_slice %218 {offsets = [0, 0], sizes = [8, 128], strides = [1, 1]} : vector<8x384xf32> to vector<8x128xf32>
      %221 = arith.addf %219, %220 : vector<8x128xf32>
      %222 = arith.negf %221 : vector<8x128xf32>
      %223 = math.exp %222 : vector<8x128xf32>
      %cst_87 = arith.constant 1.000000e+00 : f32
      %224 = vector.broadcast %cst_87 : f32 to vector<8x128xf32>
      %225 = arith.addf %224, %223 : vector<8x128xf32>
      %226 = arith.divf %224, %225 : vector<8x128xf32>
      %227 = vector.extract_strided_slice %212 {offsets = [0, 128], sizes = [8, 128], strides = [1, 1]} : vector<8x384xf32> to vector<8x128xf32>
      %228 = vector.extract_strided_slice %218 {offsets = [0, 128], sizes = [8, 128], strides = [1, 1]} : vector<8x384xf32> to vector<8x128xf32>
      %229 = arith.addf %227, %228 : vector<8x128xf32>
      %230 = arith.negf %229 : vector<8x128xf32>
      %231 = math.exp %230 : vector<8x128xf32>
      %cst_88 = arith.constant 1.000000e+00 : f32
      %232 = vector.broadcast %cst_88 : f32 to vector<8x128xf32>
      %233 = arith.addf %232, %231 : vector<8x128xf32>
      %234 = arith.divf %232, %233 : vector<8x128xf32>
      %235 = vector.extract_strided_slice %212 {offsets = [0, 256], sizes = [8, 128], strides = [1, 1]} : vector<8x384xf32> to vector<8x128xf32>
      %236 = vector.extract_strided_slice %218 {offsets = [0, 256], sizes = [8, 128], strides = [1, 1]} : vector<8x384xf32> to vector<8x128xf32>
      %237 = arith.mulf %226, %236 : vector<8x128xf32>
      %238 = arith.addf %235, %237 : vector<8x128xf32>
      %239 = math.tanh %238 : vector<8x128xf32>
      %cst_89 = arith.constant 1.000000e+00 : f32
      %240 = vector.broadcast %cst_89 : f32 to vector<8x128xf32>
      %241 = arith.subf %240, %234 : vector<8x128xf32>
      %242 = arith.mulf %241, %239 : vector<8x128xf32>
      %243 = arith.mulf %234, %205 : vector<8x128xf32>
      %244 = arith.addf %242, %243 : vector<8x128xf32>
      %245 = arith.truncf %244 : vector<8x128xf32> to vector<8x128xbf16>
      %c0_90 = arith.constant 0 : index
      %c5_91 = arith.constant 5 : index
      %c0_92 = arith.constant 0 : index
      %c0_93 = arith.constant 0 : index
      %246 = vector.load %arg6[%c0_90, %c5_91, %c0_92, %c0_93] : memref<1x8x8x128xbf16, #tpu.memory_space<vmem>>, vector<1x1x8x128xbf16>
      %247 = vector.shape_cast %246 : vector<1x1x8x128xbf16> to vector<8x128xbf16>
      %248 = vector.shape_cast %245 : vector<8x128xbf16> to vector<1x1x8x128xbf16>
      tpu.vector_store %arg6[%c0_90, %c5_91, %c0_92, %c0_93], %248 {strides = array<i32>} : memref<1x8x8x128xbf16, #tpu.memory_space<vmem>>, vector<1x1x8x128xbf16>,
      %c0_94 = arith.constant 0 : index
      %c6 = arith.constant 6 : index
      %c0_95 = arith.constant 0 : index
      %c0_96 = arith.constant 0 : index
      %249 = vector.load %arg2[%c0_94, %c6, %c0_95, %c0_96] : memref<1x8x8x384xbf16, #tpu.memory_space<vmem>>, vector<1x1x8x384xbf16>
      %250 = vector.shape_cast %249 : vector<1x1x8x384xbf16> to vector<8x384xbf16>
      %251 = arith.extf %250 : vector<8x384xbf16> to vector<8x384xf32>
      %252 = arith.truncf %244 : vector<8x128xf32> to vector<8x128xbf16>
      %c0_97 = arith.constant 0 : index
      %c0_98 = arith.constant 0 : index
      %c0_99 = arith.constant 0 : index
      %253 = vector.load %arg3[%c0_97, %c0_98, %c0_99] : memref<1x128x384xbf16, #tpu.memory_space<vmem>>, vector<1x128x384xbf16>
      %254 = vector.shape_cast %253 : vector<1x128x384xbf16> to vector<128x384xbf16>
      %cst_100 = arith.constant dense<0.000000e+00> : vector<8x384xf32>
      %255 = tpu.matmul %252, %254, %cst_100 {dimension_numbers = #tpu.dot_dimension_numbers<[1], [0], [0], [1], [0, 0, 1, 1], [], []>} : vector<8x128xbf16>, vector<128x384xbf16>, vector<8x384xf32> -> vector<8x384xf32>
      %256 = vector.broadcast %4 : vector<1x384xf32> to vector<8x384xf32>
      %257 = arith.addf %255, %256 : vector<8x384xf32>
      %258 = vector.extract_strided_slice %251 {offsets = [0, 0], sizes = [8, 128], strides = [1, 1]} : vector<8x384xf32> to vector<8x128xf32>
      %259 = vector.extract_strided_slice %257 {offsets = [0, 0], sizes = [8, 128], strides = [1, 1]} : vector<8x384xf32> to vector<8x128xf32>
      %260 = arith.addf %258, %259 : vector<8x128xf32>
      %261 = arith.negf %260 : vector<8x128xf32>
      %262 = math.exp %261 : vector<8x128xf32>
      %cst_101 = arith.constant 1.000000e+00 : f32
      %263 = vector.broadcast %cst_101 : f32 to vector<8x128xf32>
      %264 = arith.addf %263, %262 : vector<8x128xf32>
      %265 = arith.divf %263, %264 : vector<8x128xf32>
      %266 = vector.extract_strided_slice %251 {offsets = [0, 128], sizes = [8, 128], strides = [1, 1]} : vector<8x384xf32> to vector<8x128xf32>
      %267 = vector.extract_strided_slice %257 {offsets = [0, 128], sizes = [8, 128], strides = [1, 1]} : vector<8x384xf32> to vector<8x128xf32>
      %268 = arith.addf %266, %267 : vector<8x128xf32>
      %269 = arith.negf %268 : vector<8x128xf32>
      %270 = math.exp %269 : vector<8x128xf32>
      %cst_102 = arith.constant 1.000000e+00 : f32
      %271 = vector.broadcast %cst_102 : f32 to vector<8x128xf32>
      %272 = arith.addf %271, %270 : vector<8x128xf32>
      %273 = arith.divf %271, %272 : vector<8x128xf32>
      %274 = vector.extract_strided_slice %251 {offsets = [0, 256], sizes = [8, 128], strides = [1, 1]} : vector<8x384xf32> to vector<8x128xf32>
      %275 = vector.extract_strided_slice %257 {offsets = [0, 256], sizes = [8, 128], strides = [1, 1]} : vector<8x384xf32> to vector<8x128xf32>
      %276 = arith.mulf %265, %275 : vector<8x128xf32>
      %277 = arith.addf %274, %276 : vector<8x128xf32>
      %278 = math.tanh %277 : vector<8x128xf32>
      %cst_103 = arith.constant 1.000000e+00 : f32
      %279 = vector.broadcast %cst_103 : f32 to vector<8x128xf32>
      %280 = arith.subf %279, %273 : vector<8x128xf32>
      %281 = arith.mulf %280, %278 : vector<8x128xf32>
      %282 = arith.mulf %273, %244 : vector<8x128xf32>
      %283 = arith.addf %281, %282 : vector<8x128xf32>
      %284 = arith.truncf %283 : vector<8x128xf32> to vector<8x128xbf16>
      %c0_104 = arith.constant 0 : index
      %c6_105 = arith.constant 6 : index
      %c0_106 = arith.constant 0 : index
      %c0_107 = arith.constant 0 : index
      %285 = vector.load %arg6[%c0_104, %c6_105, %c0_106, %c0_107] : memref<1x8x8x128xbf16, #tpu.memory_space<vmem>>, vector<1x1x8x128xbf16>
      %286 = vector.shape_cast %285 : vector<1x1x8x128xbf16> to vector<8x128xbf16>
      %287 = vector.shape_cast %284 : vector<8x128xbf16> to vector<1x1x8x128xbf16>
      tpu.vector_store %arg6[%c0_104, %c6_105, %c0_106, %c0_107], %287 {strides = array<i32>} : memref<1x8x8x128xbf16, #tpu.memory_space<vmem>>, vector<1x1x8x128xbf16>,
      %c0_108 = arith.constant 0 : index
      %c7 = arith.constant 7 : index
      %c0_109 = arith.constant 0 : index
      %c0_110 = arith.constant 0 : index
      %288 = vector.load %arg2[%c0_108, %c7, %c0_109, %c0_110] : memref<1x8x8x384xbf16, #tpu.memory_space<vmem>>, vector<1x1x8x384xbf16>
      %289 = vector.shape_cast %288 : vector<1x1x8x384xbf16> to vector<8x384xbf16>
      %290 = arith.extf %289 : vector<8x384xbf16> to vector<8x384xf32>
      %291 = arith.truncf %283 : vector<8x128xf32> to vector<8x128xbf16>
      %c0_111 = arith.constant 0 : index
      %c0_112 = arith.constant 0 : index
      %c0_113 = arith.constant 0 : index
      %292 = vector.load %arg3[%c0_111, %c0_112, %c0_113] : memref<1x128x384xbf16, #tpu.memory_space<vmem>>, vector<1x128x384xbf16>
      %293 = vector.shape_cast %292 : vector<1x128x384xbf16> to vector<128x384xbf16>
      %cst_114 = arith.constant dense<0.000000e+00> : vector<8x384xf32>
      %294 = tpu.matmul %291, %293, %cst_114 {dimension_numbers = #tpu.dot_dimension_numbers<[1], [0], [0], [1], [0, 0, 1, 1], [], []>} : vector<8x128xbf16>, vector<128x384xbf16>, vector<8x384xf32> -> vector<8x384xf32>
      %295 = vector.broadcast %4 : vector<1x384xf32> to vector<8x384xf32>
      %296 = arith.addf %294, %295 : vector<8x384xf32>
      %297 = vector.extract_strided_slice %290 {offsets = [0, 0], sizes = [8, 128], strides = [1, 1]} : vector<8x384xf32> to vector<8x128xf32>
      %298 = vector.extract_strided_slice %296 {offsets = [0, 0], sizes = [8, 128], strides = [1, 1]} : vector<8x384xf32> to vector<8x128xf32>
      %299 = arith.addf %297, %298 : vector<8x128xf32>
      %300 = arith.negf %299 : vector<8x128xf32>
      %301 = math.exp %300 : vector<8x128xf32>
      %cst_115 = arith.constant 1.000000e+00 : f32
      %302 = vector.broadcast %cst_115 : f32 to vector<8x128xf32>
      %303 = arith.addf %302, %301 : vector<8x128xf32>
      %304 = arith.divf %302, %303 : vector<8x128xf32>
      %305 = vector.extract_strided_slice %290 {offsets = [0, 128], sizes = [8, 128], strides = [1, 1]} : vector<8x384xf32> to vector<8x128xf32>
      %306 = vector.extract_strided_slice %296 {offsets = [0, 128], sizes = [8, 128], strides = [1, 1]} : vector<8x384xf32> to vector<8x128xf32>
      %307 = arith.addf %305, %306 : vector<8x128xf32>
      %308 = arith.negf %307 : vector<8x128xf32>
      %309 = math.exp %308 : vector<8x128xf32>
      %cst_116 = arith.constant 1.000000e+00 : f32
      %310 = vector.broadcast %cst_116 : f32 to vector<8x128xf32>
      %311 = arith.addf %310, %309 : vector<8x128xf32>
      %312 = arith.divf %310, %311 : vector<8x128xf32>
      %313 = vector.extract_strided_slice %290 {offsets = [0, 256], sizes = [8, 128], strides = [1, 1]} : vector<8x384xf32> to vector<8x128xf32>
      %314 = vector.extract_strided_slice %296 {offsets = [0, 256], sizes = [8, 128], strides = [1, 1]} : vector<8x384xf32> to vector<8x128xf32>
      %315 = arith.mulf %304, %314 : vector<8x128xf32>
      %316 = arith.addf %313, %315 : vector<8x128xf32>
      %317 = math.tanh %316 : vector<8x128xf32>
      %cst_117 = arith.constant 1.000000e+00 : f32
      %318 = vector.broadcast %cst_117 : f32 to vector<8x128xf32>
      %319 = arith.subf %318, %312 : vector<8x128xf32>
      %320 = arith.mulf %319, %317 : vector<8x128xf32>
      %321 = arith.mulf %312, %283 : vector<8x128xf32>
      %322 = arith.addf %320, %321 : vector<8x128xf32>
      %323 = arith.truncf %322 : vector<8x128xf32> to vector<8x128xbf16>
      %c0_118 = arith.constant 0 : index
      %c7_119 = arith.constant 7 : index
      %c0_120 = arith.constant 0 : index
      %c0_121 = arith.constant 0 : index
      %324 = vector.load %arg6[%c0_118, %c7_119, %c0_120, %c0_121] : memref<1x8x8x128xbf16, #tpu.memory_space<vmem>>, vector<1x1x8x128xbf16>
      %325 = vector.shape_cast %324 : vector<1x1x8x128xbf16> to vector<8x128xbf16>
      %326 = vector.shape_cast %323 : vector<8x128xbf16> to vector<1x1x8x128xbf16>
      tpu.vector_store %arg6[%c0_118, %c7_119, %c0_120, %c0_121], %326 {strides = array<i32>} : memref<1x8x8x128xbf16, #tpu.memory_space<vmem>>, vector<1x1x8x128xbf16>,
      %c0_122 = arith.constant 0 : index
      %c0_123 = arith.constant 0 : index
      %327 = vector.load %arg8[%c0_122, %c0_123] : memref<8x128xf32, #tpu.memory_space<vmem>>, vector<8x128xf32>
      tpu.vector_store %arg8[%c0_122, %c0_123], %322 {strides = array<i32>} : memref<8x128xf32, #tpu.memory_space<vmem>>, vector<8x128xf32>,
    } else {
    }
    %c1_i32 = arith.constant 1 : i32
    %8 = arith.cmpi eq, %arg0, %c1_i32 : i32
    %9 = arith.extui %8 : i1 to i32
    %c0_i32_5 = arith.constant 0 : i32
    %10 = arith.cmpi ne, %9, %c0_i32_5 : i32
    scf.if %10 {
      %c0_8 = arith.constant 0 : index
      %c0_9 = arith.constant 0 : index
      %14 = vector.load %arg8[%c0_8, %c0_9] : memref<8x128xf32, #tpu.memory_space<vmem>>, vector<8x128xf32>
      %c0_10 = arith.constant 0 : index
      %c7 = arith.constant 7 : index
      %c0_11 = arith.constant 0 : index
      %c0_12 = arith.constant 0 : index
      %15 = vector.load %arg2[%c0_10, %c7, %c0_11, %c0_12] : memref<1x8x8x384xbf16, #tpu.memory_space<vmem>>, vector<1x1x8x384xbf16>
      %16 = vector.shape_cast %15 : vector<1x1x8x384xbf16> to vector<8x384xbf16>
      %17 = arith.extf %16 : vector<8x384xbf16> to vector<8x384xf32>
      %18 = arith.truncf %14 : vector<8x128xf32> to vector<8x128xbf16>
      %c0_13 = arith.constant 0 : index
      %c0_14 = arith.constant 0 : index
      %c0_15 = arith.constant 0 : index
      %19 = vector.load %arg3[%c0_13, %c0_14, %c0_15] : memref<1x128x384xbf16, #tpu.memory_space<vmem>>, vector<1x128x384xbf16>
      %20 = vector.shape_cast %19 : vector<1x128x384xbf16> to vector<128x384xbf16>
      %cst = arith.constant dense<0.000000e+00> : vector<8x384xf32>
      %21 = tpu.matmul %18, %20, %cst {dimension_numbers = #tpu.dot_dimension_numbers<[1], [0], [0], [1], [0, 0, 1, 1], [], []>} : vector<8x128xbf16>, vector<128x384xbf16>, vector<8x384xf32> -> vector<8x384xf32>
      %22 = vector.broadcast %4 : vector<1x384xf32> to vector<8x384xf32>
      %23 = arith.addf %21, %22 : vector<8x384xf32>
      %24 = vector.extract_strided_slice %17 {offsets = [0, 0], sizes = [8, 128], strides = [1, 1]} : vector<8x384xf32> to vector<8x128xf32>
      %25 = vector.extract_strided_slice %23 {offsets = [0, 0], sizes = [8, 128], strides = [1, 1]} : vector<8x384xf32> to vector<8x128xf32>
      %26 = arith.addf %24, %25 : vector<8x128xf32>
      %27 = arith.negf %26 : vector<8x128xf32>
      %28 = math.exp %27 : vector<8x128xf32>
      %cst_16 = arith.constant 1.000000e+00 : f32
      %29 = vector.broadcast %cst_16 : f32 to vector<8x128xf32>
      %30 = arith.addf %29, %28 : vector<8x128xf32>
      %31 = arith.divf %29, %30 : vector<8x128xf32>
      %32 = vector.extract_strided_slice %17 {offsets = [0, 128], sizes = [8, 128], strides = [1, 1]} : vector<8x384xf32> to vector<8x128xf32>
      %33 = vector.extract_strided_slice %23 {offsets = [0, 128], sizes = [8, 128], strides = [1, 1]} : vector<8x384xf32> to vector<8x128xf32>
      %34 = arith.addf %32, %33 : vector<8x128xf32>
      %35 = arith.negf %34 : vector<8x128xf32>
      %36 = math.exp %35 : vector<8x128xf32>
      %cst_17 = arith.constant 1.000000e+00 : f32
      %37 = vector.broadcast %cst_17 : f32 to vector<8x128xf32>
      %38 = arith.addf %37, %36 : vector<8x128xf32>
      %39 = arith.divf %37, %38 : vector<8x128xf32>
      %40 = vector.extract_strided_slice %17 {offsets = [0, 256], sizes = [8, 128], strides = [1, 1]} : vector<8x384xf32> to vector<8x128xf32>
      %41 = vector.extract_strided_slice %23 {offsets = [0, 256], sizes = [8, 128], strides = [1, 1]} : vector<8x384xf32> to vector<8x128xf32>
      %42 = arith.mulf %31, %41 : vector<8x128xf32>
      %43 = arith.addf %40, %42 : vector<8x128xf32>
      %44 = math.tanh %43 : vector<8x128xf32>
      %cst_18 = arith.constant 1.000000e+00 : f32
      %45 = vector.broadcast %cst_18 : f32 to vector<8x128xf32>
      %46 = arith.subf %45, %39 : vector<8x128xf32>
      %47 = arith.mulf %46, %44 : vector<8x128xf32>
      %48 = arith.mulf %39, %14 : vector<8x128xf32>
      %49 = arith.addf %47, %48 : vector<8x128xf32>
      %50 = arith.truncf %49 : vector<8x128xf32> to vector<8x128xbf16>
      %c0_19 = arith.constant 0 : index
      %c7_20 = arith.constant 7 : index
      %c0_21 = arith.constant 0 : index
      %c0_22 = arith.constant 0 : index
      %51 = vector.load %arg6[%c0_19, %c7_20, %c0_21, %c0_22] : memref<1x8x8x128xbf16, #tpu.memory_space<vmem>>, vector<1x1x8x128xbf16>
      %52 = vector.shape_cast %51 : vector<1x1x8x128xbf16> to vector<8x128xbf16>
      %53 = vector.shape_cast %50 : vector<8x128xbf16> to vector<1x1x8x128xbf16>
      tpu.vector_store %arg6[%c0_19, %c7_20, %c0_21, %c0_22], %53 {strides = array<i32>} : memref<1x8x8x128xbf16, #tpu.memory_space<vmem>>, vector<1x1x8x128xbf16>,
      %c0_23 = arith.constant 0 : index
      %c6 = arith.constant 6 : index
      %c0_24 = arith.constant 0 : index
      %c0_25 = arith.constant 0 : index
      %54 = vector.load %arg2[%c0_23, %c6, %c0_24, %c0_25] : memref<1x8x8x384xbf16, #tpu.memory_space<vmem>>, vector<1x1x8x384xbf16>
      %55 = vector.shape_cast %54 : vector<1x1x8x384xbf16> to vector<8x384xbf16>
      %56 = arith.extf %55 : vector<8x384xbf16> to vector<8x384xf32>
      %57 = arith.truncf %49 : vector<8x128xf32> to vector<8x128xbf16>
      %c0_26 = arith.constant 0 : index
      %c0_27 = arith.constant 0 : index
      %c0_28 = arith.constant 0 : index
      %58 = vector.load %arg3[%c0_26, %c0_27, %c0_28] : memref<1x128x384xbf16, #tpu.memory_space<vmem>>, vector<1x128x384xbf16>
      %59 = vector.shape_cast %58 : vector<1x128x384xbf16> to vector<128x384xbf16>
      %cst_29 = arith.constant dense<0.000000e+00> : vector<8x384xf32>
      %60 = tpu.matmul %57, %59, %cst_29 {dimension_numbers = #tpu.dot_dimension_numbers<[1], [0], [0], [1], [0, 0, 1, 1], [], []>} : vector<8x128xbf16>, vector<128x384xbf16>, vector<8x384xf32> -> vector<8x384xf32>
      %61 = vector.broadcast %4 : vector<1x384xf32> to vector<8x384xf32>
      %62 = arith.addf %60, %61 : vector<8x384xf32>
      %63 = vector.extract_strided_slice %56 {offsets = [0, 0], sizes = [8, 128], strides = [1, 1]} : vector<8x384xf32> to vector<8x128xf32>
      %64 = vector.extract_strided_slice %62 {offsets = [0, 0], sizes = [8, 128], strides = [1, 1]} : vector<8x384xf32> to vector<8x128xf32>
      %65 = arith.addf %63, %64 : vector<8x128xf32>
      %66 = arith.negf %65 : vector<8x128xf32>
      %67 = math.exp %66 : vector<8x128xf32>
      %cst_30 = arith.constant 1.000000e+00 : f32
      %68 = vector.broadcast %cst_30 : f32 to vector<8x128xf32>
      %69 = arith.addf %68, %67 : vector<8x128xf32>
      %70 = arith.divf %68, %69 : vector<8x128xf32>
      %71 = vector.extract_strided_slice %56 {offsets = [0, 128], sizes = [8, 128], strides = [1, 1]} : vector<8x384xf32> to vector<8x128xf32>
      %72 = vector.extract_strided_slice %62 {offsets = [0, 128], sizes = [8, 128], strides = [1, 1]} : vector<8x384xf32> to vector<8x128xf32>
      %73 = arith.addf %71, %72 : vector<8x128xf32>
      %74 = arith.negf %73 : vector<8x128xf32>
      %75 = math.exp %74 : vector<8x128xf32>
      %cst_31 = arith.constant 1.000000e+00 : f32
      %76 = vector.broadcast %cst_31 : f32 to vector<8x128xf32>
      %77 = arith.addf %76, %75 : vector<8x128xf32>
      %78 = arith.divf %76, %77 : vector<8x128xf32>
      %79 = vector.extract_strided_slice %56 {offsets = [0, 256], sizes = [8, 128], strides = [1, 1]} : vector<8x384xf32> to vector<8x128xf32>
      %80 = vector.extract_strided_slice %62 {offsets = [0, 256], sizes = [8, 128], strides = [1, 1]} : vector<8x384xf32> to vector<8x128xf32>
      %81 = arith.mulf %70, %80 : vector<8x128xf32>
      %82 = arith.addf %79, %81 : vector<8x128xf32>
      %83 = math.tanh %82 : vector<8x128xf32>
      %cst_32 = arith.constant 1.000000e+00 : f32
      %84 = vector.broadcast %cst_32 : f32 to vector<8x128xf32>
      %85 = arith.subf %84, %78 : vector<8x128xf32>
      %86 = arith.mulf %85, %83 : vector<8x128xf32>
      %87 = arith.mulf %78, %49 : vector<8x128xf32>
      %88 = arith.addf %86, %87 : vector<8x128xf32>
      %89 = arith.truncf %88 : vector<8x128xf32> to vector<8x128xbf16>
      %c0_33 = arith.constant 0 : index
      %c6_34 = arith.constant 6 : index
      %c0_35 = arith.constant 0 : index
      %c0_36 = arith.constant 0 : index
      %90 = vector.load %arg6[%c0_33, %c6_34, %c0_35, %c0_36] : memref<1x8x8x128xbf16, #tpu.memory_space<vmem>>, vector<1x1x8x128xbf16>
      %91 = vector.shape_cast %90 : vector<1x1x8x128xbf16> to vector<8x128xbf16>
      %92 = vector.shape_cast %89 : vector<8x128xbf16> to vector<1x1x8x128xbf16>
      tpu.vector_store %arg6[%c0_33, %c6_34, %c0_35, %c0_36], %92 {strides = array<i32>} : memref<1x8x8x128xbf16, #tpu.memory_space<vmem>>, vector<1x1x8x128xbf16>,
      %c0_37 = arith.constant 0 : index
      %c5 = arith.constant 5 : index
      %c0_38 = arith.constant 0 : index
      %c0_39 = arith.constant 0 : index
      %93 = vector.load %arg2[%c0_37, %c5, %c0_38, %c0_39] : memref<1x8x8x384xbf16, #tpu.memory_space<vmem>>, vector<1x1x8x384xbf16>
      %94 = vector.shape_cast %93 : vector<1x1x8x384xbf16> to vector<8x384xbf16>
      %95 = arith.extf %94 : vector<8x384xbf16> to vector<8x384xf32>
      %96 = arith.truncf %88 : vector<8x128xf32> to vector<8x128xbf16>
      %c0_40 = arith.constant 0 : index
      %c0_41 = arith.constant 0 : index
      %c0_42 = arith.constant 0 : index
      %97 = vector.load %arg3[%c0_40, %c0_41, %c0_42] : memref<1x128x384xbf16, #tpu.memory_space<vmem>>, vector<1x128x384xbf16>
      %98 = vector.shape_cast %97 : vector<1x128x384xbf16> to vector<128x384xbf16>
      %cst_43 = arith.constant dense<0.000000e+00> : vector<8x384xf32>
      %99 = tpu.matmul %96, %98, %cst_43 {dimension_numbers = #tpu.dot_dimension_numbers<[1], [0], [0], [1], [0, 0, 1, 1], [], []>} : vector<8x128xbf16>, vector<128x384xbf16>, vector<8x384xf32> -> vector<8x384xf32>
      %100 = vector.broadcast %4 : vector<1x384xf32> to vector<8x384xf32>
      %101 = arith.addf %99, %100 : vector<8x384xf32>
      %102 = vector.extract_strided_slice %95 {offsets = [0, 0], sizes = [8, 128], strides = [1, 1]} : vector<8x384xf32> to vector<8x128xf32>
      %103 = vector.extract_strided_slice %101 {offsets = [0, 0], sizes = [8, 128], strides = [1, 1]} : vector<8x384xf32> to vector<8x128xf32>
      %104 = arith.addf %102, %103 : vector<8x128xf32>
      %105 = arith.negf %104 : vector<8x128xf32>
      %106 = math.exp %105 : vector<8x128xf32>
      %cst_44 = arith.constant 1.000000e+00 : f32
      %107 = vector.broadcast %cst_44 : f32 to vector<8x128xf32>
      %108 = arith.addf %107, %106 : vector<8x128xf32>
      %109 = arith.divf %107, %108 : vector<8x128xf32>
      %110 = vector.extract_strided_slice %95 {offsets = [0, 128], sizes = [8, 128], strides = [1, 1]} : vector<8x384xf32> to vector<8x128xf32>
      %111 = vector.extract_strided_slice %101 {offsets = [0, 128], sizes = [8, 128], strides = [1, 1]} : vector<8x384xf32> to vector<8x128xf32>
      %112 = arith.addf %110, %111 : vector<8x128xf32>
      %113 = arith.negf %112 : vector<8x128xf32>
      %114 = math.exp %113 : vector<8x128xf32>
      %cst_45 = arith.constant 1.000000e+00 : f32
      %115 = vector.broadcast %cst_45 : f32 to vector<8x128xf32>
      %116 = arith.addf %115, %114 : vector<8x128xf32>
      %117 = arith.divf %115, %116 : vector<8x128xf32>
      %118 = vector.extract_strided_slice %95 {offsets = [0, 256], sizes = [8, 128], strides = [1, 1]} : vector<8x384xf32> to vector<8x128xf32>
      %119 = vector.extract_strided_slice %101 {offsets = [0, 256], sizes = [8, 128], strides = [1, 1]} : vector<8x384xf32> to vector<8x128xf32>
      %120 = arith.mulf %109, %119 : vector<8x128xf32>
      %121 = arith.addf %118, %120 : vector<8x128xf32>
      %122 = math.tanh %121 : vector<8x128xf32>
      %cst_46 = arith.constant 1.000000e+00 : f32
      %123 = vector.broadcast %cst_46 : f32 to vector<8x128xf32>
      %124 = arith.subf %123, %117 : vector<8x128xf32>
      %125 = arith.mulf %124, %122 : vector<8x128xf32>
      %126 = arith.mulf %117, %88 : vector<8x128xf32>
      %127 = arith.addf %125, %126 : vector<8x128xf32>
      %128 = arith.truncf %127 : vector<8x128xf32> to vector<8x128xbf16>
      %c0_47 = arith.constant 0 : index
      %c5_48 = arith.constant 5 : index
      %c0_49 = arith.constant 0 : index
      %c0_50 = arith.constant 0 : index
      %129 = vector.load %arg6[%c0_47, %c5_48, %c0_49, %c0_50] : memref<1x8x8x128xbf16, #tpu.memory_space<vmem>>, vector<1x1x8x128xbf16>
      %130 = vector.shape_cast %129 : vector<1x1x8x128xbf16> to vector<8x128xbf16>
      %131 = vector.shape_cast %128 : vector<8x128xbf16> to vector<1x1x8x128xbf16>
      tpu.vector_store %arg6[%c0_47, %c5_48, %c0_49, %c0_50], %131 {strides = array<i32>} : memref<1x8x8x128xbf16, #tpu.memory_space<vmem>>, vector<1x1x8x128xbf16>,
      %c0_51 = arith.constant 0 : index
      %c4 = arith.constant 4 : index
      %c0_52 = arith.constant 0 : index
      %c0_53 = arith.constant 0 : index
      %132 = vector.load %arg2[%c0_51, %c4, %c0_52, %c0_53] : memref<1x8x8x384xbf16, #tpu.memory_space<vmem>>, vector<1x1x8x384xbf16>
      %133 = vector.shape_cast %132 : vector<1x1x8x384xbf16> to vector<8x384xbf16>
      %134 = arith.extf %133 : vector<8x384xbf16> to vector<8x384xf32>
      %135 = arith.truncf %127 : vector<8x128xf32> to vector<8x128xbf16>
      %c0_54 = arith.constant 0 : index
      %c0_55 = arith.constant 0 : index
      %c0_56 = arith.constant 0 : index
      %136 = vector.load %arg3[%c0_54, %c0_55, %c0_56] : memref<1x128x384xbf16, #tpu.memory_space<vmem>>, vector<1x128x384xbf16>
      %137 = vector.shape_cast %136 : vector<1x128x384xbf16> to vector<128x384xbf16>
      %cst_57 = arith.constant dense<0.000000e+00> : vector<8x384xf32>
      %138 = tpu.matmul %135, %137, %cst_57 {dimension_numbers = #tpu.dot_dimension_numbers<[1], [0], [0], [1], [0, 0, 1, 1], [], []>} : vector<8x128xbf16>, vector<128x384xbf16>, vector<8x384xf32> -> vector<8x384xf32>
      %139 = vector.broadcast %4 : vector<1x384xf32> to vector<8x384xf32>
      %140 = arith.addf %138, %139 : vector<8x384xf32>
      %141 = vector.extract_strided_slice %134 {offsets = [0, 0], sizes = [8, 128], strides = [1, 1]} : vector<8x384xf32> to vector<8x128xf32>
      %142 = vector.extract_strided_slice %140 {offsets = [0, 0], sizes = [8, 128], strides = [1, 1]} : vector<8x384xf32> to vector<8x128xf32>
      %143 = arith.addf %141, %142 : vector<8x128xf32>
      %144 = arith.negf %143 : vector<8x128xf32>
      %145 = math.exp %144 : vector<8x128xf32>
      %cst_58 = arith.constant 1.000000e+00 : f32
      %146 = vector.broadcast %cst_58 : f32 to vector<8x128xf32>
      %147 = arith.addf %146, %145 : vector<8x128xf32>
      %148 = arith.divf %146, %147 : vector<8x128xf32>
      %149 = vector.extract_strided_slice %134 {offsets = [0, 128], sizes = [8, 128], strides = [1, 1]} : vector<8x384xf32> to vector<8x128xf32>
      %150 = vector.extract_strided_slice %140 {offsets = [0, 128], sizes = [8, 128], strides = [1, 1]} : vector<8x384xf32> to vector<8x128xf32>
      %151 = arith.addf %149, %150 : vector<8x128xf32>
      %152 = arith.negf %151 : vector<8x128xf32>
      %153 = math.exp %152 : vector<8x128xf32>
      %cst_59 = arith.constant 1.000000e+00 : f32
      %154 = vector.broadcast %cst_59 : f32 to vector<8x128xf32>
      %155 = arith.addf %154, %153 : vector<8x128xf32>
      %156 = arith.divf %154, %155 : vector<8x128xf32>
      %157 = vector.extract_strided_slice %134 {offsets = [0, 256], sizes = [8, 128], strides = [1, 1]} : vector<8x384xf32> to vector<8x128xf32>
      %158 = vector.extract_strided_slice %140 {offsets = [0, 256], sizes = [8, 128], strides = [1, 1]} : vector<8x384xf32> to vector<8x128xf32>
      %159 = arith.mulf %148, %158 : vector<8x128xf32>
      %160 = arith.addf %157, %159 : vector<8x128xf32>
      %161 = math.tanh %160 : vector<8x128xf32>
      %cst_60 = arith.constant 1.000000e+00 : f32
      %162 = vector.broadcast %cst_60 : f32 to vector<8x128xf32>
      %163 = arith.subf %162, %156 : vector<8x128xf32>
      %164 = arith.mulf %163, %161 : vector<8x128xf32>
      %165 = arith.mulf %156, %127 : vector<8x128xf32>
      %166 = arith.addf %164, %165 : vector<8x128xf32>
      %167 = arith.truncf %166 : vector<8x128xf32> to vector<8x128xbf16>
      %c0_61 = arith.constant 0 : index
      %c4_62 = arith.constant 4 : index
      %c0_63 = arith.constant 0 : index
      %c0_64 = arith.constant 0 : index
      %168 = vector.load %arg6[%c0_61, %c4_62, %c0_63, %c0_64] : memref<1x8x8x128xbf16, #tpu.memory_space<vmem>>, vector<1x1x8x128xbf16>
      %169 = vector.shape_cast %168 : vector<1x1x8x128xbf16> to vector<8x128xbf16>
      %170 = vector.shape_cast %167 : vector<8x128xbf16> to vector<1x1x8x128xbf16>
      tpu.vector_store %arg6[%c0_61, %c4_62, %c0_63, %c0_64], %170 {strides = array<i32>} : memref<1x8x8x128xbf16, #tpu.memory_space<vmem>>, vector<1x1x8x128xbf16>,
      %c0_65 = arith.constant 0 : index
      %c3 = arith.constant 3 : index
      %c0_66 = arith.constant 0 : index
      %c0_67 = arith.constant 0 : index
      %171 = vector.load %arg2[%c0_65, %c3, %c0_66, %c0_67] : memref<1x8x8x384xbf16, #tpu.memory_space<vmem>>, vector<1x1x8x384xbf16>
      %172 = vector.shape_cast %171 : vector<1x1x8x384xbf16> to vector<8x384xbf16>
      %173 = arith.extf %172 : vector<8x384xbf16> to vector<8x384xf32>
      %174 = arith.truncf %166 : vector<8x128xf32> to vector<8x128xbf16>
      %c0_68 = arith.constant 0 : index
      %c0_69 = arith.constant 0 : index
      %c0_70 = arith.constant 0 : index
      %175 = vector.load %arg3[%c0_68, %c0_69, %c0_70] : memref<1x128x384xbf16, #tpu.memory_space<vmem>>, vector<1x128x384xbf16>
      %176 = vector.shape_cast %175 : vector<1x128x384xbf16> to vector<128x384xbf16>
      %cst_71 = arith.constant dense<0.000000e+00> : vector<8x384xf32>
      %177 = tpu.matmul %174, %176, %cst_71 {dimension_numbers = #tpu.dot_dimension_numbers<[1], [0], [0], [1], [0, 0, 1, 1], [], []>} : vector<8x128xbf16>, vector<128x384xbf16>, vector<8x384xf32> -> vector<8x384xf32>
      %178 = vector.broadcast %4 : vector<1x384xf32> to vector<8x384xf32>
      %179 = arith.addf %177, %178 : vector<8x384xf32>
      %180 = vector.extract_strided_slice %173 {offsets = [0, 0], sizes = [8, 128], strides = [1, 1]} : vector<8x384xf32> to vector<8x128xf32>
      %181 = vector.extract_strided_slice %179 {offsets = [0, 0], sizes = [8, 128], strides = [1, 1]} : vector<8x384xf32> to vector<8x128xf32>
      %182 = arith.addf %180, %181 : vector<8x128xf32>
      %183 = arith.negf %182 : vector<8x128xf32>
      %184 = math.exp %183 : vector<8x128xf32>
      %cst_72 = arith.constant 1.000000e+00 : f32
      %185 = vector.broadcast %cst_72 : f32 to vector<8x128xf32>
      %186 = arith.addf %185, %184 : vector<8x128xf32>
      %187 = arith.divf %185, %186 : vector<8x128xf32>
      %188 = vector.extract_strided_slice %173 {offsets = [0, 128], sizes = [8, 128], strides = [1, 1]} : vector<8x384xf32> to vector<8x128xf32>
      %189 = vector.extract_strided_slice %179 {offsets = [0, 128], sizes = [8, 128], strides = [1, 1]} : vector<8x384xf32> to vector<8x128xf32>
      %190 = arith.addf %188, %189 : vector<8x128xf32>
      %191 = arith.negf %190 : vector<8x128xf32>
      %192 = math.exp %191 : vector<8x128xf32>
      %cst_73 = arith.constant 1.000000e+00 : f32
      %193 = vector.broadcast %cst_73 : f32 to vector<8x128xf32>
      %194 = arith.addf %193, %192 : vector<8x128xf32>
      %195 = arith.divf %193, %194 : vector<8x128xf32>
      %196 = vector.extract_strided_slice %173 {offsets = [0, 256], sizes = [8, 128], strides = [1, 1]} : vector<8x384xf32> to vector<8x128xf32>
      %197 = vector.extract_strided_slice %179 {offsets = [0, 256], sizes = [8, 128], strides = [1, 1]} : vector<8x384xf32> to vector<8x128xf32>
      %198 = arith.mulf %187, %197 : vector<8x128xf32>
      %199 = arith.addf %196, %198 : vector<8x128xf32>
      %200 = math.tanh %199 : vector<8x128xf32>
      %cst_74 = arith.constant 1.000000e+00 : f32
      %201 = vector.broadcast %cst_74 : f32 to vector<8x128xf32>
      %202 = arith.subf %201, %195 : vector<8x128xf32>
      %203 = arith.mulf %202, %200 : vector<8x128xf32>
      %204 = arith.mulf %195, %166 : vector<8x128xf32>
      %205 = arith.addf %203, %204 : vector<8x128xf32>
      %206 = arith.truncf %205 : vector<8x128xf32> to vector<8x128xbf16>
      %c0_75 = arith.constant 0 : index
      %c3_76 = arith.constant 3 : index
      %c0_77 = arith.constant 0 : index
      %c0_78 = arith.constant 0 : index
      %207 = vector.load %arg6[%c0_75, %c3_76, %c0_77, %c0_78] : memref<1x8x8x128xbf16, #tpu.memory_space<vmem>>, vector<1x1x8x128xbf16>
      %208 = vector.shape_cast %207 : vector<1x1x8x128xbf16> to vector<8x128xbf16>
      %209 = vector.shape_cast %206 : vector<8x128xbf16> to vector<1x1x8x128xbf16>
      tpu.vector_store %arg6[%c0_75, %c3_76, %c0_77, %c0_78], %209 {strides = array<i32>} : memref<1x8x8x128xbf16, #tpu.memory_space<vmem>>, vector<1x1x8x128xbf16>,
      %c0_79 = arith.constant 0 : index
      %c2 = arith.constant 2 : index
      %c0_80 = arith.constant 0 : index
      %c0_81 = arith.constant 0 : index
      %210 = vector.load %arg2[%c0_79, %c2, %c0_80, %c0_81] : memref<1x8x8x384xbf16, #tpu.memory_space<vmem>>, vector<1x1x8x384xbf16>
      %211 = vector.shape_cast %210 : vector<1x1x8x384xbf16> to vector<8x384xbf16>
      %212 = arith.extf %211 : vector<8x384xbf16> to vector<8x384xf32>
      %213 = arith.truncf %205 : vector<8x128xf32> to vector<8x128xbf16>
      %c0_82 = arith.constant 0 : index
      %c0_83 = arith.constant 0 : index
      %c0_84 = arith.constant 0 : index
      %214 = vector.load %arg3[%c0_82, %c0_83, %c0_84] : memref<1x128x384xbf16, #tpu.memory_space<vmem>>, vector<1x128x384xbf16>
      %215 = vector.shape_cast %214 : vector<1x128x384xbf16> to vector<128x384xbf16>
      %cst_85 = arith.constant dense<0.000000e+00> : vector<8x384xf32>
      %216 = tpu.matmul %213, %215, %cst_85 {dimension_numbers = #tpu.dot_dimension_numbers<[1], [0], [0], [1], [0, 0, 1, 1], [], []>} : vector<8x128xbf16>, vector<128x384xbf16>, vector<8x384xf32> -> vector<8x384xf32>
      %217 = vector.broadcast %4 : vector<1x384xf32> to vector<8x384xf32>
      %218 = arith.addf %216, %217 : vector<8x384xf32>
      %219 = vector.extract_strided_slice %212 {offsets = [0, 0], sizes = [8, 128], strides = [1, 1]} : vector<8x384xf32> to vector<8x128xf32>
      %220 = vector.extract_strided_slice %218 {offsets = [0, 0], sizes = [8, 128], strides = [1, 1]} : vector<8x384xf32> to vector<8x128xf32>
      %221 = arith.addf %219, %220 : vector<8x128xf32>
      %222 = arith.negf %221 : vector<8x128xf32>
      %223 = math.exp %222 : vector<8x128xf32>
      %cst_86 = arith.constant 1.000000e+00 : f32
      %224 = vector.broadcast %cst_86 : f32 to vector<8x128xf32>
      %225 = arith.addf %224, %223 : vector<8x128xf32>
      %226 = arith.divf %224, %225 : vector<8x128xf32>
      %227 = vector.extract_strided_slice %212 {offsets = [0, 128], sizes = [8, 128], strides = [1, 1]} : vector<8x384xf32> to vector<8x128xf32>
      %228 = vector.extract_strided_slice %218 {offsets = [0, 128], sizes = [8, 128], strides = [1, 1]} : vector<8x384xf32> to vector<8x128xf32>
      %229 = arith.addf %227, %228 : vector<8x128xf32>
      %230 = arith.negf %229 : vector<8x128xf32>
      %231 = math.exp %230 : vector<8x128xf32>
      %cst_87 = arith.constant 1.000000e+00 : f32
      %232 = vector.broadcast %cst_87 : f32 to vector<8x128xf32>
      %233 = arith.addf %232, %231 : vector<8x128xf32>
      %234 = arith.divf %232, %233 : vector<8x128xf32>
      %235 = vector.extract_strided_slice %212 {offsets = [0, 256], sizes = [8, 128], strides = [1, 1]} : vector<8x384xf32> to vector<8x128xf32>
      %236 = vector.extract_strided_slice %218 {offsets = [0, 256], sizes = [8, 128], strides = [1, 1]} : vector<8x384xf32> to vector<8x128xf32>
      %237 = arith.mulf %226, %236 : vector<8x128xf32>
      %238 = arith.addf %235, %237 : vector<8x128xf32>
      %239 = math.tanh %238 : vector<8x128xf32>
      %cst_88 = arith.constant 1.000000e+00 : f32
      %240 = vector.broadcast %cst_88 : f32 to vector<8x128xf32>
      %241 = arith.subf %240, %234 : vector<8x128xf32>
      %242 = arith.mulf %241, %239 : vector<8x128xf32>
      %243 = arith.mulf %234, %205 : vector<8x128xf32>
      %244 = arith.addf %242, %243 : vector<8x128xf32>
      %245 = arith.truncf %244 : vector<8x128xf32> to vector<8x128xbf16>
      %c0_89 = arith.constant 0 : index
      %c2_90 = arith.constant 2 : index
      %c0_91 = arith.constant 0 : index
      %c0_92 = arith.constant 0 : index
      %246 = vector.load %arg6[%c0_89, %c2_90, %c0_91, %c0_92] : memref<1x8x8x128xbf16, #tpu.memory_space<vmem>>, vector<1x1x8x128xbf16>
      %247 = vector.shape_cast %246 : vector<1x1x8x128xbf16> to vector<8x128xbf16>
      %248 = vector.shape_cast %245 : vector<8x128xbf16> to vector<1x1x8x128xbf16>
      tpu.vector_store %arg6[%c0_89, %c2_90, %c0_91, %c0_92], %248 {strides = array<i32>} : memref<1x8x8x128xbf16, #tpu.memory_space<vmem>>, vector<1x1x8x128xbf16>,
      %c0_93 = arith.constant 0 : index
      %c1 = arith.constant 1 : index
      %c0_94 = arith.constant 0 : index
      %c0_95 = arith.constant 0 : index
      %249 = vector.load %arg2[%c0_93, %c1, %c0_94, %c0_95] : memref<1x8x8x384xbf16, #tpu.memory_space<vmem>>, vector<1x1x8x384xbf16>
      %250 = vector.shape_cast %249 : vector<1x1x8x384xbf16> to vector<8x384xbf16>
      %251 = arith.extf %250 : vector<8x384xbf16> to vector<8x384xf32>
      %252 = arith.truncf %244 : vector<8x128xf32> to vector<8x128xbf16>
      %c0_96 = arith.constant 0 : index
      %c0_97 = arith.constant 0 : index
      %c0_98 = arith.constant 0 : index
      %253 = vector.load %arg3[%c0_96, %c0_97, %c0_98] : memref<1x128x384xbf16, #tpu.memory_space<vmem>>, vector<1x128x384xbf16>
      %254 = vector.shape_cast %253 : vector<1x128x384xbf16> to vector<128x384xbf16>
      %cst_99 = arith.constant dense<0.000000e+00> : vector<8x384xf32>
      %255 = tpu.matmul %252, %254, %cst_99 {dimension_numbers = #tpu.dot_dimension_numbers<[1], [0], [0], [1], [0, 0, 1, 1], [], []>} : vector<8x128xbf16>, vector<128x384xbf16>, vector<8x384xf32> -> vector<8x384xf32>
      %256 = vector.broadcast %4 : vector<1x384xf32> to vector<8x384xf32>
      %257 = arith.addf %255, %256 : vector<8x384xf32>
      %258 = vector.extract_strided_slice %251 {offsets = [0, 0], sizes = [8, 128], strides = [1, 1]} : vector<8x384xf32> to vector<8x128xf32>
      %259 = vector.extract_strided_slice %257 {offsets = [0, 0], sizes = [8, 128], strides = [1, 1]} : vector<8x384xf32> to vector<8x128xf32>
      %260 = arith.addf %258, %259 : vector<8x128xf32>
      %261 = arith.negf %260 : vector<8x128xf32>
      %262 = math.exp %261 : vector<8x128xf32>
      %cst_100 = arith.constant 1.000000e+00 : f32
      %263 = vector.broadcast %cst_100 : f32 to vector<8x128xf32>
      %264 = arith.addf %263, %262 : vector<8x128xf32>
      %265 = arith.divf %263, %264 : vector<8x128xf32>
      %266 = vector.extract_strided_slice %251 {offsets = [0, 128], sizes = [8, 128], strides = [1, 1]} : vector<8x384xf32> to vector<8x128xf32>
      %267 = vector.extract_strided_slice %257 {offsets = [0, 128], sizes = [8, 128], strides = [1, 1]} : vector<8x384xf32> to vector<8x128xf32>
      %268 = arith.addf %266, %267 : vector<8x128xf32>
      %269 = arith.negf %268 : vector<8x128xf32>
      %270 = math.exp %269 : vector<8x128xf32>
      %cst_101 = arith.constant 1.000000e+00 : f32
      %271 = vector.broadcast %cst_101 : f32 to vector<8x128xf32>
      %272 = arith.addf %271, %270 : vector<8x128xf32>
      %273 = arith.divf %271, %272 : vector<8x128xf32>
      %274 = vector.extract_strided_slice %251 {offsets = [0, 256], sizes = [8, 128], strides = [1, 1]} : vector<8x384xf32> to vector<8x128xf32>
      %275 = vector.extract_strided_slice %257 {offsets = [0, 256], sizes = [8, 128], strides = [1, 1]} : vector<8x384xf32> to vector<8x128xf32>
      %276 = arith.mulf %265, %275 : vector<8x128xf32>
      %277 = arith.addf %274, %276 : vector<8x128xf32>
      %278 = math.tanh %277 : vector<8x128xf32>
      %cst_102 = arith.constant 1.000000e+00 : f32
      %279 = vector.broadcast %cst_102 : f32 to vector<8x128xf32>
      %280 = arith.subf %279, %273 : vector<8x128xf32>
      %281 = arith.mulf %280, %278 : vector<8x128xf32>
      %282 = arith.mulf %273, %244 : vector<8x128xf32>
      %283 = arith.addf %281, %282 : vector<8x128xf32>
      %284 = arith.truncf %283 : vector<8x128xf32> to vector<8x128xbf16>
      %c0_103 = arith.constant 0 : index
      %c1_104 = arith.constant 1 : index
      %c0_105 = arith.constant 0 : index
      %c0_106 = arith.constant 0 : index
      %285 = vector.load %arg6[%c0_103, %c1_104, %c0_105, %c0_106] : memref<1x8x8x128xbf16, #tpu.memory_space<vmem>>, vector<1x1x8x128xbf16>
      %286 = vector.shape_cast %285 : vector<1x1x8x128xbf16> to vector<8x128xbf16>
      %287 = vector.shape_cast %284 : vector<8x128xbf16> to vector<1x1x8x128xbf16>
      tpu.vector_store %arg6[%c0_103, %c1_104, %c0_105, %c0_106], %287 {strides = array<i32>} : memref<1x8x8x128xbf16, #tpu.memory_space<vmem>>, vector<1x1x8x128xbf16>,
      %c0_107 = arith.constant 0 : index
      %c0_108 = arith.constant 0 : index
      %c0_109 = arith.constant 0 : index
      %c0_110 = arith.constant 0 : index
      %288 = vector.load %arg2[%c0_107, %c0_108, %c0_109, %c0_110] : memref<1x8x8x384xbf16, #tpu.memory_space<vmem>>, vector<1x1x8x384xbf16>
      %289 = vector.shape_cast %288 : vector<1x1x8x384xbf16> to vector<8x384xbf16>
      %290 = arith.extf %289 : vector<8x384xbf16> to vector<8x384xf32>
      %291 = arith.truncf %283 : vector<8x128xf32> to vector<8x128xbf16>
      %c0_111 = arith.constant 0 : index
      %c0_112 = arith.constant 0 : index
      %c0_113 = arith.constant 0 : index
      %292 = vector.load %arg3[%c0_111, %c0_112, %c0_113] : memref<1x128x384xbf16, #tpu.memory_space<vmem>>, vector<1x128x384xbf16>
      %293 = vector.shape_cast %292 : vector<1x128x384xbf16> to vector<128x384xbf16>
      %cst_114 = arith.constant dense<0.000000e+00> : vector<8x384xf32>
      %294 = tpu.matmul %291, %293, %cst_114 {dimension_numbers = #tpu.dot_dimension_numbers<[1], [0], [0], [1], [0, 0, 1, 1], [], []>} : vector<8x128xbf16>, vector<128x384xbf16>, vector<8x384xf32> -> vector<8x384xf32>
      %295 = vector.broadcast %4 : vector<1x384xf32> to vector<8x384xf32>
      %296 = arith.addf %294, %295 : vector<8x384xf32>
      %297 = vector.extract_strided_slice %290 {offsets = [0, 0], sizes = [8, 128], strides = [1, 1]} : vector<8x384xf32> to vector<8x128xf32>
      %298 = vector.extract_strided_slice %296 {offsets = [0, 0], sizes = [8, 128], strides = [1, 1]} : vector<8x384xf32> to vector<8x128xf32>
      %299 = arith.addf %297, %298 : vector<8x128xf32>
      %300 = arith.negf %299 : vector<8x128xf32>
      %301 = math.exp %300 : vector<8x128xf32>
      %cst_115 = arith.constant 1.000000e+00 : f32
      %302 = vector.broadcast %cst_115 : f32 to vector<8x128xf32>
      %303 = arith.addf %302, %301 : vector<8x128xf32>
      %304 = arith.divf %302, %303 : vector<8x128xf32>
      %305 = vector.extract_strided_slice %290 {offsets = [0, 128], sizes = [8, 128], strides = [1, 1]} : vector<8x384xf32> to vector<8x128xf32>
      %306 = vector.extract_strided_slice %296 {offsets = [0, 128], sizes = [8, 128], strides = [1, 1]} : vector<8x384xf32> to vector<8x128xf32>
      %307 = arith.addf %305, %306 : vector<8x128xf32>
      %308 = arith.negf %307 : vector<8x128xf32>
      %309 = math.exp %308 : vector<8x128xf32>
      %cst_116 = arith.constant 1.000000e+00 : f32
      %310 = vector.broadcast %cst_116 : f32 to vector<8x128xf32>
      %311 = arith.addf %310, %309 : vector<8x128xf32>
      %312 = arith.divf %310, %311 : vector<8x128xf32>
      %313 = vector.extract_strided_slice %290 {offsets = [0, 256], sizes = [8, 128], strides = [1, 1]} : vector<8x384xf32> to vector<8x128xf32>
      %314 = vector.extract_strided_slice %296 {offsets = [0, 256], sizes = [8, 128], strides = [1, 1]} : vector<8x384xf32> to vector<8x128xf32>
      %315 = arith.mulf %304, %314 : vector<8x128xf32>
      %316 = arith.addf %313, %315 : vector<8x128xf32>
      %317 = math.tanh %316 : vector<8x128xf32>
      %cst_117 = arith.constant 1.000000e+00 : f32
      %318 = vector.broadcast %cst_117 : f32 to vector<8x128xf32>
      %319 = arith.subf %318, %312 : vector<8x128xf32>
      %320 = arith.mulf %319, %317 : vector<8x128xf32>
      %321 = arith.mulf %312, %283 : vector<8x128xf32>
      %322 = arith.addf %320, %321 : vector<8x128xf32>
      %323 = arith.truncf %322 : vector<8x128xf32> to vector<8x128xbf16>
      %c0_118 = arith.constant 0 : index
      %c0_119 = arith.constant 0 : index
      %c0_120 = arith.constant 0 : index
      %c0_121 = arith.constant 0 : index
      %324 = vector.load %arg6[%c0_118, %c0_119, %c0_120, %c0_121] : memref<1x8x8x128xbf16, #tpu.memory_space<vmem>>, vector<1x1x8x128xbf16>
      %325 = vector.shape_cast %324 : vector<1x1x8x128xbf16> to vector<8x128xbf16>
      %326 = vector.shape_cast %323 : vector<8x128xbf16> to vector<1x1x8x128xbf16>
      tpu.vector_store %arg6[%c0_118, %c0_119, %c0_120, %c0_121], %326 {strides = array<i32>} : memref<1x8x8x128xbf16, #tpu.memory_space<vmem>>, vector<1x1x8x128xbf16>,
      %c0_122 = arith.constant 0 : index
      %c0_123 = arith.constant 0 : index
      %327 = vector.load %arg8[%c0_122, %c0_123] : memref<8x128xf32, #tpu.memory_space<vmem>>, vector<8x128xf32>
      tpu.vector_store %arg8[%c0_122, %c0_123], %322 {strides = array<i32>} : memref<8x128xf32, #tpu.memory_space<vmem>>, vector<8x128xf32>,
    } else {
    }
    %c0_i32_6 = arith.constant 0 : i32
    %11 = arith.cmpi eq, %arg1, %c0_i32_6 : i32
    %12 = arith.extui %11 : i1 to i32
    %c0_i32_7 = arith.constant 0 : i32
    %13 = arith.cmpi ne, %12, %c0_i32_7 : i32
    scf.if %13 {
      %c0_8 = arith.constant 0 : index
      %c0_9 = arith.constant 0 : index
      %14 = vector.load %arg8[%c0_8, %c0_9] : memref<8x128xf32, #tpu.memory_space<vmem>>, vector<8x128xf32>
      %c0_10 = arith.constant 0 : index
      %c0_11 = arith.constant 0 : index
      %c0_12 = arith.constant 0 : index
      %15 = vector.load %arg7[%c0_10, %c0_11, %c0_12] : memref<1x8x128xf32, #tpu.memory_space<vmem>>, vector<1x8x128xf32>
      %16 = vector.shape_cast %15 : vector<1x8x128xf32> to vector<8x128xf32>
      %17 = vector.shape_cast %14 : vector<8x128xf32> to vector<1x8x128xf32>
      tpu.vector_store %arg7[%c0_10, %c0_11, %c0_12], %17 {strides = array<i32>} : memref<1x8x128xf32, #tpu.memory_space<vmem>>, vector<1x8x128xf32>,
    } else {
    }
    return
  }
  func.func @transform_0(%arg0: i32, %arg1: i32) -> (i32, i32, i32, i32) {
    %c2_i32 = arith.constant 2 : i32
    %0 = arith.muli %c2_i32, %arg1 : i32
    %c0_i32 = arith.constant 0 : i32
    %1 = arith.subi %c0_i32, %0 : i32
    %2 = arith.muli %arg0, %1 : i32
    %3 = arith.addi %arg1, %2 : i32
    %c0_i32_0 = arith.constant 0 : i32
    %c0_i32_1 = arith.constant 0 : i32
    %c0_i32_2 = arith.constant 0 : i32
    return %arg0, %3, %c0_i32_0, %c0_i32_1 : i32, i32, i32, i32
  }
  func.func @transform_1(%arg0: i32, %arg1: i32) -> (i32, i32, i32) {
    %c0_i32 = arith.constant 0 : i32
    %c0_i32_0 = arith.constant 0 : i32
    %c0_i32_1 = arith.constant 0 : i32
    return %arg0, %c0_i32, %c0_i32_0 : i32, i32, i32
  }
  func.func @transform_2(%arg0: i32, %arg1: i32) -> (i32, i32, i32) {
    %c0_i32 = arith.constant 0 : i32
    %c0_i32_0 = arith.constant 0 : i32
    %c0_i32_1 = arith.constant 0 : i32
    return %arg0, %c0_i32, %c0_i32_0 : i32, i32, i32
  }
  func.func @transform_3(%arg0: i32, %arg1: i32) -> (i32, i32, i32) {
    %c0_i32 = arith.constant 0 : i32
    %c0_i32_0 = arith.constant 0 : i32
    %c0_i32_1 = arith.constant 0 : i32
    return %arg0, %c0_i32, %c0_i32_0 : i32, i32, i32
  }
  func.func @transform_4(%arg0: i32, %arg1: i32) -> (i32, i32, i32, i32) {
    %c2_i32 = arith.constant 2 : i32
    %0 = arith.muli %c2_i32, %arg1 : i32
    %c0_i32 = arith.constant 0 : i32
    %1 = arith.subi %c0_i32, %0 : i32
    %2 = arith.muli %arg0, %1 : i32
    %3 = arith.addi %arg1, %2 : i32
    %c0_i32_0 = arith.constant 0 : i32
    %c0_i32_1 = arith.constant 0 : i32
    %c0_i32_2 = arith.constant 0 : i32
    return %arg0, %3, %c0_i32_0, %c0_i32_1 : i32, i32, i32, i32
  }
  func.func @transform_5(%arg0: i32, %arg1: i32) -> (i32, i32, i32) {
    %c0_i32 = arith.constant 0 : i32
    %c0_i32_0 = arith.constant 0 : i32
    %c0_i32_1 = arith.constant 0 : i32
    return %arg0, %c0_i32, %c0_i32_0 : i32, i32, i32
  }
}

</mosaic_0001>

<bundles_post_ra>
// kernel: tpu_custom_call.1
= control target key start
LH: loop header
LB: loop body
LE: loop exit
PB: predicated region body
PF: predicated region fallthrough
CT: control target
= control target key end

     0   :  { %s8525_s0 = inlined_call_operand.hbm [shape: bf16[2,8,8,384], index: 0, kind: input, shape index: {}]   ;;  %s8526_s1 = inlined_call_operand.hbm [shape: bf16[2,128,384], index: 1, kind: input, shape index: {}]   ;;  %s8527_s2 = inlined_call_operand.hbm [shape: f32[2,1,384], index: 2, kind: input, shape index: {}]   ;;  %s8528_s3 = inlined_call_operand.hbm [shape: f32[2,8,128], index: 3, kind: input, shape index: {}]   ;;  %s8529_s4 = inlined_call_operand.hbm [shape: bf16[2,8,8,128], index: 4, kind: output, shape index: {0}]   ;;  %s8530_s5 = inlined_call_operand.hbm [shape: f32[2,8,128], index: 5, kind: output, shape index: {1}]  }
   0x1   :  { %8539 = sst [smem:[#allocation25_spill]] %s8525_s0 }
   0x2   :  { %8540 = sst [smem:[#allocation26_spill]] %s8526_s1 }
   0x3   :  { %8541 = sst [smem:[#allocation27_spill]] %s8529_s4 }
   0x4   :  { %8542 = sst [smem:[#allocation28_spill]] %s8530_s5 }
   0x5   :  { %11 = vsyncpa [#allocation4], 0 }
   0x6   :  { %13 = vsyncpa [#allocation4 + $0x1], 0 }
   0x7   :  { %14 = vsyncpa [#allocation7], 0 }
   0x8   :  { %16 = vsyncpa [#allocation7 + $0x1], 0 }
   0x9   :  { %17 = vsyncpa [#allocation10], 0 }
   0xa   :  { %19 = vsyncpa [#allocation10 + $0x1], 0 }
   0xb   :  { %20 = vsyncpa [#allocation5], 0 }
   0xc   :  { %22 = vsyncpa [#allocation5 + $0x1], 0 }
   0xd   :  { %23 = vsyncpa [#allocation13], 0 }
   0xe   :  { %25 = vsyncpa [#allocation13 + $0x1], 0  ;;  %s7316_s18 = smov 0   ;;  %s7318_s19 = smov 0  }
   0xf   :  { %s7320_s20 = smov 0   ;;  %s7322_s21 = smov 0  }
  0x10   :  { %s7324_s22 = smov 0   ;;  %s7326_s23 = smov 0  }
  0x11 LB: > { %8543 = sst [smem:[#allocation19_spill]] %s7260_s18  ;;  %s7347_s24 = sadd.s32 4294967295, %s7280_s23   ;;  %s7280_s23 = sphi %s7326_s23, %s31_s23   ;;  %s7276_s22 = sphi %s7324_s22, %s8568_s22   ;;  %s7272_s21 = sphi %s7322_s21, %s8567_s21   ;;  %s7268_s20 = sphi %s7320_s20, %s8563_s20   ;;  %s7264_s19 = sphi %s7318_s19, %s8566_s19   ;;  %s7260_s18 = sphi %s7316_s18, %s8565_s18  }
  0x12   : > { %8544 = sst [smem:[#allocation20_spill]] %s7268_s20  ;;  %s4768_s25 = sadd.s32 4294967294, %s7280_s23  }
  0x13   : > { %8545 = sst [smem:[#allocation21_spill]] %s7280_s23  ;;  %s43_s26 = sadd.s32 1, %s7276_s22 }
  0x14   : > { %s60_s27 = sadd.s32 1, %s7268_s20  ;;  %p45_p0 = scmp.ge.s32.totalorder %s43_s26, 2 }
  0x15   : > { %p67_p1 = scmp.ne.s32.totalorder %s7268_s20, %s7264_s19  ;;  %p68_p2 = scmp.eq.s32.totalorder %s7280_s23, 0 }
  0x16   : > { %p73_p3 = scmp.ne.s32.totalorder %s7264_s19, %s7260_s18  ;;  %s8570_s26 = smov (%p45_p0, %s43_s26), 0 }
  0x17   : > { %8546 = sst [smem:[#allocation22_spill]] %s8570_s26  ;;  %p7359_p4 = por %p68_p2, %p67_p1 }
  0x18   : > { %p74_p5 = scmp.eq.s32.totalorder %s7347_s24, 0  ;;  %s55_s29 = ssub.s32 %s7276_s22, %s8570_s26 }
  0x19   : > { %p185_p6 = scmp.eq.s32.totalorder %s7347_s24, 1  ;;  %p58_p7 = scmp.eq.s32.totalorder %s55_s29, 0 }
  0x1a   : > { %p7367_p8 = por %p74_p5, %p73_p3  ;;  %p191_p10 = scmp.eq.s32.totalorder %s4768_s25, 1 }
  0x1b   : > { %p7371_p9 = por %p185_p6, %p67_p1  ;;  %p4770_p12 = scmp.ge.s32.totalorder %s7280_s23, 2 }
  0x1c   : > { %s7376_s7 = scalar_select %p58_p7, %s7268_s20, %s60_s27  }
  0x1d   : > { %p7378_p11 = por %p191_p10, %p73_p3  ;;  %p6824_p13 = scmp.lt.s32.totalorder %s7280_s23, 2 }
  0x1e   : > { %8550 = sst [smem:[#allocation23_spill]] %s7376_s7  ;;  %s7385_s9 = sand.u32 1, %s7268_s20  }
  0x1f   : > { %s8551_s8 = scalar_select %p7378_p11, 1, 0 }
  0x20   : > { %p7389_p0 = pnand %p6824_p13, %p7359_p4  ;;  %s266_s11 = sand.u32 1, %s7280_s23  }
  0x21   : > { %8552 = sst [smem:[#allocation24_spill]] %s8551_s8  ;;  %s6785_s12 = smul.u32 192, %s7385_s9 }
  0x22   : > { %s6786_s13 = smul.u32 192, %s7276_s22  ;;  %p4775_p1 = scmp.ge.s32.totalorder %s7280_s23, 1 }
  0x23   : > { %s8554_s1 = sld [smem:[#allocation26_spill]]  ;;  %s270_s17 = scalar_lea.vmem [#allocation6], %s6785_s12 }
  0x24   : > { %s278_s25 = sshll.u32 %s270_s17, 4  ;;  %p324_p2 = scmp.lt.s32.totalorder %s7280_s23, 3  ;;  %s279_s25 = int_to_ptr.vmem [resolvable:$true] %s278_s25 }
  0x25   : > { %s267_s28 = scalar_lea.sflag [#allocation7], %s266_s11  ;;  %s7282_s29 = smov 192  }
  0x26   : > { %s7283_s26 = smov 12   ;;  %p7403_p3 = pnand %p4775_p1, %p324_p2 }
  0x27   : > { %s6783_s14 = smul.u32 96, %s7385_s9  ;;  %s4773_s12 = sshll.u32 %s7385_s9, 3 }
  0x28   : > { %s6787_s15 = smul.u32 3, %s7385_s9  ;;  %s8556_s0 = sld [smem:[#allocation25_spill]] }
  0x29   : > { %s275_s16 = scalar_lea.hbm %s8554_s1, %s6786_s13  ;;  %s6784_s13 = smul.u32 96, %s7276_s22 }
  0x2a   : > { %s276_s27 = sshll.u32 %s275_s16, 4  ;;  %s241_s11 = scalar_lea.vmem [#allocation3], %s6783_s14  ;;  %s277_s27 = int_to_ptr.hbm [resolvable:$true] %s276_s27 }
  0x2b   : > { %6810 = dma.hbm_to_vmem [thread:$0]  (!%p7389_p0), %s277_s27, 3072, %s279_s25, %s267_s28, %s7282_s29, %s7282_s29, %s7283_s26  }
  0x2c   : > { %s256_s20 = sshll.u32 %s241_s11, 4  ;;  %s238_s25 = scalar_lea.sflag [#allocation4], %s7385_s9  ;;  %s257_s20 = int_to_ptr.vmem [resolvable:$true] %s256_s20 }
  0x2d   : > { %s6788_s27 = smul.u32 3, %s7276_s22  ;;  %s292_s8 = scalar_lea.vmem [#allocation8], %s6787_s15 }
  0x2e   : > { %s253_s1 = scalar_lea.hbm %s8556_s0, %s6784_s13  ;;  %s300_s18 = sshll.u32 %s292_s8, 4  ;;  %s301_s18 = int_to_ptr.vmem [resolvable:$true] %s300_s18 }
  0x2f   : > { %s254_s23 = sshll.u32 %s253_s1, 4  ;;  %s296_s16 = scalar_lea.hbm %s8527_s2, %s6788_s27  ;;  %s255_s23 = int_to_ptr.hbm [resolvable:$true] %s254_s23 }
  0x30   : > { %6807 = dma.hbm_to_vmem [thread:$0]  (!%p7389_p0), %s255_s23, 1536, %s257_s20, %s238_s25, %s7282_s29, %s7282_s29, %s7283_s26  }
  0x31   : > { %s4774_s13 = sshll.u32 %s7276_s22, 3  ;;  %s298_s14 = sshll.u32 %s296_s16, 4  ;;  %s299_s14 = int_to_ptr.hbm [resolvable:$true] %s298_s14 }
  0x32   : > { %s315_s1 = scalar_lea.hbm %s8528_s3, %s4774_s13  ;;  %s311_s20 = scalar_lea.vmem [#allocation9], %s4773_s12 }
  0x33   : > { %s317_s0 = sshll.u32 %s315_s1, 4  ;;  %s319_s23 = sshll.u32 %s311_s20, 4  ;;  %s318_s0 = int_to_ptr.hbm [resolvable:$true] %s317_s0  ;;  %s320_s23 = int_to_ptr.vmem [resolvable:$true] %s319_s23 }
  0x34   : > { %6813 = dma.hbm_to_vmem [thread:$0]  (!%p7389_p0), %s299_s14, 48, %s301_s18, %s267_s28  }
  0x35   : > { %s308_s26 = scalar_lea.sflag [#allocation10], %s7385_s9  ;;  %328 = sbr.rel (%p7403_p3) target bundleno = 3043 (0xbe3), region = 36 }
  0x36   : > { %6816 = dma.hbm_to_vmem [thread:$0]  (!%p7389_p0), %s318_s0, 128, %s320_s23, %s308_s26  }
  0x37   : > { %s7433_s4 = sand.u32 (!%p7403_p3), 1, %s7264_s19  }
  0x38   : > { %s6789_s5 = smul.u32 (!%p7403_p3), 96, %s7433_s4  ;;  %s331_s8 = scalar_lea.sflag (!%p7403_p3), [#allocation4], %s7433_s4 }
  0x3a   : > { %s7437_s29 = scalar_lea.vmem [#allocation3], %s6789_s5 }
  0x3b   : > { %7239 = dma.done.wait (%p7367_p8), %s331_s8, 1536  }
  0x3c   : > { %7241 = vsyncadd (%p7367_p8), %s331_s8, 4294965760  ;;  %s340_s0 = sand.u32 1, %s7347_s24   ;;  %s6790_s18 = smul.u32 192, %s7433_s4 }
  0x3d   : > { %s341_s7 = scalar_lea.sflag [#allocation7], %s340_s0 }
  0x3e   : > { %s7445_s9 = scalar_lea.vmem [#allocation6], %s6790_s18 }
  0x3f   : > { %7243 = dma.done.wait (%p7367_p8), %s341_s7, 3120  }
  0x40   : > { %7245 = vsyncadd (%p7367_p8), %s341_s7, 4294964176  ;;  %s6791_s10 = smul.u32 3, %s7433_s4  ;;  %s4776_s28 = sshll.u32 %s7433_s4, 3 }
  0x41   : > { %s361_s15 = scalar_lea.sflag [#allocation10], %s7433_s4  ;;  %s364_s25 = scalar_lea.vmem [#allocation9], %s4776_s28 }
  0x42   : > { %s354_s12 = scalar_lea.vmem [#allocation8], %s6791_s10 }
  0x43   : > { %7247 = dma.done.wait (%p7367_p8), %s361_s15, 128  }
  0x44   : > { %7249 = vsyncadd (%p7367_p8), %s361_s15, 4294967168  ;;  %s4777_s24 = sshll.u32 %s7433_s4, 5  ;;  %v7459_v0 = vld [vmem:[%s354_s12] sm:$0x7]  ;;  %v426_v1 = vld [vmem:[%s364_s25] sm:$0xff]  ;;  %s7463_s16 = scalar_lea.vmem [#allocation12], %s4776_s28 }
  0x45   : > { %427 = vst [vmem:[#allocation2] sm:$0xff] %v426_v1  ;;  %s7461_s27 = scalar_lea.vmem [#allocation11], %s4777_s24  ;;  %p4779_p4 = scmp.ne.s32.totalorder %s7272_s21, 0 }
  0x47   : > { %432 = sbr.rel (%p4779_p4) target bundleno = 1535 (0x5ff), region = 60 }
  0x4c   : > { %v4866_v2 = vld [vmem:[%s7445_s9 + $0xa8] sm:$0xf]  ;;  %v6420_v3 = vld [vmem:[%s7445_s9 + $0xb0] sm:$0xf0]  ;;  %v6419_v4 = vld [vmem:[%s7445_s9 + $0xac] sm:$0xf] }
  0x4d   : > { %v4867_v5 = vor.u32 %v6420_v3, %v4866_v2  ;;  %v4868_v6 = vld [vmem:[%s7445_s9 + $0xb4] sm:$0xf0]  ;;  %v4854_v7 = vld [vmem:[%s7445_s9 + $0x90] sm:$0xf]  ;;  %v6417_v8 = vld [vmem:[%s7445_s9 + $0x98] sm:$0xf0] }
  0x4e   : > { %v4871_v9 = vor.u32 %v6419_v4, %v4868_v6  ;;  %v6416_v10 = vld [vmem:[%s7445_s9 + $0x94] sm:$0xf]  ;;  %v4856_v11 = vld [vmem:[%s7445_s9 + $0x9c] sm:$0xf0]  ;;  %v4855_v12 = vor.u32 %v6417_v8, %v4854_v7  ;;  %v4842_v14 = vld [vmem:[%s7445_s9 + $0x78] sm:$0xf] }
  0x4f   : > { %607 = vmatpush.bf16.msra.mxu0 %v4867_v5  ;;  %v4859_v13 = vor.u32 %v6416_v10, %v4856_v11  ;;  %v6414_v15 = vld [vmem:[%s7445_s9 + $0x80] sm:$0xf0]  ;;  %v6413_v16 = vld [vmem:[%s7445_s9 + $0x7c] sm:$0xf]  ;;  %v4844_v17 = vld [vmem:[%s7445_s9 + $0x84] sm:$0xf0] }
  0x50   : > { %620 = vmatpush.bf16.msra.mxu1 %v4871_v9  ;;  %v4874_v18 = vld [vmem:[%s7445_s9 + $0xb0] sm:$0xf]  ;;  %v4843_v19 = vor.u32 %v6414_v15, %v4842_v14  ;;  %v6421_v20 = vld [vmem:[%s7445_s9 + $0xb8] sm:$0xf0]  ;;  %v4847_v21 = vor.u32 %v6413_v16, %v4844_v17  ;;  %v4830_v22 = vld [vmem:[%s7445_s9 + $0x60] sm:$0xf] }
  0x51   : > { %v6411_v23 = vld [vmem:[%s7445_s9 + $0x68] sm:$0xf0]  ;;  %v4875_v24 = vor.u32 %v6421_v20, %v4874_v18  ;;  %v4862_v25 = vld [vmem:[%s7445_s9 + $0x98] sm:$0xf]  ;;  %v6410_v26 = vld [vmem:[%s7445_s9 + $0x64] sm:$0xf] }
  0x52   : > { %v4832_v27 = vld [vmem:[%s7445_s9 + $0x6c] sm:$0xf0]  ;;  %v6418_v28 = vld [vmem:[%s7445_s9 + $0xa0] sm:$0xf0]  ;;  %v4831_v30 = vor.u32 %v6411_v23, %v4830_v22  ;;  %v4850_v31 = vld [vmem:[%s7445_s9 + $0x80] sm:$0xf] }
  0x53   : > { %608 = vmatpush.bf16.msra.mxu0 %v4855_v12  ;;  %633 = vmatpush.bf16.msra.mxu2 %v4875_v24  ;;  %v4863_v29 = vor.u32 %v6418_v28, %v4862_v25  ;;  %v6415_v32 = vld [vmem:[%s7445_s9 + $0x88] sm:$0xf0]  ;;  %v4835_v33 = vor.u32 %v6410_v26, %v4832_v27  ;;  %v4818_v34 = vld [vmem:[%s7445_s9 + $0x48] sm:$0xf]  ;;  %v6408_v35 = vld [vmem:[%s7445_s9 + $0x50] sm:$0xf0] }
  0x54   : > { %621 = vmatpush.bf16.msra.mxu1 %v4859_v13  ;;  %v6407_v36 = vld [vmem:[%s7445_s9 + $0x4c] sm:$0xf]  ;;  %v4820_v37 = vld [vmem:[%s7445_s9 + $0x54] sm:$0xf0]  ;;  %v4851_v38 = vor.u32 %v6415_v32, %v4850_v31  ;;  %v4819_v39 = vor.u32 %v6408_v35, %v4818_v34  ;;  %v4838_v40 = vld [vmem:[%s7445_s9 + $0x68] sm:$0xf] }
  0x55   : > { %v6412_v41 = vld [vmem:[%s7445_s9 + $0x70] sm:$0xf0]  ;;  %v4823_v42 = vor.u32 %v6407_v36, %v4820_v37  ;;  %v4806_v43 = vld [vmem:[%s7445_s9 + $0x30] sm:$0xf]  ;;  %v6405_v44 = vld [vmem:[%s7445_s9 + $0x38] sm:$0xf0] }
  0x56   : > { %v6404_v45 = vld [vmem:[%s7445_s9 + $0x34] sm:$0xf]  ;;  %v4808_v46 = vld [vmem:[%s7445_s9 + $0x3c] sm:$0xf0]  ;;  %v4839_v47 = vor.u32 %v6412_v41, %v4838_v40  ;;  %v4807_v48 = vor.u32 %v6405_v44, %v4806_v43  ;;  %v4826_v49 = vld [vmem:[%s7445_s9 + $0x50] sm:$0xf] }
  0x57   : > { %609 = vmatpush.bf16.msra.mxu0 %v4843_v19  ;;  %634 = vmatpush.bf16.msra.mxu2 %v4863_v29  ;;  %v6409_v50 = vld [vmem:[%s7445_s9 + $0x58] sm:$0xf0]  ;;  %v4811_v51 = vor.u32 %v6404_v45, %v4808_v46  ;;  %v4794_v52 = vld [vmem:[%s7445_s9 + $0x18] sm:$0xf]  ;;  %v6402_v53 = vld [vmem:[%s7445_s9 + $0x20] sm:$0xf0] }
  0x58   : > { %622 = vmatpush.bf16.msra.mxu1 %v4847_v21  ;;  %v6401_v54 = vld [vmem:[%s7445_s9 + $0x1c] sm:$0xf]  ;;  %v4796_v55 = vld [vmem:[%s7445_s9 + $0x24] sm:$0xf0]  ;;  %v4827_v56 = vor.u32 %v6409_v50, %v4826_v49  ;;  %v4795_v57 = vor.u32 %v6402_v53, %v4794_v52  ;;  %v4814_v58 = vld [vmem:[%s7445_s9 + $0x38] sm:$0xf] }
  0x59   : > { %v6406_v59 = vld [vmem:[%s7445_s9 + $0x40] sm:$0xf0]  ;;  %v4799_v60 = vor.u32 %v6401_v54, %v4796_v55  ;;  %v4782_v61 = vld [vmem:[%s7445_s9] sm:$0xf]  ;;  %v6399_v62 = vld [vmem:[%s7445_s9 + $0x8] sm:$0xf0] }
  0x5a   : > { %v6398_v63 = vld [vmem:[%s7445_s9 + $0x4] sm:$0xf]  ;;  %v4784_v1 = vld [vmem:[%s7445_s9 + $0xc] sm:$0xf0]  ;;  %v4815_v2 = vor.u32 %v6406_v59, %v4814_v58  ;;  %v4783_v3 = vor.u32 %v6399_v62, %v4782_v61  ;;  %v7510_v4 = vld [vmem:[#allocation2] sm:$0xff]  ;;  %v7538_v41 = vperm.slane %v7459_v0, 0 }
  0x5b   : > { %610 = vmatpush.bf16.msra.mxu0 %v4831_v30  ;;  %635 = vmatpush.bf16.msra.mxu2 %v4851_v38  ;;  %v4802_v5 = vld [vmem:[%s7445_s9 + $0x20] sm:$0xf]  ;;  %v6403_v6 = vld [vmem:[%s7445_s9 + $0x28] sm:$0xf0]  ;;  %v4787_v7 = vor.u32 %v6398_v63, %v4784_v1  ;;  %v439_v8 = vpack.c.bf16 %v7510_v4, %v7510_v4  ;;  %v4790_v10 = vld [vmem:[%s7445_s9 + $0x8] sm:$0xf] }
  0x5c   : > { %623 = vmatpush.bf16.msra.mxu1 %v4835_v33  ;;  %v4803_v9 = vor.u32 %v6403_v6, %v4802_v5  ;;  %v6400_v11 = vld [vmem:[%s7445_s9 + $0x10] sm:$0xf0]  ;;  %v4966_v13 = vld [vmem:[%s7445_s9 + $0xa8] sm:$0xf]  ;;  %v6443_v15 = vld [vmem:[%s7445_s9 + $0xac] sm:$0xf] }
  0x5d   : > { %v4791_v12 = vor.u32 %v6400_v11, %v4790_v10  ;;  %v6444_v14 = vld [vmem:[%s7445_s9 + $0xb0] sm:$0xf0]  ;;  %v4968_v17 = vld [vmem:[%s7445_s9 + $0xb4] sm:$0xf0]  ;;  %v4974_v18 = vld [vmem:[%s7445_s9 + $0xb0] sm:$0xf] }
  0x5e   : > { %v4967_v16 = vor.u32 %v6444_v14, %v4966_v13  ;;  %v6445_v19 = vld [vmem:[%s7445_s9 + $0xb8] sm:$0xf0]  ;;  %v4971_v20 = vor.u32 %v6443_v15, %v4968_v17  ;;  %v4954_v22 = vld [vmem:[%s7445_s9 + $0x90] sm:$0xf]  ;;  %v6440_v24 = vld [vmem:[%s7445_s9 + $0x94] sm:$0xf] }
  0x5f   : > { %611 = vmatpush.bf16.msra.mxu0 %v4819_v39  ;;  %636 = vmatpush.bf16.msra.mxu2 %v4839_v47  ;;  %v4975_v21 = vor.u32 %v6445_v19, %v4974_v18  ;;  %v6441_v23 = vld [vmem:[%s7445_s9 + $0x98] sm:$0xf0]  ;;  %v4956_v26 = vld [vmem:[%s7445_s9 + $0x9c] sm:$0xf0]  ;;  %v4962_v27 = vld [vmem:[%s7445_s9 + $0x98] sm:$0xf] }
  0x60   : > { %624 = vmatpush.bf16.msra.mxu1 %v4823_v42  ;;  %861 = vmatpush.bf16.msra.mxu3 %v4967_v16  ;;  %v4955_v25 = vor.u32 %v6441_v23, %v4954_v22  ;;  %v6442_v28 = vld [vmem:[%s7445_s9 + $0xa0] sm:$0xf0]  ;;  %v4959_v29 = vor.u32 %v6440_v24, %v4956_v26  ;;  %v4942_v31 = vld [vmem:[%s7445_s9 + $0x78] sm:$0xf]  ;;  %v6437_v33 = vld [vmem:[%s7445_s9 + $0x7c] sm:$0xf] }
  0x61   : > { %v4963_v30 = vor.u32 %v6442_v28, %v4962_v27  ;;  %v6438_v32 = vld [vmem:[%s7445_s9 + $0x80] sm:$0xf0]  ;;  %v4944_v35 = vld [vmem:[%s7445_s9 + $0x84] sm:$0xf0]  ;;  %v4950_v36 = vld [vmem:[%s7445_s9 + $0x80] sm:$0xf] }
  0x62   : > { %v4943_v34 = vor.u32 %v6438_v32, %v4942_v31  ;;  %v6439_v37 = vld [vmem:[%s7445_s9 + $0x88] sm:$0xf0]  ;;  %v4947_v38 = vor.u32 %v6437_v33, %v4944_v35  ;;  %v434_v40 = vld [vmem:[%s7437_s29] sm:$0xff]  ;;  %v7541_v42 = vperm.slane %v7459_v0, 1  ;;  %v4932_v47 = vld [vmem:[%s7445_s9 + $0x6c] sm:$0xf0] }
  0x63   : > { %612 = vmatpush.bf16.msra.mxu0 %v4807_v48  ;;  %637 = vmatpush.bf16.msra.mxu2 %v4827_v56  ;;  %v4951_v39 = vor.u32 %v6439_v37, %v4950_v36  ;;  %v4930_v43 = vld [vmem:[%s7445_s9 + $0x60] sm:$0xf]  ;;  %v6435_v44 = vld [vmem:[%s7445_s9 + $0x68] sm:$0xf0]  ;;  %v6434_v45 = vld [vmem:[%s7445_s9 + $0x64] sm:$0xf]  ;;  %v436_v50 = vunpack.c.l.bf16 %v434_v40  ;;  %v437_v54 = vunpack.c.h.bf16 %v434_v40 }
  0x64   : > { %625 = vmatpush.bf16.msra.mxu1 %v4811_v51  ;;  %862 = vmatpush.bf16.msra.mxu3 %v4955_v25  ;;  %v4931_v46 = vor.u32 %v6435_v44, %v4930_v43  ;;  %v4938_v48 = vld [vmem:[%s7445_s9 + $0x68] sm:$0xf]  ;;  %v6436_v49 = vld [vmem:[%s7445_s9 + $0x70] sm:$0xf0]  ;;  %v4935_v51 = vor.u32 %v6434_v45, %v4932_v47  ;;  %v6431_v59 = vld [vmem:[%s7445_s9 + $0x4c] sm:$0xf] }
  0x65   : > { %v4939_v52 = vor.u32 %v6436_v49, %v4938_v48  ;;  %v6432_v58 = vld [vmem:[%s7445_s9 + $0x50] sm:$0xf0]  ;;  %v4920_v62 = vld [vmem:[%s7445_s9 + $0x54] sm:$0xf0]  ;;  %v4926_v63 = vld [vmem:[%s7445_s9 + $0x50] sm:$0xf] }
  0x66   : > { %v6433_v1 = vld [vmem:[%s7445_s9 + $0x58] sm:$0xf0]  ;;  %v4908_v13 = vld [vmem:[%s7445_s9 + $0x3c] sm:$0xf0]  ;;  %v4914_v15 = vld [vmem:[%s7445_s9 + $0x38] sm:$0xf] }
  0x67   : > { %613 = vmatpush.bf16.msra.mxu0 %v4795_v57  ;;  %638 = vmatpush.bf16.msra.mxu2 %v4815_v2  ;;  %v4918_v57 = vld [vmem:[%s7445_s9 + $0x48] sm:$0xf]  ;;  %v4927_v5 = vor.u32 %v6433_v1, %v4926_v63  ;;  %v6430_v16 = vld [vmem:[%s7445_s9 + $0x40] sm:$0xf0]  ;;  %v4894_v17 = vld [vmem:[%s7445_s9 + $0x18] sm:$0xf] }
  0x68   : > { %626 = vmatpush.bf16.msra.mxu1 %v4799_v60  ;;  %863 = vmatpush.bf16.msra.mxu3 %v4943_v34  ;;  %v4919_v61 = vor.u32 %v6432_v58, %v4918_v57  ;;  %v4915_v19 = vor.u32 %v6430_v16, %v4914_v15  ;;  %v4896_v22 = vld [vmem:[%s7445_s9 + $0x24] sm:$0xf0]  ;;  %v4902_v26 = vld [vmem:[%s7445_s9 + $0x20] sm:$0xf]  ;;  %v6427_v27 = vld [vmem:[%s7445_s9 + $0x28] sm:$0xf0] }
  0x69   : > { %v4882_v28 = vld [vmem:[%s7445_s9] sm:$0xf]  ;;  %v6422_v31 = vld [vmem:[%s7445_s9 + $0x4] sm:$0xf]  ;;  %v4884_v32 = vld [vmem:[%s7445_s9 + $0xc] sm:$0xf0] }
  0x6a   : > { %v4890_v33 = vld [vmem:[%s7445_s9 + $0x8] sm:$0xf]  ;;  %v6424_v34 = vld [vmem:[%s7445_s9 + $0x10] sm:$0xf0] }
  0x6b   : > { %614 = vmatpush.bf16.msra.mxu0 %v4783_v3  ;;  %639 = vmatpush.bf16.msra.mxu2 %v4803_v9  ;;  %v4923_v3 = vor.u32 %v6431_v59, %v4920_v62  ;;  %v6429_v9 = vld [vmem:[%s7445_s9 + $0x38] sm:$0xf0]  ;;  %v4891_v43 = vor.u32 %v6424_v34, %v4890_v33  ;;  %v435_v57 = vld [vmem:[%s7437_s29 + $0x8] sm:$0xf] }
  0x6c   : > { %627 = vmatpush.bf16.msra.mxu1 %v4787_v7  ;;  %864 = vmatpush.bf16.msra.mxu3 %v4931_v46  ;;  %v5067_v16 = vld [vmem:[%s7445_s9 + $0xa8] sm:$0xf] }
  0x6e   : > { %615 = vmatmul.bf16.vlgmr.msra.gmra.mxu0 %v439_v8 }
  0x6f   : > { %628 = vmatmul.bf16.vlgmr.msra.gmra.mxu1 %v439_v8  ;;  %640 = vmatpush.bf16.msra.mxu2 %v4791_v12  ;;  %v6428_v12 = vld [vmem:[%s7445_s9 + $0x34] sm:$0xf] }
  0x70   : > { %874 = vmatpush.bf16.msrb.mxu0 %v4971_v20  ;;  %887 = vmatpush.bf16.msrb.mxu1 %v4975_v21  ;;  %v4911_v14 = vor.u32 %v6428_v12, %v4908_v13  ;;  %v6426_v20 = vld [vmem:[%s7445_s9 + $0x20] sm:$0xf0]  ;;  %v6425_v21 = vld [vmem:[%s7445_s9 + $0x1c] sm:$0xf] }
  0x71   : > { %865 = vmatpush.bf16.msra.mxu3 %v4919_v61  ;;  %v4895_v24 = vor.u32 %v6426_v20, %v4894_v17  ;;  %v4899_v25 = vor.u32 %v6425_v21, %v4896_v22  ;;  %v438_v61 = vunpack.c.l.bf16 %v435_v57  ;;  %v6468_v17 = vld [vmem:[%s7445_s9 + $0xb0] sm:$0xf0]  ;;  %v5075_v20 = vld [vmem:[%s7445_s9 + $0xb0] sm:$0xf]  ;;  %v6469_v21 = vld [vmem:[%s7445_s9 + $0xb8] sm:$0xf0] }
  0x72   : > { %641 = vmatmul.bf16.vlgmr.msra.gmra.mxu2 %v439_v8  ;;  %v4906_v8 = vld [vmem:[%s7445_s9 + $0x30] sm:$0xf]  ;;  %v6460_v57 = vld [vmem:[%s7445_s9 + $0x70] sm:$0xf0] }
  0x73   : > { %v4907_v11 = vor.u32 %v6429_v9, %v4906_v8 }
  0x74   : > { %875 = vmatpush.bf16.msrb.mxu0 %v4959_v29  ;;  %888 = vmatpush.bf16.msrb.mxu1 %v4963_v30  ;;  %v4903_v29 = vor.u32 %v6427_v27, %v4902_v26  ;;  %v6423_v30 = vld [vmem:[%s7445_s9 + $0x8] sm:$0xf0]  ;;  %v6465_v26 = vld [vmem:[%s7445_s9 + $0x98] sm:$0xf0]  ;;  %v6464_v27 = vld [vmem:[%s7445_s9 + $0x94] sm:$0xf] }
  0x75   : > { %866 = vmatpush.bf16.msra.mxu3 %v4907_v11  ;;  %v4883_v35 = vor.u32 %v6423_v30, %v4882_v28  ;;  %v5063_v30 = vld [vmem:[%s7445_s9 + $0x98] sm:$0xf] }
  0x78   : > { %876 = vmatpush.bf16.msrb.mxu0 %v4947_v38  ;;  %889 = vmatpush.bf16.msrb.mxu1 %v4951_v39  ;;  %v4887_v38 = vor.u32 %v6422_v31, %v4884_v32  ;;  %v6466_v31 = vld [vmem:[%s7445_s9 + $0xa0] sm:$0xf0] }
  0x79   : > { %867 = vmatpush.bf16.msra.mxu3 %v4895_v24  ;;  %v7593_v24 = vld [vmem:[%s7437_s29 + $0xc] sm:$0xff]  ;;  %v5064_v33 = vor.u32 %v6466_v31, %v5063_v30 }
  0x7a   : > { %v699_v34 = vunpack.c.h.bf16 %v7593_v24 }
  0x7c   : > { %877 = vmatpush.bf16.msrb.mxu0 %v4935_v51  ;;  %890 = vmatpush.bf16.msrb.mxu1 %v4939_v52 }
  0x7d   : > { %868 = vmatpush.bf16.msra.mxu3 %v4883_v35  ;;  %v5043_v35 = vld [vmem:[%s7445_s9 + $0x78] sm:$0xf] }
  0x80   : > { %878 = vmatpush.bf16.msrb.mxu0 %v4923_v3  ;;  %891 = vmatpush.bf16.msrb.mxu1 %v4927_v5 }
  0x84   : > { %879 = vmatpush.bf16.msrb.mxu0 %v4911_v14  ;;  %892 = vmatpush.bf16.msrb.mxu1 %v4915_v19  ;;  %v5068_v19 = vor.u32 %v6468_v17, %v5067_v16 }
  0x86   : > { %1116 = vmatpush.bf16.msrb.mxu2 %v5068_v19  ;;  %v5015_v19 = vld [vmem:[%s7445_s9 + $0x38] sm:$0xf] }
  0x88   : > { %880 = vmatpush.bf16.msrb.mxu0 %v4899_v25  ;;  %893 = vmatpush.bf16.msrb.mxu1 %v4903_v29  ;;  %v5055_v25 = vld [vmem:[%s7445_s9 + $0x90] sm:$0xf]  ;;  %v5057_v29 = vld [vmem:[%s7445_s9 + $0x9c] sm:$0xf0] }
  0x89   : > { %v5056_v28 = vor.u32 %v6465_v26, %v5055_v25  ;;  %v5060_v32 = vor.u32 %v6464_v27, %v5057_v29  ;;  %v6450_v25 = vld [vmem:[%s7445_s9 + $0x20] sm:$0xf0]  ;;  %v6449_v26 = vld [vmem:[%s7445_s9 + $0x1c] sm:$0xf]  ;;  %v4997_v27 = vld [vmem:[%s7445_s9 + $0x24] sm:$0xf0] }
  0x8a   : > { %v6451_v29 = vld [vmem:[%s7445_s9 + $0x28] sm:$0xf0] }
  0x8b   : > { %1117 = vmatpush.bf16.msrb.mxu2 %v5056_v28  ;;  %v5003_v28 = vld [vmem:[%s7445_s9 + $0x20] sm:$0xf] }
  0x8c   : > { %881 = vmatpush.bf16.msrb.mxu0 %v4887_v38  ;;  %894 = vmatpush.bf16.msrb.mxu1 %v4891_v43  ;;  %v5051_v43 = vld [vmem:[%s7445_s9 + $0x80] sm:$0xf] }
  0xeb   : > { %v616_v53 = vpop.f32.mrf.mxu0 }
  0xec   : > { %v617_v55 = vadd.f32 %v616_v53, %v7538_v41  ;;  %v629_v56 = vpop.f32.mrf.mxu1 }
  0xed   : > { %v630_v60 = vadd.f32 %v629_v56, %v7541_v42 }
  0xee   : > { %v646_v2 = vadd.f32 %v617_v55, %v436_v50  ;;  %v7576_v50 = vperm.slane %v7459_v0, 2 }
  0xef   : > { %v666_v6 = vadd.f32 %v630_v60, %v437_v54 }
  0xf0   : > { %v4876_v7 = vmul.f32 -1.442695, %v646_v2 }
  0xf1   : > { %v4877_v10 = vmul.f32 -1.442695, %v666_v6 }
  0xf2   : > { %6878 = vpow2.f32 %v4876_v7 }
  0xf3   : > { %6880 = vpow2.f32 %v4877_v10  ;;  %v618_v18 = vpop.f32.mrf.mxu0 }
  0xf4   : > { %v631_v23 = vpop.f32.mrf.mxu1  ;;  %v6467_v18 = vld [vmem:[%s7445_s9 + $0xac] sm:$0xf] }
  0xf5   : > { %v642_v37 = vpop.f32.mrf.mxu2  ;;  %v5076_v23 = vor.u32 %v6469_v21, %v5075_v20  ;;  %v4995_v21 = vld [vmem:[%s7445_s9 + $0x18] sm:$0xf] }
  0xf6   : > { %v643_v58 = vadd.f32 %v642_v37, %v7576_v50  ;;  %v6461_v37 = vld [vmem:[%s7445_s9 + $0x7c] sm:$0xf] }
  0xf7   : > { %1142 = vmatpush.bf16.msra.mxu0 %v5076_v23 }
  0xf8   : > { %v6879_v36 = vpop.eup %6878 }
  0xf9   : > { %v6881_v39 = vpop.eup %6880  ;;  %v650_v40 = vadd.f32 1.0, %v6879_v36  ;;  %v6462_v36 = vld [vmem:[%s7445_s9 + $0x80] sm:$0xf0] }
  0xfa   : > { %v670_v44 = vadd.f32 1.0, %v6881_v39  ;;  %v5044_v39 = vor.u32 %v6462_v36, %v5043_v35  ;;  %v5004_v35 = vor.u32 %v6451_v29, %v5003_v28  ;;  %v4983_v36 = vld [vmem:[%s7445_s9] sm:$0xf]  ;;  %v6489_v28 = vld [vmem:[%s7445_s9 + $0x98] sm:$0xf0] }
  0xfb   : > { %6882 = vrcp.f32 %v650_v40  ;;  %v662_v53 = vand.u32 2147483648, %v650_v40  ;;  %v660_v55 = vand.u32 2147483647, %v650_v40  ;;  %vm656_vm1 = vweird.f32 %v650_v40  ;;  %1143 = vmatpush.bf16.msra.mxu0 %v5064_v33  ;;  %v6488_v29 = vld [vmem:[%s7445_s9 + $0x94] sm:$0xf] }
  0xfc   : > { %6884 = vrcp.f32 %v670_v44  ;;  %vm676_vm4 = vweird.f32 %v670_v44  ;;  %v682_v3 = vand.u32 2147483648, %v670_v44  ;;  %v680_v5 = vand.u32 2147483647, %v670_v44  ;;  %1118 = vmatpush.bf16.msrb.mxu2 %v5044_v39  ;;  %v4985_v39 = vld [vmem:[%s7445_s9 + $0xc] sm:$0xf0] }
  0xfd   : > { %v644_v45 = vpop.f32.mrf.mxu2  ;;  %v663_v60 = vor.u32 1.1754944e-38, %v662_v53  ;;  %vm661_vm3 = vcmp.eq.f32.partialorder %v660_v55, 8.507059e+37  ;;  %v6458_v53 = vld [vmem:[%s7445_s9 + $0x64] sm:$0xf]  ;;  %v5033_v55 = vld [vmem:[%s7445_s9 + $0x6c] sm:$0xf0]  ;;  %v4996_v33 = vor.u32 %v6450_v25, %v4995_v21 }
  0xfe   : > { %v683_v8 = vor.u32 1.1754944e-38, %v682_v3  ;;  %vm681_vm7 = vcmp.eq.f32.partialorder %v680_v5, 8.507059e+37  ;;  %v6491_v21 = vld [vmem:[%s7445_s9 + $0xac] sm:$0xf] }
 0x101   : > { %v6883_v46 = vpop.eup %6882 }
 0x102   : > { %v6885_v47 = vpop.eup %6884  ;;  %v652_v48 = vmul.f32 %v6883_v46, %v650_v40  ;;  %vm657_vm0 = vweird.f32 %v6883_v46  ;;  %v5045_v40 = vld [vmem:[%s7445_s9 + $0x84] sm:$0xf0] }
 0x103   : > { %v672_v49 = vmul.f32 %v6885_v47, %v670_v44  ;;  %vm658_vm2 = vmor %vm656_vm1, %vm657_vm0  ;;  %vm677_vm5 = vweird.f32 %v6885_v47  ;;  %v6463_v44 = vld [vmem:[%s7445_s9 + $0x88] sm:$0xf0] }
 0x104   : > { %v653_v51 = vsub.f32 1.0, %v652_v48  ;;  %vm678_vm6 = vmor %vm676_vm4, %vm677_vm5  ;;  %v5052_v48 = vor.u32 %v6463_v44, %v5051_v43  ;;  %v6448_v43 = vld [vmem:[%s7445_s9 + $0x10] sm:$0xf0] }
 0x105   : > { %v673_v52 = vsub.f32 1.0, %v672_v49 }
 0x106   : > { %v654_v54 = vmul.f32 %v6883_v46, %v653_v51  ;;  %1144 = vmatpush.bf16.msra.mxu0 %v5052_v48  ;;  %v5031_v51 = vld [vmem:[%s7445_s9 + $0x60] sm:$0xf] }
 0x107   : > { %v674_v56 = vmul.f32 %v6885_v47, %v673_v52  ;;  %v6459_v52 = vld [vmem:[%s7445_s9 + $0x68] sm:$0xf0] }
 0x108   : > { %v655_v59 = vadd.f32 %v6883_v46, %v654_v54  ;;  %v5032_v54 = vor.u32 %v6459_v52, %v5031_v51 }
 0x109   : > { %v675_v1 = vadd.f32 %v6885_v47, %v674_v56  ;;  %v5039_v56 = vld [vmem:[%s7445_s9 + $0x68] sm:$0xf] }
 0x10a   : > { %v659_v62 = vsel %vm658_vm2, %v6883_v46, %v655_v59  ;;  %v698_v59 = vunpack.c.l.bf16 %v7593_v24  ;;  %1119 = vmatpush.bf16.msrb.mxu2 %v5032_v54 }
 0x10b   : > { %v664_v63 = vsel %vm661_vm3, %v663_v60, %v659_v62  ;;  %v679_v7 = vsel %vm678_vm6, %v6885_v47, %v675_v1  ;;  %v5048_v47 = vor.u32 %v6461_v37, %v5045_v40  ;;  %v5036_v60 = vor.u32 %v6458_v53, %v5033_v55  ;;  %v6456_v1 = vld [vmem:[%s7445_s9 + $0x50] sm:$0xf0]  ;;  %v6447_v37 = vld [vmem:[%s7445_s9 + $0x8] sm:$0xf0]  ;;  %v4991_v40 = vld [vmem:[%s7445_s9 + $0x8] sm:$0xf] }
 0x10c   : > { %v686_v2 = vmul.f32 %v664_v63, %v643_v58  ;;  %v684_v9 = vsel %vm681_vm7, %v683_v8, %v679_v7  ;;  %v5019_v63 = vld [vmem:[%s7445_s9 + $0x48] sm:$0xf]  ;;  %v5027_v7 = vld [vmem:[%s7445_s9 + $0x50] sm:$0xf]  ;;  %v6457_v8 = vld [vmem:[%s7445_s9 + $0x58] sm:$0xf0]  ;;  %v4984_v44 = vor.u32 %v6447_v37, %v4983_v36  ;;  %v4992_v48 = vor.u32 %v6448_v43, %v4991_v40 }
 0x10d   : > { %v689_v10 = vsub.f32 1.0, %v684_v9  ;;  %v691_v13 = vmul.f32 %v684_v9, %v7510_v4  ;;  %v5069_v4 = vld [vmem:[%s7445_s9 + $0xb4] sm:$0xf0]  ;;  %v5020_v5 = vor.u32 %v6456_v1, %v5019_v63  ;;  %v6486_v37 = vld [vmem:[%s7445_s9 + $0x80] sm:$0xf0] }
 0x10e   : > { %v687_v6 = vadd.f32 %v686_v2, %v438_v61  ;;  %v5072_v22 = vor.u32 %v6467_v18, %v5069_v4  ;;  %v5040_v61 = vor.u32 %v6460_v57, %v5039_v56  ;;  %v6455_v2 = vld [vmem:[%s7445_s9 + $0x4c] sm:$0xf]  ;;  %v5009_v18 = vld [vmem:[%s7445_s9 + $0x3c] sm:$0xf0]  ;;  %v6454_v4 = vld [vmem:[%s7445_s9 + $0x40] sm:$0xf0] }
 0x10f   : > { %1120 = vmatpush.bf16.msrb.mxu2 %v5020_v5  ;;  %v5016_v24 = vor.u32 %v6454_v4, %v5015_v19  ;;  %v5168_v4 = vld [vmem:[%s7445_s9 + $0xa8] sm:$0xf]  ;;  %v5144_v36 = vld [vmem:[%s7445_s9 + $0x78] sm:$0xf]  ;;  %v5152_v43 = vld [vmem:[%s7445_s9 + $0x80] sm:$0xf] }
 0x110   : > { %6886 = vtanh.f32 %v687_v6  ;;  %1129 = vmatpush.bf16.msrb.mxu3 %v5072_v22  ;;  %1145 = vmatpush.bf16.msra.mxu0 %v5040_v61  ;;  %v5021_v6 = vld [vmem:[%s7445_s9 + $0x54] sm:$0xf0]  ;;  %v4879_v61 = vld [vmem:[%s7437_s29 + $0x14] sm:$0xf]  ;;  %v5146_v40 = vld [vmem:[%s7445_s9 + $0x84] sm:$0xf0] }
 0x114   : > { %1130 = vmatpush.bf16.msrb.mxu3 %v5060_v32 }
 0x116   : > { %v6887_v11 = vpop.eup %6886 }
 0x117   : > { %v690_v12 = vmul.f32 %v6887_v11, %v689_v10  ;;  %v5024_v10 = vor.u32 %v6455_v2, %v5021_v6  ;;  %v5028_v11 = vor.u32 %v6457_v8, %v5027_v7 }
 0x118   : > { %1131 = vmatpush.bf16.msrb.mxu3 %v5048_v47 }
 0x119   : > { %v7581_v14 = vadd.f32 %v691_v13, %v690_v12  ;;  %v5007_v12 = vld [vmem:[%s7445_s9 + $0x30] sm:$0xf]  ;;  %v6453_v13 = vld [vmem:[%s7445_s9 + $0x38] sm:$0xf0]  ;;  %1146 = vmatpush.bf16.msra.mxu0 %v5028_v11 }
 0x11a   : > { %v5008_v20 = vor.u32 %v6453_v13, %v5007_v12 }
 0x11b   : > { %v693_v15 = vpack.c.bf16 %v7581_v14, %v7581_v14 }
 0x11c   : > { %1132 = vmatpush.bf16.msrb.mxu3 %v5036_v60  ;;  %1121 = vmatpush.bf16.msrb.mxu2 %v5008_v20  ;;  %v6492_v20 = vld [vmem:[%s7445_s9 + $0xb0] sm:$0xf0] }
 0x11d   : > { %694 = vst [vmem:[%s7461_s27] sm:$0xf] %v693_v15  ;;  %869 = vmatmul.bf16.vlgmr.msra.gmra.mxu3 %v693_v15  ;;  %882 = vmatmul.bf16.vlgmr.msrb.gmra.mxu0 %v693_v15 }
 0x11e   : > { %895 = vmatmul.bf16.vlgmr.msrb.gmra.mxu1 %v693_v15  ;;  %v6452_v15 = vld [vmem:[%s7445_s9 + $0x34] sm:$0xf]  ;;  %1147 = vmatpush.bf16.msra.mxu0 %v5016_v24  ;;  %v6493_v24 = vld [vmem:[%s7445_s9 + $0xb8] sm:$0xf0] }
 0x11f   : > { %v5012_v23 = vor.u32 %v6452_v15, %v5009_v18 }
 0x120   : > { %1133 = vmatpush.bf16.msrb.mxu3 %v5024_v10  ;;  %1122 = vmatpush.bf16.msrb.mxu2 %v4996_v33  ;;  %v6490_v33 = vld [vmem:[%s7445_s9 + $0xa0] sm:$0xf0] }
 0x122   : > { %1148 = vmatpush.bf16.msra.mxu0 %v5004_v35 }
 0x124   : > { %1134 = vmatpush.bf16.msrb.mxu3 %v5012_v23  ;;  %1123 = vmatpush.bf16.msrb.mxu2 %v4984_v44  ;;  %v5176_v23 = vld [vmem:[%s7445_s9 + $0xb0] sm:$0xf]  ;;  %v6487_v44 = vld [vmem:[%s7445_s9 + $0x88] sm:$0xf0] }
 0x126   : > { %1149 = vmatpush.bf16.msra.mxu0 %v4992_v48  ;;  %v5153_v48 = vor.u32 %v6487_v44, %v5152_v43  ;;  %v5092_v43 = vld [vmem:[%s7445_s9 + $0x8] sm:$0xf]  ;;  %v6472_v44 = vld [vmem:[%s7445_s9 + $0x10] sm:$0xf0] }
 0x19a   : > { %v883_v38 = vpop.f32.mrf.mxu0 }
 0x19b   : > { %v884_v45 = vadd.f32 %v883_v38, %v7541_v42  ;;  %v7609_v46 = vpop.f32.mrf.mxu1  ;;  %v6446_v38 = vld [vmem:[%s7445_s9 + $0x4] sm:$0xf] }
 0x19c   : > { %v4988_v47 = vor.u32 %v6446_v38, %v4985_v39  ;;  %v897_v1 = vadd.f32 %v7609_v46, %v7576_v50  ;;  %v6485_v38 = vld [vmem:[%s7445_s9 + $0x7c] sm:$0xf]  ;;  %v5145_v39 = vor.u32 %v6486_v37, %v5144_v36  ;;  %v5084_v37 = vld [vmem:[%s7445_s9] sm:$0xf] }
 0x19d   : > { %v920_v49 = vadd.f32 %v884_v45, %v699_v34  ;;  %v5000_v34 = vor.u32 %v6449_v26, %v4997_v27  ;;  %v5177_v26 = vor.u32 %v6493_v24, %v5176_v23  ;;  %v5156_v27 = vld [vmem:[%s7445_s9 + $0x90] sm:$0xf]  ;;  %v6474_v23 = vld [vmem:[%s7445_s9 + $0x20] sm:$0xf0] }
 0x19f   : > { %v4977_v58 = vmul.f32 -1.442695, %v920_v49  ;;  %1135 = vmatpush.bf16.msrb.mxu3 %v5000_v34 }
 0x1a0   : > { %v870_v62 = vpop.f32.mrf.mxu3 }
 0x1a1   : > { %6888 = vpow2.f32 %v4977_v58  ;;  %v871_v3 = vadd.f32 %v870_v62, %v7538_v41 }
 0x1a2   : > { %v885_v9 = vpop.f32.mrf.mxu0 }
 0x1a3   : > { %v900_v16 = vadd.f32 %v871_v3, %v698_v59  ;;  %v898_v17 = vpop.f32.mrf.mxu1  ;;  %1136 = vmatpush.bf16.msrb.mxu3 %v4988_v47  ;;  %v700_v3 = vunpack.c.l.bf16 %v4879_v61  ;;  %v5149_v47 = vor.u32 %v6485_v38, %v5146_v40  ;;  %v6471_v38 = vld [vmem:[%s7445_s9 + $0x8] sm:$0xf0]  ;;  %v5086_v40 = vld [vmem:[%s7445_s9 + $0xc] sm:$0xf0] }
 0x1a5   : > { %v4976_v22 = vmul.f32 -1.442695, %v900_v16 }
 0x1a7   : > { %v6889_v30 = vpop.eup %6888  ;;  %6890 = vpow2.f32 %v4976_v22  ;;  %v5169_v22 = vor.u32 %v6492_v20, %v5168_v4  ;;  %1397 = vmatpush.bf16.msra.mxu3 %v5177_v26  ;;  %v5110_v4 = vld [vmem:[%s7445_s9 + $0x3c] sm:$0xf0]  ;;  %v5116_v20 = vld [vmem:[%s7445_s9 + $0x38] sm:$0xf] }
 0x1a8   : > { %v924_v31 = vadd.f32 1.0, %v6889_v30  ;;  %v872_v32 = vpop.f32.mrf.mxu3  ;;  %v5157_v30 = vor.u32 %v6489_v28, %v5156_v27  ;;  %v6473_v28 = vld [vmem:[%s7445_s9 + $0x1c] sm:$0xf] }
 0x1a9   : > { %1371 = vmatpush.bf16.msra.mxu1 %v5169_v22  ;;  %v5164_v32 = vld [vmem:[%s7445_s9 + $0x98] sm:$0xf] }
 0x1aa   : > { %6892 = vrcp.f32 %v924_v31  ;;  %v936_v7 = vand.u32 2147483648, %v924_v31  ;;  %vm930_vm13 = vweird.f32 %v924_v31  ;;  %v934_v9 = vand.u32 2147483647, %v924_v31 }
 0x1ab   : > { %v5165_v35 = vor.u32 %v6490_v33, %v5164_v32 }
 0x1ac   : > { %v937_v12 = vor.u32 1.1754944e-38, %v936_v7  ;;  %vm935_vm15 = vcmp.eq.f32.partialorder %v934_v9, 8.507059e+37  ;;  %v5128_v9 = vld [vmem:[%s7445_s9 + $0x50] sm:$0xf] }
 0x1ad   : > { %v6891_v45 = vpop.eup %6890  ;;  %1372 = vmatpush.bf16.msra.mxu1 %v5157_v30  ;;  %1398 = vmatpush.bf16.msra.mxu3 %v5165_v35  ;;  %v5104_v30 = vld [vmem:[%s7445_s9 + $0x20] sm:$0xf] }
 0x1ae   : > { %v904_v49 = vadd.f32 1.0, %v6891_v45 }
 0x1b0   : > { %6894 = vrcp.f32 %v904_v49  ;;  %v6893_v51 = vpop.eup %6892  ;;  %v916_v57 = vand.u32 2147483648, %v904_v49  ;;  %v914_v59 = vand.u32 2147483647, %v904_v49  ;;  %vm910_vm9 = vweird.f32 %v904_v49 }
 0x1b1   : > { %v926_v52 = vmul.f32 %v6893_v51, %v924_v31  ;;  %vm931_vm12 = vweird.f32 %v6893_v51  ;;  %v5158_v31 = vld [vmem:[%s7445_s9 + $0x9c] sm:$0xf0]  ;;  %1373 = vmatpush.bf16.msra.mxu1 %v5145_v39  ;;  %1399 = vmatpush.bf16.msra.mxu3 %v5153_v48  ;;  %v6470_v39 = vld [vmem:[%s7445_s9 + $0x4] sm:$0xf] }
 0x1b2   : > { %v917_v63 = vor.u32 1.1754944e-38, %v916_v57  ;;  %vm915_vm11 = vcmp.eq.f32.partialorder %v914_v59, 8.507059e+37  ;;  %vm932_vm14 = vmor %vm930_vm13, %vm931_vm12  ;;  %v5161_v34 = vor.u32 %v6488_v29, %v5158_v31  ;;  %v6484_v57 = vld [vmem:[%s7445_s9 + $0x70] sm:$0xf0]  ;;  %v5098_v29 = vld [vmem:[%s7445_s9 + $0x24] sm:$0xf0] }
 0x1b3   : > { %v927_v55 = vsub.f32 1.0, %v926_v52  ;;  %v6483_v52 = vld [vmem:[%s7445_s9 + $0x68] sm:$0xf0]  ;;  %v5101_v35 = vor.u32 %v6473_v28, %v5098_v29 }
 0x1b4   : > { %v6475_v31 = vld [vmem:[%s7445_s9 + $0x28] sm:$0xf0] }
 0x1b5   : > { %v928_v60 = vmul.f32 %v6893_v51, %v927_v55  ;;  %v5134_v55 = vld [vmem:[%s7445_s9 + $0x6c] sm:$0xf0]  ;;  %v5105_v36 = vor.u32 %v6475_v31, %v5104_v30  ;;  %v6513_v31 = vld [vmem:[%s7445_s9 + $0x98] sm:$0xf0] }
 0x1b6   : > { %v6895_v53 = vpop.eup %6894  ;;  %v5257_v30 = vld [vmem:[%s7445_s9 + $0x90] sm:$0xf] }
 0x1b7   : > { %v906_v54 = vmul.f32 %v6895_v53, %v904_v49  ;;  %vm911_vm8 = vweird.f32 %v6895_v53  ;;  %v929_v6 = vadd.f32 %v6893_v51, %v928_v60  ;;  %v4979_v49 = vld [vmem:[%s7437_s29 + $0x18] sm:$0xff] }
 0x1b8   : > { %vm912_vm10 = vmor %vm910_vm9, %vm911_vm8  ;;  %v954_v59 = vunpack.c.h.bf16 %v4979_v49 }
 0x1b9   : > { %v907_v56 = vsub.f32 1.0, %v906_v54  ;;  %v933_v11 = vsel %vm932_vm14, %v6893_v51, %v929_v6  ;;  %v5132_v51 = vld [vmem:[%s7445_s9 + $0x60] sm:$0xf] }
 0x1ba   : > { %v938_v46 = vsel %vm935_vm15, %v937_v12, %v933_v11  ;;  %v5133_v54 = vor.u32 %v6483_v52, %v5132_v51  ;;  %v5093_v51 = vor.u32 %v6472_v44, %v5092_v43  ;;  %v6509_v43 = vld [vmem:[%s7445_s9 + $0x7c] sm:$0xf] }
 0x1bb   : > { %v908_v58 = vmul.f32 %v6895_v53, %v907_v56  ;;  %v943_v13 = vsub.f32 1.0, %v938_v46  ;;  %v945_v17 = vmul.f32 %v938_v46, %v7581_v14  ;;  %v5170_v14 = vld [vmem:[%s7445_s9 + $0xb4] sm:$0xf0]  ;;  %v5140_v56 = vld [vmem:[%s7445_s9 + $0x68] sm:$0xf] }
 0x1bc   : > { %v5173_v25 = vor.u32 %v6491_v21, %v5170_v14  ;;  %v5141_v61 = vor.u32 %v6484_v57, %v5140_v56  ;;  %1374 = vmatpush.bf16.msra.mxu1 %v5133_v54  ;;  %v5108_v46 = vld [vmem:[%s7445_s9 + $0x30] sm:$0xf]  ;;  %v6478_v21 = vld [vmem:[%s7445_s9 + $0x40] sm:$0xf0]  ;;  %v5096_v14 = vld [vmem:[%s7445_s9 + $0x18] sm:$0xf] }
 0x1bd   : > { %v909_v62 = vadd.f32 %v6895_v53, %v908_v58  ;;  %v953_v58 = vunpack.c.l.bf16 %v4979_v49  ;;  %v5117_v27 = vor.u32 %v6478_v21, %v5116_v20  ;;  %v5089_v49 = vor.u32 %v6470_v39, %v5086_v40  ;;  %v5245_v39 = vld [vmem:[%s7445_s9 + $0x78] sm:$0xf]  ;;  %v6510_v40 = vld [vmem:[%s7445_s9 + $0x80] sm:$0xf0] }
 0x1be   : > { %1384 = vmatpush.bf16.msra.mxu2 %v5173_v25  ;;  %1400 = vmatpush.bf16.msra.mxu3 %v5141_v61  ;;  %v5246_v44 = vor.u32 %v6510_v40, %v5245_v39  ;;  %v6494_v39 = vld [vmem:[%s7445_s9 + $0x4] sm:$0xf]  ;;  %v5187_v40 = vld [vmem:[%s7445_s9 + $0xc] sm:$0xf0] }
 0x1bf   : > { %v913_v2 = vsel %vm912_vm10, %v6895_v53, %v909_v62  ;;  %v6482_v53 = vld [vmem:[%s7445_s9 + $0x64] sm:$0xf] }
 0x1c0   : > { %v918_v5 = vsel %vm915_vm11, %v917_v63, %v913_v2  ;;  %v5137_v60 = vor.u32 %v6482_v53, %v5134_v55  ;;  %v6480_v2 = vld [vmem:[%s7445_s9 + $0x50] sm:$0xf0] }
 0x1c1   : > { %v940_v8 = vmul.f32 %v918_v5, %v897_v1  ;;  %v5120_v1 = vld [vmem:[%s7445_s9 + $0x48] sm:$0xf] }
 0x1c2   : > { %1385 = vmatpush.bf16.msra.mxu2 %v5161_v34  ;;  %v5121_v7 = vor.u32 %v6480_v2, %v5120_v1  ;;  %v5097_v34 = vor.u32 %v6474_v23, %v5096_v14  ;;  %v4980_v2 = vld [vmem:[%s7437_s29 + $0x20] sm:$0xf]  ;;  %v5269_v14 = vld [vmem:[%s7445_s9 + $0xa8] sm:$0xf]  ;;  %v6516_v23 = vld [vmem:[%s7445_s9 + $0xb0] sm:$0xf0] }
 0x1c3   : > { %v941_v10 = vadd.f32 %v940_v8, %v700_v3  ;;  %v6479_v3 = vld [vmem:[%s7445_s9 + $0x4c] sm:$0xf]  ;;  %v5122_v8 = vld [vmem:[%s7445_s9 + $0x54] sm:$0xf0] }
 0x1c4   : > { %v5125_v11 = vor.u32 %v6479_v3, %v5122_v8  ;;  %1375 = vmatpush.bf16.msra.mxu1 %v5121_v7  ;;  %v955_v8 = vunpack.c.l.bf16 %v4980_v2 }
 0x1c5   : > { %6896 = vtanh.f32 %v941_v10  ;;  %v6481_v10 = vld [vmem:[%s7445_s9 + $0x58] sm:$0xf0] }
 0x1c6   : > { %1386 = vmatpush.bf16.msra.mxu2 %v5149_v47  ;;  %v5129_v12 = vor.u32 %v6481_v10, %v5128_v9  ;;  %v5085_v47 = vor.u32 %v6471_v38, %v5084_v37 }
 0x1c8   : > { %1401 = vmatpush.bf16.msra.mxu3 %v5129_v12 }
 0x1ca   : > { %1387 = vmatpush.bf16.msra.mxu2 %v5137_v60 }
 0x1cb   : > { %v6897_v15 = vpop.eup %6896 }
 0x1cc   : > { %v944_v16 = vmul.f32 %v6897_v15, %v943_v13  ;;  %v6477_v13 = vld [vmem:[%s7445_s9 + $0x38] sm:$0xf0]  ;;  %v6476_v15 = vld [vmem:[%s7445_s9 + $0x34] sm:$0xf]  ;;  %1402 = vmatpush.bf16.msra.mxu3 %v5117_v27 }
 0x1cd   : > { %v5109_v22 = vor.u32 %v6477_v13, %v5108_v46  ;;  %v5113_v26 = vor.u32 %v6476_v15, %v5110_v4  ;;  %v6517_v27 = vld [vmem:[%s7445_s9 + $0xb8] sm:$0xf0] }
 0x1ce   : > { %v7647_v18 = vadd.f32 %v945_v17, %v944_v16  ;;  %1388 = vmatpush.bf16.msra.mxu2 %v5125_v11 }
 0x1cf   : > { %1376 = vmatpush.bf16.msra.mxu1 %v5109_v22 }
 0x1d0   : > { %v947_v19 = vpack.c.bf16 %v7647_v18, %v7647_v18  ;;  %1403 = vmatpush.bf16.msra.mxu3 %v5105_v36  ;;  %v6514_v36 = vld [vmem:[%s7445_s9 + $0xa0] sm:$0xf0] }
 0x1d2   : > { %4978 = vst [vmem:[%s7461_s27 + $0x4] sm:$0xf] %v947_v19  ;;  %1124 = vmatmul.bf16.vlgmr.msrb.gmra.mxu2 %v947_v19  ;;  %1137 = vmatmul.bf16.vlgmr.msrb.gmra.mxu3 %v947_v19 }
 0x1d3   : > { %1150 = vmatmul.bf16.vlgmr.msra.gmra.mxu0 %v947_v19  ;;  %1389 = vmatpush.bf16.msra.mxu2 %v5113_v26  ;;  %v5277_v26 = vld [vmem:[%s7445_s9 + $0xb0] sm:$0xf] }
 0x1d4   : > { %1377 = vmatpush.bf16.msra.mxu1 %v5097_v34  ;;  %1404 = vmatpush.bf16.msra.mxu3 %v5093_v51  ;;  %v5278_v29 = vor.u32 %v6517_v27, %v5277_v26  ;;  %v5259_v34 = vld [vmem:[%s7445_s9 + $0x9c] sm:$0xf0]  ;;  %v6498_v26 = vld [vmem:[%s7445_s9 + $0x20] sm:$0xf0] }
 0x1d7   : > { %1390 = vmatpush.bf16.msra.mxu2 %v5101_v35  ;;  %v5265_v35 = vld [vmem:[%s7445_s9 + $0x98] sm:$0xf] }
 0x1d8   : > { %1378 = vmatpush.bf16.msra.mxu1 %v5085_v47  ;;  %v5266_v38 = vor.u32 %v6514_v36, %v5265_v35  ;;  %v5247_v47 = vld [vmem:[%s7445_s9 + $0x84] sm:$0xf0]  ;;  %v6499_v35 = vld [vmem:[%s7445_s9 + $0x28] sm:$0xf0]  ;;  %v5185_v36 = vld [vmem:[%s7445_s9] sm:$0xf] }
 0x1d9   : > { %v5250_v51 = vor.u32 %v6509_v43, %v5247_v47  ;;  %v6496_v47 = vld [vmem:[%s7445_s9 + $0x10] sm:$0xf0] }
 0x1db   : > { %1391 = vmatpush.bf16.msra.mxu2 %v5089_v49  ;;  %v6511_v49 = vld [vmem:[%s7445_s9 + $0x88] sm:$0xf0] }
 0x1df   : > { %1652 = vmatpush.bf16.msrb.mxu2 %v5278_v29 }
 0x1e3   : > { %1653 = vmatpush.bf16.msrb.mxu2 %v5266_v38 }
 0x250   : > { %v7670_v45 = vpop.f32.mrf.mxu0 }
 0x255   : > { %v1125_v62 = vpop.f32.mrf.mxu2  ;;  %v1138_v63 = vpop.f32.mrf.mxu3 }
 0x256   : > { %v1126_v5 = vadd.f32 %v1125_v62, %v7538_v41  ;;  %v1139_v6 = vadd.f32 %v1138_v63, %v7541_v42 }
 0x258   : > { %v1155_v16 = vadd.f32 %v1126_v5, %v953_v58  ;;  %v1175_v17 = vadd.f32 %v1139_v6, %v954_v59  ;;  %v1153_v19 = vpop.f32.mrf.mxu0  ;;  %v1152_v6 = vadd.f32 %v7670_v45, %v7576_v50 }
 0x25a   : > { %v5077_v24 = vmul.f32 -1.442695, %v1155_v16  ;;  %v5078_v25 = vmul.f32 -1.442695, %v1175_v17 }
 0x25c   : > { %6898 = vpow2.f32 %v5077_v24  ;;  %v6515_v24 = vld [vmem:[%s7445_s9 + $0xac] sm:$0xf] }
 0x25d   : > { %6900 = vpow2.f32 %v5078_v25  ;;  %v1127_v32 = vpop.f32.mrf.mxu2  ;;  %v1140_v33 = vpop.f32.mrf.mxu3  ;;  %v5270_v25 = vor.u32 %v6516_v23, %v5269_v14 }
 0x25e   : > { %v6512_v32 = vld [vmem:[%s7445_s9 + $0x94] sm:$0xf]  ;;  %v5258_v33 = vor.u32 %v6513_v31, %v5257_v30  ;;  %v6497_v30 = vld [vmem:[%s7445_s9 + $0x1c] sm:$0xf]  ;;  %v5199_v31 = vld [vmem:[%s7445_s9 + $0x24] sm:$0xf0] }
 0x25f   : > { %1626 = vmatpush.bf16.msrb.mxu0 %v5270_v25  ;;  %v5262_v37 = vor.u32 %v6512_v32, %v5259_v34  ;;  %v6502_v25 = vld [vmem:[%s7445_s9 + $0x40] sm:$0xf0]  ;;  %v5205_v32 = vld [vmem:[%s7445_s9 + $0x20] sm:$0xf]  ;;  %v5202_v34 = vor.u32 %v6497_v30, %v5199_v31  ;;  %v6541_v30 = vld [vmem:[%s7445_s9 + $0xb8] sm:$0xf0] }
 0x260   : > { %v5206_v38 = vor.u32 %v6499_v35, %v5205_v32  ;;  %v6536_v35 = vld [vmem:[%s7445_s9 + $0x94] sm:$0xf] }
 0x262   : > { %v6899_v48 = vpop.eup %6898 }
 0x263   : > { %v6901_v52 = vpop.eup %6900  ;;  %v1159_v53 = vadd.f32 1.0, %v6899_v48  ;;  %1627 = vmatpush.bf16.msrb.mxu0 %v5258_v33  ;;  %v5253_v48 = vld [vmem:[%s7445_s9 + $0x80] sm:$0xf] }
 0x264   : > { %v1179_v54 = vadd.f32 1.0, %v6901_v52  ;;  %v5254_v52 = vor.u32 %v6511_v49, %v5253_v48 }
 0x265   : > { %6902 = vrcp.f32 %v1159_v53  ;;  %v1171_v60 = vand.u32 2147483648, %v1159_v53  ;;  %v1169_v63 = vand.u32 2147483647, %v1159_v53  ;;  %vm1165_vm1 = vweird.f32 %v1159_v53 }
 0x266   : > { %6904 = vrcp.f32 %v1179_v54  ;;  %v1191_v11 = vand.u32 2147483648, %v1179_v54  ;;  %vm1185_vm5 = vweird.f32 %v1179_v54  ;;  %v1189_v46 = vand.u32 2147483647, %v1179_v54  ;;  %1654 = vmatpush.bf16.msrb.mxu2 %v5254_v52 }
 0x267   : > { %v1172_v5 = vor.u32 1.1754944e-38, %v1171_v60  ;;  %vm1170_vm3 = vcmp.eq.f32.partialorder %v1169_v63, 8.507059e+37  ;;  %1628 = vmatpush.bf16.msrb.mxu0 %v5246_v44  ;;  %v6508_v60 = vld [vmem:[%s7445_s9 + $0x70] sm:$0xf0]  ;;  %v5193_v44 = vld [vmem:[%s7445_s9 + $0x8] sm:$0xf] }
 0x268   : > { %v1192_v16 = vor.u32 1.1754944e-38, %v1191_v11  ;;  %vm1190_vm7 = vcmp.eq.f32.partialorder %v1189_v46, 8.507059e+37 }
 0x26b   : > { %v6903_v55 = vpop.eup %6902 }
 0x26c   : > { %v6905_v56 = vpop.eup %6904  ;;  %v1161_v57 = vmul.f32 %v6903_v55, %v1159_v53  ;;  %vm1166_vm0 = vweird.f32 %v6903_v55  ;;  %v5080_v53 = vld [vmem:[%s7437_s29 + $0x24] sm:$0xff] }
 0x26d   : > { %v1181_v58 = vmul.f32 %v6905_v56, %v1179_v54  ;;  %vm1167_vm2 = vmor %vm1165_vm1, %vm1166_vm0  ;;  %vm1186_vm4 = vweird.f32 %v6905_v56  ;;  %v5233_v54 = vld [vmem:[%s7445_s9 + $0x60] sm:$0xf] }
 0x26e   : > { %v1162_v59 = vsub.f32 1.0, %v1161_v57  ;;  %vm1187_vm6 = vmor %vm1185_vm5, %vm1186_vm4 }
 0x26f   : > { %v1182_v61 = vsub.f32 1.0, %v1181_v58  ;;  %v5235_v58 = vld [vmem:[%s7445_s9 + $0x6c] sm:$0xf0] }
 0x270   : > { %v1163_v62 = vmul.f32 %v6903_v55, %v1162_v59  ;;  %v5241_v59 = vld [vmem:[%s7445_s9 + $0x68] sm:$0xf] }
 0x271   : > { %v1183_v1 = vmul.f32 %v6905_v56, %v1182_v61  ;;  %v1208_v61 = vunpack.c.l.bf16 %v5080_v53  ;;  %v5242_v63 = vor.u32 %v6508_v60, %v5241_v59 }
 0x272   : > { %v1164_v3 = vadd.f32 %v6903_v55, %v1163_v62 }
 0x273   : > { %v1184_v10 = vadd.f32 %v6905_v56, %v1183_v1  ;;  %1655 = vmatpush.bf16.msrb.mxu2 %v5242_v63 }
 0x274   : > { %v1168_v7 = vsel %vm1167_vm2, %v6903_v55, %v1164_v3  ;;  %v6507_v55 = vld [vmem:[%s7445_s9 + $0x68] sm:$0xf0]  ;;  %v5221_v3 = vld [vmem:[%s7445_s9 + $0x48] sm:$0xf] }
 0x275   : > { %v1173_v9 = vsel %vm1170_vm3, %v1172_v5, %v1168_v7  ;;  %v1188_v15 = vsel %vm1187_vm6, %v6905_v56, %v1184_v10  ;;  %v6506_v56 = vld [vmem:[%s7445_s9 + $0x64] sm:$0xf]  ;;  %v5234_v57 = vor.u32 %v6507_v55, %v5233_v54  ;;  %v6504_v5 = vld [vmem:[%s7445_s9 + $0x50] sm:$0xf0]  ;;  %v6503_v7 = vld [vmem:[%s7445_s9 + $0x4c] sm:$0xf]  ;;  %v5194_v54 = vor.u32 %v6496_v47, %v5193_v44 }
 0x276   : > { %v1195_v12 = vmul.f32 %v1173_v9, %v1152_v6  ;;  %v1193_v45 = vsel %vm1190_vm7, %v1192_v16, %v1188_v15  ;;  %v5238_v62 = vor.u32 %v6506_v56, %v5235_v58  ;;  %v5222_v6 = vor.u32 %v6504_v5, %v5221_v3  ;;  %v5229_v9 = vld [vmem:[%s7445_s9 + $0x50] sm:$0xf]  ;;  %v5346_v44 = vld [vmem:[%s7445_s9 + $0x78] sm:$0xf]  ;;  %v6534_v47 = vld [vmem:[%s7445_s9 + $0x80] sm:$0xf0] }
 0x277   : > { %v1198_v17 = vsub.f32 1.0, %v1193_v45  ;;  %v1200_v20 = vmul.f32 %v1193_v45, %v7647_v18  ;;  %v5271_v18 = vld [vmem:[%s7445_s9 + $0xb4] sm:$0xf0]  ;;  %1629 = vmatpush.bf16.msrb.mxu0 %v5234_v57  ;;  %v1209_v15 = vunpack.c.h.bf16 %v5080_v53  ;;  %v5209_v16 = vld [vmem:[%s7445_s9 + $0x30] sm:$0xf] }
 0x278   : > { %v1196_v13 = vadd.f32 %v1195_v12, %v955_v8  ;;  %v5274_v28 = vor.u32 %v6515_v24, %v5271_v18  ;;  %v5223_v8 = vld [vmem:[%s7445_s9 + $0x54] sm:$0xf0]  ;;  %v6505_v12 = vld [vmem:[%s7445_s9 + $0x58] sm:$0xf0] }
 0x279   : > { %v5226_v11 = vor.u32 %v6503_v7, %v5223_v8  ;;  %v5230_v46 = vor.u32 %v6505_v12, %v5229_v9  ;;  %v6501_v45 = vld [vmem:[%s7445_s9 + $0x38] sm:$0xf0]  ;;  %v5197_v18 = vld [vmem:[%s7445_s9 + $0x18] sm:$0xf] }
 0x27a   : > { %6906 = vtanh.f32 %v1196_v13  ;;  %1639 = vmatpush.bf16.msrb.mxu1 %v5274_v28  ;;  %v5198_v29 = vor.u32 %v6498_v26, %v5197_v18  ;;  %v5370_v18 = vld [vmem:[%s7445_s9 + $0xa8] sm:$0xf]  ;;  %v6540_v26 = vld [vmem:[%s7445_s9 + $0xb0] sm:$0xf0] }
 0x27b   : > { %1630 = vmatpush.bf16.msrb.mxu0 %v5222_v6  ;;  %1656 = vmatpush.bf16.msrb.mxu2 %v5230_v46 }
 0x27e   : > { %1640 = vmatpush.bf16.msrb.mxu1 %v5262_v37  ;;  %v6495_v37 = vld [vmem:[%s7445_s9 + $0x8] sm:$0xf0] }
 0x27f   : > { %v5186_v48 = vor.u32 %v6495_v37, %v5185_v36  ;;  %v5360_v37 = vld [vmem:[%s7445_s9 + $0x9c] sm:$0xf0] }
 0x280   : > { %v6907_v19 = vpop.eup %6906 }
 0x281   : > { %v1199_v4 = vmul.f32 %v6907_v19, %v1198_v17  ;;  %v5210_v19 = vor.u32 %v6501_v45, %v5209_v16 }
 0x282   : > { %1641 = vmatpush.bf16.msrb.mxu1 %v5250_v51  ;;  %v5190_v51 = vor.u32 %v6494_v39, %v5187_v40  ;;  %v6538_v39 = vld [vmem:[%s7445_s9 + $0xa0] sm:$0xf0]  ;;  %v5363_v40 = vor.u32 %v6536_v35, %v5360_v37  ;;  %v6521_v35 = vld [vmem:[%s7445_s9 + $0x1c] sm:$0xf] }
 0x283   : > { %v7709_v21 = vadd.f32 %v1200_v20, %v1199_v4  ;;  %v6500_v4 = vld [vmem:[%s7445_s9 + $0x34] sm:$0xf]  ;;  %v5211_v20 = vld [vmem:[%s7445_s9 + $0x3c] sm:$0xf0]  ;;  %1631 = vmatpush.bf16.msrb.mxu0 %v5210_v19 }
 0x284   : > { %v5214_v24 = vor.u32 %v6500_v4, %v5211_v20 }
 0x285   : > { %v1202_v22 = vpack.c.bf16 %v7709_v21, %v7709_v21 }
 0x286   : > { %1642 = vmatpush.bf16.msrb.mxu1 %v5238_v62  ;;  %v5081_v62 = vld [vmem:[%s7437_s29 + $0x2c] sm:$0xf] }
 0x287   : > { %5079 = vst [vmem:[%s7461_s27 + $0x8] sm:$0xf] %v1202_v22  ;;  %1379 = vmatmul.bf16.vlgmr.msra.gmra.mxu1 %v1202_v22  ;;  %1392 = vmatmul.bf16.vlgmr.msra.gmra.mxu2 %v1202_v22  ;;  %v1210_v6 = vunpack.c.l.bf16 %v5081_v62  ;;  %v5342_v62 = vld [vmem:[%s7445_s9 + $0x68] sm:$0xf] }
 0x288   : > { %1405 = vmatmul.bf16.vlgmr.msra.gmra.mxu3 %v1202_v22  ;;  %v5217_v22 = vld [vmem:[%s7445_s9 + $0x38] sm:$0xf]  ;;  %1632 = vmatpush.bf16.msrb.mxu0 %v5198_v29  ;;  %v5378_v29 = vld [vmem:[%s7445_s9 + $0xb0] sm:$0xf] }
 0x289   : > { %v5218_v28 = vor.u32 %v6502_v25, %v5217_v22  ;;  %v5379_v32 = vor.u32 %v6541_v30, %v5378_v29  ;;  %v6526_v29 = vld [vmem:[%s7445_s9 + $0x40] sm:$0xf0]  ;;  %v5298_v30 = vld [vmem:[%s7445_s9 + $0x18] sm:$0xf] }
 0x28a   : > { %1643 = vmatpush.bf16.msrb.mxu1 %v5226_v11 }
 0x28b   : > { %1657 = vmatpush.bf16.msrb.mxu2 %v5218_v28  ;;  %v5371_v28 = vor.u32 %v6540_v26, %v5370_v18  ;;  %v5312_v18 = vld [vmem:[%s7445_s9 + $0x3c] sm:$0xf0] }
 0x28c   : > { %1633 = vmatpush.bf16.msrb.mxu0 %v5186_v48  ;;  %v6533_v48 = vld [vmem:[%s7445_s9 + $0x7c] sm:$0xf] }
 0x28d   : > { %1881 = vmatpush.bf16.msrb.mxu3 %v5371_v28 }
 0x28e   : > { %1644 = vmatpush.bf16.msrb.mxu1 %v5214_v24 }
 0x28f   : > { %1658 = vmatpush.bf16.msrb.mxu2 %v5206_v38  ;;  %v5366_v38 = vld [vmem:[%s7445_s9 + $0x98] sm:$0xf] }
 0x292   : > { %1645 = vmatpush.bf16.msrb.mxu1 %v5202_v34  ;;  %v6537_v34 = vld [vmem:[%s7445_s9 + $0x98] sm:$0xf0] }
 0x293   : > { %1659 = vmatpush.bf16.msrb.mxu2 %v5194_v54 }
 0x296   : > { %1646 = vmatpush.bf16.msrb.mxu1 %v5190_v51  ;;  %v5348_v51 = vld [vmem:[%s7445_s9 + $0x84] sm:$0xf0] }
 0x297   : > { %v5351_v54 = vor.u32 %v6533_v48, %v5348_v51  ;;  %v6518_v48 = vld [vmem:[%s7445_s9 + $0x4] sm:$0xf]  ;;  %v5294_v51 = vld [vmem:[%s7445_s9 + $0x8] sm:$0xf] }
 0x29a   : > { %1907 = vmatpush.bf16.msra.mxu1 %v5379_v32 }
 0x304   : > { %v1380_v1 = vpop.f32.mrf.mxu1 }
 0x305   : > { %v1381_v2 = vadd.f32 %v1380_v1, %v7538_v41 }
 0x307   : > { %v1410_v10 = vadd.f32 %v1381_v2, %v1208_v61 }
 0x309   : > { %v5178_v13 = vmul.f32 -1.442695, %v1410_v10 }
 0x30a   : > { %v1393_v17 = vpop.f32.mrf.mxu2 }
 0x30b   : > { %6908 = vpow2.f32 %v5178_v13  ;;  %v1394_v14 = vadd.f32 %v1393_v17, %v7541_v42  ;;  %v1406_v23 = vpop.f32.mrf.mxu3 }
 0x30c   : > { %v1382_v27 = vpop.f32.mrf.mxu1  ;;  %v1407_v9 = vadd.f32 %v1406_v23, %v7576_v50 }
 0x30d   : > { %v1430_v33 = vadd.f32 %v1394_v14, %v1209_v15  ;;  %v6539_v27 = vld [vmem:[%s7445_s9 + $0xac] sm:$0xf] }
 0x30f   : > { %v5179_v43 = vmul.f32 -1.442695, %v1430_v33  ;;  %v5358_v33 = vld [vmem:[%s7445_s9 + $0x90] sm:$0xf] }
 0x310   : > { %v5359_v36 = vor.u32 %v6537_v34, %v5358_v33  ;;  %v6522_v34 = vld [vmem:[%s7445_s9 + $0x20] sm:$0xf0] }
 0x311   : > { %v6909_v49 = vpop.eup %6908  ;;  %6910 = vpow2.f32 %v5179_v43  ;;  %v5367_v43 = vor.u32 %v6538_v39, %v5366_v38  ;;  %v5299_v37 = vor.u32 %v6522_v34, %v5298_v30  ;;  %v5306_v39 = vld [vmem:[%s7445_s9 + $0x20] sm:$0xf]  ;;  %v6563_v30 = vld [vmem:[%s7445_s9 + $0xac] sm:$0xf] }
 0x312   : > { %v1414_v52 = vadd.f32 1.0, %v6909_v49  ;;  %v1395_v53 = vpop.f32.mrf.mxu2  ;;  %1882 = vmatpush.bf16.msrb.mxu3 %v5359_v36  ;;  %v5347_v49 = vor.u32 %v6534_v47, %v5346_v44  ;;  %v5300_v36 = vld [vmem:[%s7445_s9 + $0x24] sm:$0xf0]  ;;  %v6519_v47 = vld [vmem:[%s7445_s9 + $0x8] sm:$0xf0] }
 0x313   : > { %v1408_v55 = vpop.f32.mrf.mxu3  ;;  %1908 = vmatpush.bf16.msra.mxu1 %v5367_v43  ;;  %v6535_v53 = vld [vmem:[%s7445_s9 + $0x88] sm:$0xf0]  ;;  %v5303_v38 = vor.u32 %v6521_v35, %v5300_v36  ;;  %v5286_v43 = vld [vmem:[%s7445_s9] sm:$0xf] }
 0x314   : > { %6912 = vrcp.f32 %v1414_v52  ;;  %v1426_v61 = vand.u32 2147483648, %v1414_v52  ;;  %v1424_v1 = vand.u32 2147483647, %v1414_v52  ;;  %vm1420_vm9 = vweird.f32 %v1414_v52  ;;  %v7839_v36 = vld [vmem:[%s7437_s29 + $0x3c] sm:$0xff] }
 0x316   : > { %v1427_v7 = vor.u32 1.1754944e-38, %v1426_v61  ;;  %vm1425_vm11 = vcmp.eq.f32.partialorder %v1424_v1, 8.507059e+37  ;;  %1883 = vmatpush.bf16.msrb.mxu3 %v5347_v49  ;;  %v5336_v61 = vld [vmem:[%s7445_s9 + $0x6c] sm:$0xf0] }
 0x317   : > { %v6911_v56 = vpop.eup %6910  ;;  %v5288_v49 = vld [vmem:[%s7445_s9 + $0xc] sm:$0xf0] }
 0x318   : > { %v1434_v57 = vadd.f32 1.0, %v6911_v56  ;;  %v5181_v56 = vld [vmem:[%s7437_s29 + $0x30] sm:$0xff] }
 0x319   : > { %v1463_v1 = vunpack.c.l.bf16 %v5181_v56 }
 0x31a   : > { %v6913_v58 = vpop.eup %6912  ;;  %6914 = vrcp.f32 %v1434_v57  ;;  %v1446_v13 = vand.u32 2147483648, %v1434_v57  ;;  %v1444_v15 = vand.u32 2147483647, %v1434_v57  ;;  %vm1440_vm13 = vweird.f32 %v1434_v57 }
 0x31b   : > { %v1416_v59 = vmul.f32 %v6913_v58, %v1414_v52  ;;  %vm1421_vm8 = vweird.f32 %v6913_v58  ;;  %v5354_v52 = vld [vmem:[%s7445_s9 + $0x80] sm:$0xf] }
 0x31c   : > { %vm1422_vm10 = vmor %vm1420_vm9, %vm1421_vm8  ;;  %v1447_v19 = vor.u32 1.1754944e-38, %v1446_v13  ;;  %vm1445_vm15 = vcmp.eq.f32.partialorder %v1444_v15, 8.507059e+37  ;;  %v5355_v55 = vor.u32 %v6535_v53, %v5354_v52  ;;  %v5324_v13 = vld [vmem:[%s7445_s9 + $0x54] sm:$0xf0]  ;;  %v5330_v15 = vld [vmem:[%s7445_s9 + $0x50] sm:$0xf] }
 0x31d   : > { %v1417_v60 = vsub.f32 1.0, %v1416_v59  ;;  %v6530_v59 = vld [vmem:[%s7445_s9 + $0x64] sm:$0xf]  ;;  %v6520_v52 = vld [vmem:[%s7445_s9 + $0x10] sm:$0xf0] }
 0x31e   : > { %1909 = vmatpush.bf16.msra.mxu1 %v5355_v55  ;;  %v5291_v55 = vor.u32 %v6518_v48, %v5288_v49 }
 0x31f   : > { %v1418_v63 = vmul.f32 %v6913_v58, %v1417_v60 }
 0x320   : > { %v6915_v2 = vpop.eup %6914 }
 0x321   : > { %v1436_v3 = vmul.f32 %v6915_v2, %v1434_v57  ;;  %v1419_v5 = vadd.f32 %v6913_v58, %v1418_v63  ;;  %vm1441_vm12 = vweird.f32 %v6915_v2  ;;  %v5334_v57 = vld [vmem:[%s7445_s9 + $0x60] sm:$0xf]  ;;  %v6532_v63 = vld [vmem:[%s7445_s9 + $0x70] sm:$0xf0] }
 0x322   : > { %vm1442_vm14 = vmor %vm1440_vm13, %vm1441_vm12 }
 0x323   : > { %v1437_v8 = vsub.f32 1.0, %v1436_v3  ;;  %v1423_v10 = vsel %vm1422_vm10, %v6913_v58, %v1419_v5  ;;  %v6531_v58 = vld [vmem:[%s7445_s9 + $0x68] sm:$0xf0]  ;;  %v5339_v3 = vor.u32 %v6530_v59, %v5336_v61  ;;  %v5343_v5 = vor.u32 %v6532_v63, %v5342_v62 }
 0x324   : > { %v1428_v11 = vsel %vm1425_vm11, %v1427_v7, %v1423_v10  ;;  %v5335_v60 = vor.u32 %v6531_v58, %v5334_v57  ;;  %v5322_v10 = vld [vmem:[%s7445_s9 + $0x48] sm:$0xf]  ;;  %v5295_v58 = vor.u32 %v6520_v52, %v5294_v51  ;;  %v1719_v51 = vunpack.c.h.bf16 %v7839_v36  ;;  %v5447_v52 = vld [vmem:[%s7445_s9 + $0x78] sm:$0xf] }
 0x325   : > { %v1438_v12 = vmul.f32 %v6915_v2, %v1437_v8  ;;  %v1450_v46 = vmul.f32 %v1428_v11, %v1407_v9  ;;  %1910 = vmatpush.bf16.msra.mxu1 %v5343_v5  ;;  %v6528_v11 = vld [vmem:[%s7445_s9 + $0x50] sm:$0xf0] }
 0x326   : > { %1884 = vmatpush.bf16.msrb.mxu3 %v5335_v60 }
 0x327   : > { %v1451_v16 = vadd.f32 %v1450_v46, %v1210_v6  ;;  %v1439_v45 = vadd.f32 %v6915_v2, %v1438_v12  ;;  %v6527_v12 = vld [vmem:[%s7445_s9 + $0x4c] sm:$0xf]  ;;  %v5323_v46 = vor.u32 %v6528_v11, %v5322_v10 }
 0x329   : > { %6916 = vtanh.f32 %v1451_v16  ;;  %v1443_v17 = vsel %vm1442_vm14, %v6915_v2, %v1439_v45  ;;  %v1464_v2 = vunpack.c.h.bf16 %v5181_v56  ;;  %v6529_v16 = vld [vmem:[%s7445_s9 + $0x58] sm:$0xf0] }
 0x32a   : > { %v1448_v4 = vsel %vm1445_vm15, %v1447_v19, %v1443_v17  ;;  %v5327_v19 = vor.u32 %v6527_v12, %v5324_v13  ;;  %1885 = vmatpush.bf16.msrb.mxu3 %v5323_v46 }
 0x32b   : > { %v1453_v20 = vsub.f32 1.0, %v1448_v4  ;;  %v1455_v23 = vmul.f32 %v1448_v4, %v7709_v21  ;;  %v5372_v21 = vld [vmem:[%s7445_s9 + $0xb4] sm:$0xf0]  ;;  %v5331_v4 = vor.u32 %v6529_v16, %v5330_v15 }
 0x32c   : > { %v5375_v31 = vor.u32 %v6539_v27, %v5372_v21  ;;  %v5318_v21 = vld [vmem:[%s7445_s9 + $0x38] sm:$0xf] }
 0x32d   : > { %1911 = vmatpush.bf16.msra.mxu1 %v5331_v4  ;;  %v5319_v33 = vor.u32 %v6526_v29, %v5318_v21  ;;  %v5471_v21 = vld [vmem:[%s7445_s9 + $0xa8] sm:$0xf]  ;;  %v6564_v29 = vld [vmem:[%s7445_s9 + $0xb0] sm:$0xf0] }
 0x32e   : > { %1894 = vmatpush.bf16.msra.mxu0 %v5375_v31 }
 0x32f   : > { %v6917_v22 = vpop.eup %6916 }
 0x330   : > { %v1454_v14 = vmul.f32 %v6917_v22, %v1453_v20 }
 0x331   : > { %1912 = vmatpush.bf16.msra.mxu1 %v5319_v33  ;;  %v6565_v33 = vld [vmem:[%s7445_s9 + $0xb8] sm:$0xf0] }
 0x332   : > { %v7768_v24 = vadd.f32 %v1455_v23, %v1454_v14  ;;  %1895 = vmatpush.bf16.msra.mxu0 %v5363_v40  ;;  %v5310_v14 = vld [vmem:[%s7445_s9 + $0x30] sm:$0xf]  ;;  %v6525_v23 = vld [vmem:[%s7445_s9 + $0x38] sm:$0xf0]  ;;  %v6523_v40 = vld [vmem:[%s7445_s9 + $0x28] sm:$0xf0] }
 0x333   : > { %v5311_v27 = vor.u32 %v6525_v23, %v5310_v14  ;;  %v5307_v44 = vor.u32 %v6523_v40, %v5306_v39  ;;  %v6560_v39 = vld [vmem:[%s7445_s9 + $0x94] sm:$0xf] }
 0x334   : > { %v1457_v25 = vpack.c.bf16 %v7768_v24, %v7768_v24 }
 0x335   : > { %1886 = vmatpush.bf16.msrb.mxu3 %v5311_v27  ;;  %1913 = vmatpush.bf16.msra.mxu1 %v5307_v44  ;;  %v5467_v44 = vld [vmem:[%s7445_s9 + $0x98] sm:$0xf] }
 0x336   : > { %5180 = vst [vmem:[%s7461_s27 + $0xc] sm:$0xf] %v1457_v25  ;;  %1634 = vmatmul.bf16.vlgmr.msrb.gmra.mxu0 %v1457_v25  ;;  %1647 = vmatmul.bf16.vlgmr.msrb.gmra.mxu1 %v1457_v25 }
 0x337   : > { %1660 = vmatmul.bf16.vlgmr.msrb.gmra.mxu2 %v1457_v25  ;;  %1896 = vmatpush.bf16.msra.mxu0 %v5351_v54  ;;  %v6524_v25 = vld [vmem:[%s7445_s9 + $0x34] sm:$0xf]  ;;  %v5287_v54 = vor.u32 %v6519_v47, %v5286_v43  ;;  %v5461_v43 = vld [vmem:[%s7445_s9 + $0x9c] sm:$0xf0]  ;;  %v6562_v47 = vld [vmem:[%s7445_s9 + $0xa0] sm:$0xf0] }
 0x338   : > { %v5315_v28 = vor.u32 %v6524_v25, %v5312_v18  ;;  %v5464_v48 = vor.u32 %v6560_v39, %v5461_v43  ;;  %v5468_v49 = vor.u32 %v6562_v47, %v5467_v44  ;;  %v5401_v39 = vld [vmem:[%s7445_s9 + $0x24] sm:$0xf0]  ;;  %v6547_v43 = vld [vmem:[%s7445_s9 + $0x28] sm:$0xf0] }
 0x339   : > { %1887 = vmatpush.bf16.msrb.mxu3 %v5299_v37  ;;  %1914 = vmatpush.bf16.msra.mxu1 %v5295_v58  ;;  %v5459_v37 = vld [vmem:[%s7445_s9 + $0x90] sm:$0xf]  ;;  %v5455_v58 = vld [vmem:[%s7445_s9 + $0x80] sm:$0xf] }
 0x33b   : > { %1897 = vmatpush.bf16.msra.mxu0 %v5339_v3 }
 0x33d   : > { %1888 = vmatpush.bf16.msrb.mxu3 %v5287_v54  ;;  %v6557_v54 = vld [vmem:[%s7445_s9 + $0x7c] sm:$0xf] }
 0x33f   : > { %1898 = vmatpush.bf16.msra.mxu0 %v5327_v19 }
 0x343   : > { %1899 = vmatpush.bf16.msra.mxu0 %v5315_v28 }
 0x347   : > { %1900 = vmatpush.bf16.msra.mxu0 %v5303_v38  ;;  %v6561_v38 = vld [vmem:[%s7445_s9 + $0x98] sm:$0xf0] }
 0x348   : > { %v5460_v40 = vor.u32 %v6561_v38, %v5459_v37  ;;  %v6546_v37 = vld [vmem:[%s7445_s9 + $0x20] sm:$0xf0]  ;;  %v6545_v38 = vld [vmem:[%s7445_s9 + $0x1c] sm:$0xf] }
 0x34b   : > { %1901 = vmatpush.bf16.msra.mxu0 %v5291_v55 }
 0x3b3   : > { %v1635_v6 = vpop.f32.mrf.mxu0  ;;  %v1648_v7 = vpop.f32.mrf.mxu1 }
 0x3b4   : > { %v1636_v8 = vadd.f32 %v1635_v6, %v7538_v41  ;;  %v1649_v9 = vadd.f32 %v1648_v7, %v7541_v42 }
 0x3b6   : > { %v1665_v45 = vadd.f32 %v1636_v8, %v1463_v1  ;;  %v1685_v17 = vadd.f32 %v1649_v9, %v1464_v2  ;;  %v5182_v9 = vld [vmem:[%s7437_s29 + $0x38] sm:$0xf] }
 0x3b7   : > { %v1465_v12 = vunpack.c.l.bf16 %v5182_v9  ;;  %v6556_v9 = vld [vmem:[%s7445_s9 + $0x70] sm:$0xf0] }
 0x3b8   : > { %v5279_v20 = vmul.f32 -1.442695, %v1665_v45  ;;  %v5280_v22 = vmul.f32 -1.442695, %v1685_v17 }
 0x3ba   : > { %6918 = vpow2.f32 %v5279_v20  ;;  %v1661_v26 = vpop.f32.mrf.mxu2 }
 0x3bb   : > { %6920 = vpow2.f32 %v5280_v22  ;;  %v1637_v31 = vpop.f32.mrf.mxu0  ;;  %v1650_v32 = vpop.f32.mrf.mxu1  ;;  %v1662_v46 = vadd.f32 %v1661_v26, %v7576_v50 }
 0x3bc   : > { %v5472_v31 = vor.u32 %v6564_v29, %v5471_v21  ;;  %v5479_v32 = vld [vmem:[%s7445_s9 + $0xb0] sm:$0xf] }
 0x3bd   : > { %v5480_v35 = vor.u32 %v6565_v33, %v5479_v32  ;;  %v5399_v33 = vld [vmem:[%s7445_s9 + $0x18] sm:$0xf] }
 0x3be   : > { %2136 = vmatpush.bf16.msra.mxu2 %v5472_v31  ;;  %v5419_v31 = vld [vmem:[%s7445_s9 + $0x38] sm:$0xf] }
 0x3bf   : > { %2162 = vmatpush.bf16.msrb.mxu0 %v5480_v35 }
 0x3c0   : > { %v6919_v53 = vpop.eup %6918 }
 0x3c1   : > { %v6921_v56 = vpop.eup %6920  ;;  %v1669_v57 = vadd.f32 1.0, %v6919_v53  ;;  %v6558_v53 = vld [vmem:[%s7445_s9 + $0x80] sm:$0xf0] }
 0x3c2   : > { %v1689_v59 = vadd.f32 1.0, %v6921_v56  ;;  %v1663_v60 = vpop.f32.mrf.mxu2  ;;  %2137 = vmatpush.bf16.msra.mxu2 %v5460_v40  ;;  %v5448_v56 = vor.u32 %v6558_v53, %v5447_v52  ;;  %v5407_v40 = vld [vmem:[%s7445_s9 + $0x20] sm:$0xf] }
 0x3c3   : > { %6922 = vrcp.f32 %v1669_v57  ;;  %v1681_v5 = vand.u32 2147483648, %v1669_v57  ;;  %v1679_v7 = vand.u32 2147483647, %v1669_v57  ;;  %vm1675_vm1 = vweird.f32 %v1669_v57  ;;  %2163 = vmatpush.bf16.msrb.mxu0 %v5468_v49  ;;  %v5387_v53 = vld [vmem:[%s7445_s9] sm:$0xf] }
 0x3c4   : > { %6924 = vrcp.f32 %v1689_v59  ;;  %v1701_v17 = vand.u32 2147483648, %v1689_v59  ;;  %vm1695_vm5 = vweird.f32 %v1689_v59  ;;  %v1699_v19 = vand.u32 2147483647, %v1689_v59 }
 0x3c5   : > { %v1682_v11 = vor.u32 1.1754944e-38, %v1681_v5  ;;  %vm1680_vm3 = vcmp.eq.f32.partialorder %v1679_v7, 8.507059e+37  ;;  %v6554_v5 = vld [vmem:[%s7445_s9 + $0x64] sm:$0xf]  ;;  %v5437_v7 = vld [vmem:[%s7445_s9 + $0x6c] sm:$0xf0]  ;;  %v5400_v49 = vor.u32 %v6546_v37, %v5399_v33  ;;  %v5408_v52 = vor.u32 %v6547_v43, %v5407_v40 }
 0x3c6   : > { %v1702_v22 = vor.u32 1.1754944e-38, %v1701_v17  ;;  %vm1700_vm7 = vcmp.eq.f32.partialorder %v1699_v19, 8.507059e+37  ;;  %2138 = vmatpush.bf16.msra.mxu2 %v5448_v56  ;;  %v5389_v56 = vld [vmem:[%s7445_s9 + $0xc] sm:$0xf0]  ;;  %v6587_v33 = vld [vmem:[%s7445_s9 + $0xac] sm:$0xf] }
 0x3c7   : > { %v6585_v40 = vld [vmem:[%s7445_s9 + $0x98] sm:$0xf0]  ;;  %v6584_v43 = vld [vmem:[%s7445_s9 + $0x94] sm:$0xf] }
 0x3c9   : > { %v6923_v61 = vpop.eup %6922 }
 0x3ca   : > { %v6925_v62 = vpop.eup %6924  ;;  %v1671_v63 = vmul.f32 %v6923_v61, %v1669_v57  ;;  %vm1676_vm0 = vweird.f32 %v6923_v61  ;;  %v5449_v57 = vld [vmem:[%s7445_s9 + $0x84] sm:$0xf0] }
 0x3cb   : > { %v1691_v1 = vmul.f32 %v6925_v62, %v1689_v59  ;;  %vm1677_vm2 = vmor %vm1675_vm1, %vm1676_vm0  ;;  %vm1696_vm4 = vweird.f32 %v6925_v62  ;;  %v6559_v59 = vld [vmem:[%s7445_s9 + $0x88] sm:$0xf0] }
 0x3cc   : > { %v1672_v2 = vsub.f32 1.0, %v1671_v63  ;;  %vm1697_vm6 = vmor %vm1695_vm5, %vm1696_vm4  ;;  %v5456_v63 = vor.u32 %v6559_v59, %v5455_v58  ;;  %v6544_v58 = vld [vmem:[%s7445_s9 + $0x10] sm:$0xf0] }
 0x3cd   : > { %v1692_v3 = vsub.f32 1.0, %v1691_v1 }
 0x3ce   : > { %v1673_v6 = vmul.f32 %v6923_v61, %v1672_v2  ;;  %2164 = vmatpush.bf16.msrb.mxu0 %v5456_v63  ;;  %v5435_v2 = vld [vmem:[%s7445_s9 + $0x60] sm:$0xf] }
 0x3cf   : > { %v1693_v8 = vmul.f32 %v6925_v62, %v1692_v3  ;;  %v6555_v3 = vld [vmem:[%s7445_s9 + $0x68] sm:$0xf0] }
 0x3d0   : > { %v1674_v10 = vadd.f32 %v6923_v61, %v1673_v6  ;;  %v5436_v6 = vor.u32 %v6555_v3, %v5435_v2 }
 0x3d1   : > { %v1694_v16 = vadd.f32 %v6925_v62, %v1693_v8  ;;  %v5443_v8 = vld [vmem:[%s7445_s9 + $0x68] sm:$0xf] }
 0x3d2   : > { %v1678_v13 = vsel %vm1677_vm2, %v6923_v61, %v1674_v10  ;;  %2139 = vmatpush.bf16.msra.mxu2 %v5436_v6 }
 0x3d3   : > { %v1683_v15 = vsel %vm1680_vm3, %v1682_v11, %v1678_v13  ;;  %v1698_v20 = vsel %vm1697_vm6, %v6925_v62, %v1694_v16  ;;  %v5452_v62 = vor.u32 %v6557_v54, %v5449_v57  ;;  %v1718_v11 = vunpack.c.l.bf16 %v7839_v36  ;;  %v6552_v16 = vld [vmem:[%s7445_s9 + $0x50] sm:$0xf0]  ;;  %v6543_v54 = vld [vmem:[%s7445_s9 + $0x8] sm:$0xf0]  ;;  %v5395_v57 = vld [vmem:[%s7445_s9 + $0x8] sm:$0xf] }
 0x3d4   : > { %v1705_v45 = vmul.f32 %v1683_v15, %v1662_v46  ;;  %v1703_v14 = vsel %vm1700_vm7, %v1702_v22, %v1698_v20  ;;  %v5444_v46 = vor.u32 %v6556_v9, %v5443_v8  ;;  %v5423_v15 = vld [vmem:[%s7445_s9 + $0x48] sm:$0xf]  ;;  %v5431_v20 = vld [vmem:[%s7445_s9 + $0x50] sm:$0xf]  ;;  %v6553_v22 = vld [vmem:[%s7445_s9 + $0x58] sm:$0xf0]  ;;  %v5388_v59 = vor.u32 %v6543_v54, %v5387_v53 }
 0x3d5   : > { %v1708_v23 = vsub.f32 1.0, %v1703_v14  ;;  %v1710_v26 = vmul.f32 %v1703_v14, %v7768_v24  ;;  %v5473_v24 = vld [vmem:[%s7445_s9 + $0xb4] sm:$0xf0]  ;;  %v5424_v19 = vor.u32 %v6552_v16, %v5423_v15  ;;  %v5396_v63 = vor.u32 %v6544_v58, %v5395_v57  ;;  %v6582_v54 = vld [vmem:[%s7445_s9 + $0x80] sm:$0xf0] }
 0x3d6   : > { %v1706_v4 = vadd.f32 %v1705_v45, %v1465_v12  ;;  %v5476_v34 = vor.u32 %v6563_v30, %v5473_v24  ;;  %v5440_v12 = vor.u32 %v6554_v5, %v5437_v7  ;;  %v6551_v45 = vld [vmem:[%s7445_s9 + $0x4c] sm:$0xf]  ;;  %2165 = vmatpush.bf16.msrb.mxu0 %v5444_v46  ;;  %v5413_v30 = vld [vmem:[%s7445_s9 + $0x3c] sm:$0xf0]  ;;  %v6550_v24 = vld [vmem:[%s7445_s9 + $0x40] sm:$0xf0] }
 0x3d7   : > { %2140 = vmatpush.bf16.msra.mxu2 %v5424_v19  ;;  %v5420_v36 = vor.u32 %v6550_v24, %v5419_v31  ;;  %v5283_v46 = vld [vmem:[%s7437_s29 + $0x44] sm:$0xf]  ;;  %v5572_v24 = vld [vmem:[%s7445_s9 + $0xa8] sm:$0xf]  ;;  %v5548_v53 = vld [vmem:[%s7445_s9 + $0x78] sm:$0xf] }
 0x3d8   : > { %6926 = vtanh.f32 %v1706_v4  ;;  %2149 = vmatpush.bf16.msra.mxu3 %v5476_v34  ;;  %v5425_v4 = vld [vmem:[%s7445_s9 + $0x54] sm:$0xf0]  ;;  %v5550_v57 = vld [vmem:[%s7445_s9 + $0x84] sm:$0xf0]  ;;  %v5556_v58 = vld [vmem:[%s7445_s9 + $0x80] sm:$0xf] }
 0x3dc   : > { %2150 = vmatpush.bf16.msra.mxu3 %v5464_v48 }
 0x3de   : > { %v6927_v25 = vpop.eup %6926 }
 0x3df   : > { %v1709_v18 = vmul.f32 %v6927_v25, %v1708_v23  ;;  %v5428_v23 = vor.u32 %v6551_v45, %v5425_v4  ;;  %v5432_v25 = vor.u32 %v6553_v22, %v5431_v20 }
 0x3e0   : > { %2151 = vmatpush.bf16.msra.mxu3 %v5452_v62 }
 0x3e1   : > { %v7827_v27 = vadd.f32 %v1710_v26, %v1709_v18  ;;  %v5411_v18 = vld [vmem:[%s7445_s9 + $0x30] sm:$0xf]  ;;  %v6549_v26 = vld [vmem:[%s7445_s9 + $0x38] sm:$0xf0]  ;;  %2166 = vmatpush.bf16.msrb.mxu0 %v5432_v25 }
 0x3e2   : > { %v5412_v32 = vor.u32 %v6549_v26, %v5411_v18 }
 0x3e3   : > { %v1712_v28 = vpack.c.bf16 %v7827_v27, %v7827_v27 }
 0x3e4   : > { %2152 = vmatpush.bf16.msra.mxu3 %v5440_v12  ;;  %2141 = vmatpush.bf16.msra.mxu2 %v5412_v32  ;;  %v6588_v32 = vld [vmem:[%s7445_s9 + $0xb0] sm:$0xf0] }
 0x3e5   : > { %5281 = vst [vmem:[%s7461_s27 + $0x10] sm:$0xf] %v1712_v28  ;;  %1889 = vmatmul.bf16.vlgmr.msrb.gmra.mxu3 %v1712_v28  ;;  %1902 = vmatmul.bf16.vlgmr.msra.gmra.mxu0 %v1712_v28 }
 0x3e6   : > { %1915 = vmatmul.bf16.vlgmr.msra.gmra.mxu1 %v1712_v28  ;;  %v6548_v28 = vld [vmem:[%s7445_s9 + $0x34] sm:$0xf]  ;;  %2167 = vmatpush.bf16.msrb.mxu0 %v5420_v36  ;;  %v6589_v36 = vld [vmem:[%s7445_s9 + $0xb8] sm:$0xf0] }
 0x3e7   : > { %v5416_v35 = vor.u32 %v6548_v28, %v5413_v30 }
 0x3e8   : > { %2153 = vmatpush.bf16.msra.mxu3 %v5428_v23  ;;  %2142 = vmatpush.bf16.msra.mxu2 %v5400_v49  ;;  %v6586_v49 = vld [vmem:[%s7445_s9 + $0xa0] sm:$0xf0] }
 0x3ea   : > { %2168 = vmatpush.bf16.msrb.mxu0 %v5408_v52 }
 0x3ec   : > { %2154 = vmatpush.bf16.msra.mxu3 %v5416_v35  ;;  %2143 = vmatpush.bf16.msra.mxu2 %v5388_v59  ;;  %v5580_v35 = vld [vmem:[%s7445_s9 + $0xb0] sm:$0xf]  ;;  %v6583_v59 = vld [vmem:[%s7445_s9 + $0x88] sm:$0xf0] }
 0x3ee   : > { %2169 = vmatpush.bf16.msrb.mxu0 %v5396_v63  ;;  %v5557_v63 = vor.u32 %v6583_v59, %v5556_v58  ;;  %v5496_v58 = vld [vmem:[%s7445_s9 + $0x8] sm:$0xf]  ;;  %v6568_v59 = vld [vmem:[%s7445_s9 + $0x10] sm:$0xf0] }
 0x462   : > { %v1903_v55 = vpop.f32.mrf.mxu0 }
 0x463   : > { %v1904_v60 = vadd.f32 %v1903_v55, %v7541_v42  ;;  %v7855_v61 = vpop.f32.mrf.mxu1  ;;  %v6542_v55 = vld [vmem:[%s7445_s9 + $0x4] sm:$0xf] }
 0x464   : > { %v5392_v62 = vor.u32 %v6542_v55, %v5389_v56  ;;  %v1917_v16 = vadd.f32 %v7855_v61, %v7576_v50  ;;  %v6581_v55 = vld [vmem:[%s7445_s9 + $0x7c] sm:$0xf]  ;;  %v5549_v56 = vor.u32 %v6582_v54, %v5548_v53  ;;  %v5488_v54 = vld [vmem:[%s7445_s9] sm:$0xf] }
 0x465   : > { %v1940_v1 = vadd.f32 %v1904_v60, %v1719_v51  ;;  %v5404_v51 = vor.u32 %v6545_v38, %v5401_v39  ;;  %v5581_v38 = vor.u32 %v6589_v36, %v5580_v35  ;;  %v5560_v39 = vld [vmem:[%s7445_s9 + $0x90] sm:$0xf]  ;;  %v6570_v35 = vld [vmem:[%s7445_s9 + $0x20] sm:$0xf0] }
 0x467   : > { %v5381_v10 = vmul.f32 -1.442695, %v1940_v1  ;;  %2155 = vmatpush.bf16.msra.mxu3 %v5404_v51 }
 0x468   : > { %v1890_v13 = vpop.f32.mrf.mxu3 }
 0x469   : > { %6928 = vpow2.f32 %v5381_v10  ;;  %v1891_v17 = vadd.f32 %v1890_v13, %v7538_v41 }
 0x46a   : > { %v1905_v14 = vpop.f32.mrf.mxu0 }
 0x46b   : > { %v1920_v21 = vadd.f32 %v1891_v17, %v1718_v11  ;;  %v1918_v29 = vpop.f32.mrf.mxu1  ;;  %2156 = vmatpush.bf16.msra.mxu3 %v5392_v62  ;;  %v1720_v17 = vunpack.c.l.bf16 %v5283_v46  ;;  %v5553_v62 = vor.u32 %v6581_v55, %v5550_v57  ;;  %v6567_v55 = vld [vmem:[%s7445_s9 + $0x8] sm:$0xf0]  ;;  %v5490_v57 = vld [vmem:[%s7445_s9 + $0xc] sm:$0xf0] }
 0x46d   : > { %v5380_v34 = vmul.f32 -1.442695, %v1920_v21 }
 0x46f   : > { %v6929_v44 = vpop.eup %6928  ;;  %6930 = vpow2.f32 %v5380_v34  ;;  %v5573_v34 = vor.u32 %v6588_v32, %v5572_v24  ;;  %2417 = vmatpush.bf16.msrb.mxu3 %v5581_v38  ;;  %v5514_v24 = vld [vmem:[%s7445_s9 + $0x3c] sm:$0xf0]  ;;  %v5520_v32 = vld [vmem:[%s7445_s9 + $0x38] sm:$0xf] }
 0x470   : > { %v1944_v47 = vadd.f32 1.0, %v6929_v44  ;;  %v1892_v48 = vpop.f32.mrf.mxu3  ;;  %v5561_v44 = vor.u32 %v6585_v40, %v5560_v39  ;;  %v6569_v40 = vld [vmem:[%s7445_s9 + $0x1c] sm:$0xf] }
 0x471   : > { %2391 = vmatpush.bf16.msrb.mxu1 %v5573_v34  ;;  %v5568_v48 = vld [vmem:[%s7445_s9 + $0x98] sm:$0xf] }
 0x472   : > { %6932 = vrcp.f32 %v1944_v47  ;;  %v1956_v20 = vand.u32 2147483648, %v1944_v47  ;;  %vm1950_vm13 = vweird.f32 %v1944_v47  ;;  %v1954_v14 = vand.u32 2147483647, %v1944_v47 }
 0x473   : > { %v5569_v52 = vor.u32 %v6586_v49, %v5568_v48 }
 0x474   : > { %v1957_v18 = vor.u32 1.1754944e-38, %v1956_v20  ;;  %vm1955_vm15 = vcmp.eq.f32.partialorder %v1954_v14, 8.507059e+37  ;;  %v5532_v14 = vld [vmem:[%s7445_s9 + $0x50] sm:$0xf] }
 0x475   : > { %v6931_v60 = vpop.eup %6930  ;;  %2392 = vmatpush.bf16.msrb.mxu1 %v5561_v44  ;;  %2418 = vmatpush.bf16.msrb.mxu3 %v5569_v52  ;;  %v5508_v44 = vld [vmem:[%s7445_s9 + $0x20] sm:$0xf] }
 0x476   : > { %v1924_v1 = vadd.f32 1.0, %v6931_v60 }
 0x478   : > { %6934 = vrcp.f32 %v1924_v1  ;;  %v6933_v2 = vpop.eup %6932  ;;  %v1936_v9 = vand.u32 2147483648, %v1924_v1  ;;  %v1934_v11 = vand.u32 2147483647, %v1924_v1  ;;  %vm1930_vm9 = vweird.f32 %v1924_v1 }
 0x479   : > { %v1946_v3 = vmul.f32 %v6933_v2, %v1944_v47  ;;  %vm1951_vm12 = vweird.f32 %v6933_v2  ;;  %v5562_v47 = vld [vmem:[%s7445_s9 + $0x9c] sm:$0xf0]  ;;  %2393 = vmatpush.bf16.msrb.mxu1 %v5549_v56  ;;  %2419 = vmatpush.bf16.msrb.mxu3 %v5557_v63  ;;  %v6566_v56 = vld [vmem:[%s7445_s9 + $0x4] sm:$0xf] }
 0x47a   : > { %v1937_v15 = vor.u32 1.1754944e-38, %v1936_v9  ;;  %vm1935_vm11 = vcmp.eq.f32.partialorder %v1934_v11, 8.507059e+37  ;;  %vm1952_vm14 = vmor %vm1950_vm13, %vm1951_vm12  ;;  %v5565_v51 = vor.u32 %v6584_v43, %v5562_v47  ;;  %v6580_v9 = vld [vmem:[%s7445_s9 + $0x70] sm:$0xf0]  ;;  %v5502_v43 = vld [vmem:[%s7445_s9 + $0x24] sm:$0xf0] }
 0x47b   : > { %v1947_v7 = vsub.f32 1.0, %v1946_v3  ;;  %v6579_v3 = vld [vmem:[%s7445_s9 + $0x68] sm:$0xf0]  ;;  %v5505_v52 = vor.u32 %v6569_v40, %v5502_v43 }
 0x47c   : > { %v6571_v47 = vld [vmem:[%s7445_s9 + $0x28] sm:$0xf0] }
 0x47d   : > { %v1948_v12 = vmul.f32 %v6933_v2, %v1947_v7  ;;  %v5538_v7 = vld [vmem:[%s7445_s9 + $0x6c] sm:$0xf0]  ;;  %v5509_v53 = vor.u32 %v6571_v47, %v5508_v44 }
 0x47e   : > { %v6935_v5 = vpop.eup %6934 }
 0x47f   : > { %v1926_v6 = vmul.f32 %v6935_v5, %v1924_v1  ;;  %vm1931_vm8 = vweird.f32 %v6935_v5  ;;  %v1949_v4 = vadd.f32 %v6933_v2, %v1948_v12  ;;  %v5383_v1 = vld [vmem:[%s7437_s29 + $0x48] sm:$0xff] }
 0x480   : > { %vm1932_vm10 = vmor %vm1930_vm9, %vm1931_vm8  ;;  %v1974_v11 = vunpack.c.h.bf16 %v5383_v1 }
 0x481   : > { %v1927_v8 = vsub.f32 1.0, %v1926_v6  ;;  %v1953_v25 = vsel %vm1952_vm14, %v6933_v2, %v1949_v4  ;;  %v5536_v2 = vld [vmem:[%s7445_s9 + $0x60] sm:$0xf] }
 0x482   : > { %v1958_v61 = vsel %vm1955_vm15, %v1957_v18, %v1953_v25  ;;  %v5537_v6 = vor.u32 %v6579_v3, %v5536_v2  ;;  %v5497_v2 = vor.u32 %v6568_v59, %v5496_v58 }
 0x483   : > { %v1928_v10 = vmul.f32 %v6935_v5, %v1927_v8  ;;  %v1963_v26 = vsub.f32 1.0, %v1958_v61  ;;  %v1965_v29 = vmul.f32 %v1958_v61, %v7827_v27  ;;  %v5574_v27 = vld [vmem:[%s7445_s9 + $0xb4] sm:$0xf0]  ;;  %v5544_v8 = vld [vmem:[%s7445_s9 + $0x68] sm:$0xf] }
 0x484   : > { %v5577_v37 = vor.u32 %v6587_v33, %v5574_v27  ;;  %v5545_v46 = vor.u32 %v6580_v9, %v5544_v8  ;;  %2394 = vmatpush.bf16.msrb.mxu1 %v5537_v6  ;;  %v5512_v61 = vld [vmem:[%s7445_s9 + $0x30] sm:$0xf]  ;;  %v6574_v33 = vld [vmem:[%s7445_s9 + $0x40] sm:$0xf0]  ;;  %v5500_v27 = vld [vmem:[%s7445_s9 + $0x18] sm:$0xf] }
 0x485   : > { %v1929_v13 = vadd.f32 %v6935_v5, %v1928_v10  ;;  %v1973_v10 = vunpack.c.l.bf16 %v5383_v1  ;;  %v5521_v39 = vor.u32 %v6574_v33, %v5520_v32  ;;  %v5493_v1 = vor.u32 %v6566_v56, %v5490_v57 }
 0x486   : > { %2404 = vmatpush.bf16.msrb.mxu2 %v5577_v37  ;;  %2420 = vmatpush.bf16.msrb.mxu3 %v5545_v46 }
 0x487   : > { %v1933_v45 = vsel %vm1932_vm10, %v6935_v5, %v1929_v13  ;;  %v6578_v5 = vld [vmem:[%s7445_s9 + $0x64] sm:$0xf] }
 0x488   : > { %v1938_v19 = vsel %vm1935_vm11, %v1937_v15, %v1933_v45  ;;  %v5541_v12 = vor.u32 %v6578_v5, %v5538_v7  ;;  %v6576_v45 = vld [vmem:[%s7445_s9 + $0x50] sm:$0xf0] }
 0x489   : > { %v1960_v22 = vmul.f32 %v1938_v19, %v1917_v16  ;;  %v5524_v16 = vld [vmem:[%s7445_s9 + $0x48] sm:$0xf] }
 0x48a   : > { %2405 = vmatpush.bf16.msrb.mxu2 %v5565_v51  ;;  %v5525_v20 = vor.u32 %v6576_v45, %v5524_v16  ;;  %v5501_v51 = vor.u32 %v6570_v35, %v5500_v27  ;;  %v5384_v45 = vld [vmem:[%s7437_s29 + $0x50] sm:$0xf]  ;;  %v5484_v27 = vld [vmem:[%s7437_s29 + $0x54] sm:$0xff] }
 0x48b   : > { %v1961_v23 = vadd.f32 %v1960_v22, %v1720_v17  ;;  %v6575_v17 = vld [vmem:[%s7445_s9 + $0x4c] sm:$0xf]  ;;  %v5526_v22 = vld [vmem:[%s7445_s9 + $0x54] sm:$0xf0]  ;;  %v2228_v35 = vunpack.c.l.bf16 %v5484_v27  ;;  %v2229_v40 = vunpack.c.h.bf16 %v5484_v27 }
 0x48c   : > { %v5529_v25 = vor.u32 %v6575_v17, %v5526_v22  ;;  %2395 = vmatpush.bf16.msrb.mxu1 %v5525_v20  ;;  %v1975_v22 = vunpack.c.l.bf16 %v5384_v45 }
 0x48d   : > { %6936 = vtanh.f32 %v1961_v23  ;;  %v6577_v23 = vld [vmem:[%s7445_s9 + $0x58] sm:$0xf0] }
 0x48e   : > { %2406 = vmatpush.bf16.msrb.mxu2 %v5553_v62  ;;  %v5533_v18 = vor.u32 %v6577_v23, %v5532_v14  ;;  %v5489_v62 = vor.u32 %v6567_v55, %v5488_v54 }
 0x490   : > { %2421 = vmatpush.bf16.msrb.mxu3 %v5533_v18 }
 0x492   : > { %2407 = vmatpush.bf16.msrb.mxu2 %v5541_v12 }
 0x493   : > { %v6937_v28 = vpop.eup %6936 }
 0x494   : > { %v1964_v21 = vmul.f32 %v6937_v28, %v1963_v26  ;;  %v6573_v26 = vld [vmem:[%s7445_s9 + $0x38] sm:$0xf0]  ;;  %v6572_v28 = vld [vmem:[%s7445_s9 + $0x34] sm:$0xf]  ;;  %2422 = vmatpush.bf16.msrb.mxu3 %v5521_v39 }
 0x495   : > { %v5513_v34 = vor.u32 %v6573_v26, %v5512_v61  ;;  %v5517_v38 = vor.u32 %v6572_v28, %v5514_v24 }
 0x496   : > { %v7893_v30 = vadd.f32 %v1965_v29, %v1964_v21  ;;  %2408 = vmatpush.bf16.msrb.mxu2 %v5529_v25 }
 0x497   : > { %2396 = vmatpush.bf16.msrb.mxu1 %v5513_v34 }
 0x498   : > { %v1967_v31 = vpack.c.bf16 %v7893_v30, %v7893_v30  ;;  %2423 = vmatpush.bf16.msrb.mxu3 %v5509_v53 }
 0x49a   : > { %5382 = vst [vmem:[%s7461_s27 + $0x14] sm:$0xf] %v1967_v31  ;;  %2144 = vmatmul.bf16.vlgmr.msra.gmra.mxu2 %v1967_v31  ;;  %2157 = vmatmul.bf16.vlgmr.msra.gmra.mxu3 %v1967_v31 }
 0x49b   : > { %2170 = vmatmul.bf16.vlgmr.msrb.gmra.mxu0 %v1967_v31  ;;  %2409 = vmatpush.bf16.msrb.mxu2 %v5517_v38 }
 0x49c   : > { %2397 = vmatpush.bf16.msrb.mxu1 %v5501_v51  ;;  %2424 = vmatpush.bf16.msrb.mxu3 %v5497_v2 }
 0x49f   : > { %2410 = vmatpush.bf16.msrb.mxu2 %v5505_v52 }
 0x4a0   : > { %2398 = vmatpush.bf16.msrb.mxu1 %v5489_v62  ;;  %v5485_v62 = vld [vmem:[%s7437_s29 + $0x5c] sm:$0xf] }
 0x4a3   : > { %2411 = vmatpush.bf16.msrb.mxu2 %v5493_v1 }
 0x518   : > { %v7916_v60 = vpop.f32.mrf.mxu0 }
 0x51d   : > { %v2145_v13 = vpop.f32.mrf.mxu2  ;;  %v2158_v15 = vpop.f32.mrf.mxu3 }
 0x51e   : > { %v2146_v19 = vadd.f32 %v2145_v13, %v7538_v41  ;;  %v2159_v4 = vadd.f32 %v2158_v15, %v7541_v42 }
 0x520   : > { %v2175_v21 = vadd.f32 %v2146_v19, %v1973_v10  ;;  %v2195_v29 = vadd.f32 %v2159_v4, %v1974_v11  ;;  %v2173_v31 = vpop.f32.mrf.mxu0  ;;  %v2172_v4 = vadd.f32 %v7916_v60, %v7576_v50 }
 0x522   : > { %v5481_v36 = vmul.f32 -1.442695, %v2175_v21  ;;  %v5482_v37 = vmul.f32 -1.442695, %v2195_v29 }
 0x524   : > { %6938 = vpow2.f32 %v5481_v36 }
 0x525   : > { %6940 = vpow2.f32 %v5482_v37  ;;  %v2147_v48 = vpop.f32.mrf.mxu2  ;;  %v2160_v49 = vpop.f32.mrf.mxu3 }
 0x52a   : > { %v6939_v63 = vpop.eup %6938 }
 0x52b   : > { %v6941_v3 = vpop.eup %6940  ;;  %v2179_v5 = vadd.f32 1.0, %v6939_v63 }
 0x52c   : > { %v2199_v6 = vadd.f32 1.0, %v6941_v3 }
 0x52d   : > { %6942 = vrcp.f32 %v2179_v5  ;;  %v2191_v12 = vand.u32 2147483648, %v2179_v5  ;;  %v2189_v15 = vand.u32 2147483647, %v2179_v5  ;;  %vm2185_vm1 = vweird.f32 %v2179_v5 }
 0x52e   : > { %6944 = vrcp.f32 %v2199_v6  ;;  %v2211_v25 = vand.u32 2147483648, %v2199_v6  ;;  %vm2205_vm5 = vweird.f32 %v2199_v6  ;;  %v2209_v61 = vand.u32 2147483647, %v2199_v6 }
 0x52f   : > { %v2192_v19 = vor.u32 1.1754944e-38, %v2191_v12  ;;  %vm2190_vm3 = vcmp.eq.f32.partialorder %v2189_v15, 8.507059e+37 }
 0x530   : > { %v2212_v21 = vor.u32 1.1754944e-38, %v2211_v25  ;;  %vm2210_vm7 = vcmp.eq.f32.partialorder %v2209_v61, 8.507059e+37 }
 0x533   : > { %v6943_v7 = vpop.eup %6942 }
 0x534   : > { %v6945_v8 = vpop.eup %6944  ;;  %v2181_v9 = vmul.f32 %v6943_v7, %v2179_v5  ;;  %vm2186_vm0 = vweird.f32 %v6943_v7  ;;  %v2230_v5 = vunpack.c.l.bf16 %v5485_v62 }
 0x535   : > { %v2201_v10 = vmul.f32 %v6945_v8, %v2199_v6  ;;  %vm2187_vm2 = vmor %vm2185_vm1, %vm2186_vm0  ;;  %vm2206_vm4 = vweird.f32 %v6945_v8 }
 0x536   : > { %v2182_v11 = vsub.f32 1.0, %v2181_v9  ;;  %vm2207_vm6 = vmor %vm2205_vm5, %vm2206_vm4 }
 0x537   : > { %v2202_v46 = vsub.f32 1.0, %v2201_v10 }
 0x538   : > { %v2183_v13 = vmul.f32 %v6943_v7, %v2182_v11 }
 0x539   : > { %v2203_v16 = vmul.f32 %v6945_v8, %v2202_v46 }
 0x53a   : > { %v2184_v17 = vadd.f32 %v6943_v7, %v2183_v13 }
 0x53b   : > { %v2204_v23 = vadd.f32 %v6945_v8, %v2203_v16 }
 0x53c   : > { %v2188_v20 = vsel %vm2187_vm2, %v6943_v7, %v2184_v17 }
 0x53d   : > { %v2193_v14 = vsel %vm2190_vm3, %v2192_v19, %v2188_v20  ;;  %v2208_v28 = vsel %vm2207_vm6, %v6945_v8, %v2204_v23 }
 0x53e   : > { %v2215_v18 = vmul.f32 %v2193_v14, %v2172_v4  ;;  %v2213_v29 = vsel %vm2210_vm7, %v2212_v21, %v2208_v28 }
 0x53f   : > { %v2218_v60 = vsub.f32 1.0, %v2213_v29  ;;  %v2220_v32 = vmul.f32 %v2213_v29, %v7893_v30 }
 0x540   : > { %v2216_v26 = vadd.f32 %v2215_v18, %v1975_v22 }
 0x542   : > { %6946 = vtanh.f32 %v2216_v26 }
 0x548   : > { %v6947_v31 = vpop.eup %6946 }
 0x549   : > { %v2219_v24 = vmul.f32 %v6947_v31, %v2218_v60 }
 0x54b   : > { %v7955_v33 = vadd.f32 %v2220_v32, %v2219_v24 }
 0x54d   : > { %v2222_v34 = vpack.c.bf16 %v7955_v33, %v7955_v33 }
 0x54f   : > { %5483 = vst [vmem:[%s7461_s27 + $0x18] sm:$0xf] %v2222_v34  ;;  %2399 = vmatmul.bf16.vlgmr.msrb.gmra.mxu1 %v2222_v34  ;;  %2412 = vmatmul.bf16.vlgmr.msrb.gmra.mxu2 %v2222_v34 }
 0x550   : > { %2425 = vmatmul.bf16.vlgmr.msrb.gmra.mxu3 %v2222_v34 }
 0x5cc   : > { %v2400_v36 = vpop.f32.mrf.mxu1 }
 0x5cd   : > { %v2401_v37 = vadd.f32 %v2400_v36, %v7538_v41 }
 0x5cf   : > { %v2430_v38 = vadd.f32 %v2401_v37, %v2228_v35 }
 0x5d1   : > { %v5582_v39 = vmul.f32 -1.442695, %v2430_v38 }
 0x5d2   : > { %v2413_v43 = vpop.f32.mrf.mxu2 }
 0x5d3   : > { %6948 = vpow2.f32 %v5582_v39  ;;  %v2414_v30 = vadd.f32 %v2413_v43, %v7541_v42  ;;  %v2426_v44 = vpop.f32.mrf.mxu3 }
 0x5d4   : > { %v2402_v47 = vpop.f32.mrf.mxu1  ;;  %v2427_v8 = vadd.f32 %v2426_v44, %v7576_v50 }
 0x5d5   : > { %v2450_v48 = vadd.f32 %v2414_v30, %v2229_v40 }
 0x5d7   : > { %v5583_v49 = vmul.f32 -1.442695, %v2450_v48 }
 0x5d9   : > { %v6949_v51 = vpop.eup %6948  ;;  %6950 = vpow2.f32 %v5583_v49 }
 0x5da   : > { %v2434_v52 = vadd.f32 1.0, %v6949_v51  ;;  %v2415_v53 = vpop.f32.mrf.mxu2 }
 0x5db   : > { %v2428_v54 = vpop.f32.mrf.mxu3 }
 0x5dc   : > { %6952 = vrcp.f32 %v2434_v52  ;;  %v2446_v59 = vand.u32 2147483648, %v2434_v52  ;;  %v2444_v63 = vand.u32 2147483647, %v2434_v52  ;;  %vm2440_vm9 = vweird.f32 %v2434_v52 }
 0x5de   : > { %v2447_v6 = vor.u32 1.1754944e-38, %v2446_v59  ;;  %vm2445_vm11 = vcmp.eq.f32.partialorder %v2444_v63, 8.507059e+37 }
 0x5df   : > { %v6951_v55 = vpop.eup %6950 }
 0x5e0   : > { %v2454_v41 = vadd.f32 1.0, %v6951_v55 }
 0x5e2   : > { %v6953_v56 = vpop.eup %6952  ;;  %6954 = vrcp.f32 %v2454_v41  ;;  %v2466_v12 = vand.u32 2147483648, %v2454_v41  ;;  %v2464_v13 = vand.u32 2147483647, %v2454_v41  ;;  %vm2460_vm13 = vweird.f32 %v2454_v41 }
 0x5e3   : > { %v2436_v57 = vmul.f32 %v6953_v56, %v2434_v52  ;;  %vm2441_vm8 = vweird.f32 %v6953_v56 }
 0x5e4   : > { %vm2442_vm10 = vmor %vm2440_vm9, %vm2441_vm8  ;;  %v2467_v45 = vor.u32 1.1754944e-38, %v2466_v12  ;;  %vm2465_vm15 = vcmp.eq.f32.partialorder %v2464_v13, 8.507059e+37 }
 0x5e5   : > { %v2437_v58 = vsub.f32 1.0, %v2436_v57 }
 0x5e7   : > { %v2438_v42 = vmul.f32 %v6953_v56, %v2437_v58 }
 0x5e8   : > { %v6955_v1 = vpop.eup %6954 }
 0x5e9   : > { %v2456_v2 = vmul.f32 %v6955_v1, %v2454_v41  ;;  %v2439_v3 = vadd.f32 %v6953_v56, %v2438_v42  ;;  %vm2461_vm12 = vweird.f32 %v6955_v1 }
 0x5ea   : > { %vm2462_vm14 = vmor %vm2460_vm13, %vm2461_vm12 }
 0x5eb   : > { %v2457_v7 = vsub.f32 1.0, %v2456_v2  ;;  %v2443_v9 = vsel %vm2442_vm10, %v6953_v56, %v2439_v3 }
 0x5ec   : > { %v2448_v10 = vsel %vm2445_vm11, %v2447_v6, %v2443_v9 }
 0x5ed   : > { %v2458_v11 = vmul.f32 %v6955_v1, %v2457_v7  ;;  %v2470_v46 = vmul.f32 %v2448_v10, %v2427_v8 }
 0x5ef   : > { %v2459_v15 = vadd.f32 %v6955_v1, %v2458_v11  ;;  %v2471_v16 = vadd.f32 %v2470_v46, %v2230_v5 }
 0x5f1   : > { %v2463_v17 = vsel %vm2462_vm14, %v6955_v1, %v2459_v15  ;;  %6956 = vtanh.f32 %v2471_v16 }
 0x5f2   : > { %v2468_v19 = vsel %vm2465_vm15, %v2467_v45, %v2463_v17 }
 0x5f3   : > { %v2473_v4 = vsub.f32 1.0, %v2468_v19  ;;  %v2475_v22 = vmul.f32 %v2468_v19, %v7955_v33 }
 0x5f7   : > { %v6957_v50 = vpop.eup %6956 }
 0x5f8   : > { %v2474_v20 = vmul.f32 %v6957_v50, %v2473_v4 }
 0x5fa   : > { %v2476_v14 = vadd.f32 %v2475_v22, %v2474_v20 }
 0x5fc   : > { %v2477_v23 = vpack.c.bf16 %v2476_v14, %v2476_v14  ;;  %2480 = vst [vmem:[#allocation2] sm:$0xff] %v2476_v14 }
 0x5fe   : > { %5584 = vst [vmem:[%s7461_s27 + $0x1c] sm:$0xf] %v2477_v23 }
 0x5ff PF: > { %p5585_p5 = scmp.ne.s32.totalorder %s7272_s21, 1 }
 0x601   : > { %2484 = sbr.rel (%p5585_p5) target bundleno = 3001 (0xbb9), region = 64 }
 0x606   : > { %v5674_v25 = vld [vmem:[%s7445_s9 + $0xa8] sm:$0xf]  ;;  %v6612_v18 = vld [vmem:[%s7445_s9 + $0xb0] sm:$0xf0]  ;;  %v6611_v61 = vld [vmem:[%s7445_s9 + $0xac] sm:$0xf] }
 0x607   : > { %v5675_v26 = vor.u32 %v6612_v18, %v5674_v25  ;;  %v5676_v28 = vld [vmem:[%s7445_s9 + $0xb4] sm:$0xf0]  ;;  %v5662_v21 = vld [vmem:[%s7445_s9 + $0x90] sm:$0xf]  ;;  %v6609_v29 = vld [vmem:[%s7445_s9 + $0x98] sm:$0xf0] }
 0x608   : > { %v5679_v60 = vor.u32 %v6611_v61, %v5676_v28  ;;  %v6608_v31 = vld [vmem:[%s7445_s9 + $0x94] sm:$0xf]  ;;  %v5664_v24 = vld [vmem:[%s7445_s9 + $0x9c] sm:$0xf0]  ;;  %v5663_v32 = vor.u32 %v6609_v29, %v5662_v21  ;;  %v5650_v34 = vld [vmem:[%s7445_s9 + $0x78] sm:$0xf] }
 0x609   : > { %2660 = vmatpush.bf16.msra.mxu0 %v5675_v26  ;;  %v5667_v33 = vor.u32 %v6608_v31, %v5664_v24  ;;  %v6606_v27 = vld [vmem:[%s7445_s9 + $0x80] sm:$0xf0]  ;;  %v6605_v35 = vld [vmem:[%s7445_s9 + $0x7c] sm:$0xf]  ;;  %v5652_v36 = vld [vmem:[%s7445_s9 + $0x84] sm:$0xf0] }
 0x60a   : > { %2673 = vmatpush.bf16.msra.mxu1 %v5679_v60  ;;  %v5682_v37 = vld [vmem:[%s7445_s9 + $0xb0] sm:$0xf]  ;;  %v5651_v38 = vor.u32 %v6606_v27, %v5650_v34  ;;  %v6613_v39 = vld [vmem:[%s7445_s9 + $0xb8] sm:$0xf0]  ;;  %v5655_v40 = vor.u32 %v6605_v35, %v5652_v36  ;;  %v5638_v43 = vld [vmem:[%s7445_s9 + $0x60] sm:$0xf] }
 0x60b   : > { %v6603_v30 = vld [vmem:[%s7445_s9 + $0x68] sm:$0xf0]  ;;  %v5683_v44 = vor.u32 %v6613_v39, %v5682_v37  ;;  %v5670_v47 = vld [vmem:[%s7445_s9 + $0x98] sm:$0xf]  ;;  %v6602_v48 = vld [vmem:[%s7445_s9 + $0x64] sm:$0xf] }
 0x60c   : > { %v5640_v49 = vld [vmem:[%s7445_s9 + $0x6c] sm:$0xf0]  ;;  %v6610_v51 = vld [vmem:[%s7445_s9 + $0xa0] sm:$0xf0]  ;;  %v5639_v53 = vor.u32 %v6603_v30, %v5638_v43  ;;  %v5658_v54 = vld [vmem:[%s7445_s9 + $0x80] sm:$0xf] }
 0x60d   : > { %2661 = vmatpush.bf16.msra.mxu0 %v5663_v32  ;;  %2686 = vmatpush.bf16.msra.mxu2 %v5683_v44  ;;  %v5671_v52 = vor.u32 %v6610_v51, %v5670_v47  ;;  %v6607_v55 = vld [vmem:[%s7445_s9 + $0x88] sm:$0xf0]  ;;  %v5643_v41 = vor.u32 %v6602_v48, %v5640_v49  ;;  %v5626_v56 = vld [vmem:[%s7445_s9 + $0x48] sm:$0xf]  ;;  %v6600_v57 = vld [vmem:[%s7445_s9 + $0x50] sm:$0xf0] }
 0x60e   : > { %2674 = vmatpush.bf16.msra.mxu1 %v5667_v33  ;;  %v6599_v58 = vld [vmem:[%s7445_s9 + $0x4c] sm:$0xf]  ;;  %v5628_v59 = vld [vmem:[%s7445_s9 + $0x54] sm:$0xf0]  ;;  %v5659_v62 = vor.u32 %v6607_v55, %v5658_v54  ;;  %v5627_v42 = vor.u32 %v6600_v57, %v5626_v56  ;;  %v5646_v63 = vld [vmem:[%s7445_s9 + $0x68] sm:$0xf] }
 0x60f   : > { %v6604_v1 = vld [vmem:[%s7445_s9 + $0x70] sm:$0xf0]  ;;  %v5631_v2 = vor.u32 %v6599_v58, %v5628_v59  ;;  %v5614_v3 = vld [vmem:[%s7445_s9 + $0x30] sm:$0xf]  ;;  %v6597_v5 = vld [vmem:[%s7445_s9 + $0x38] sm:$0xf0] }
 0x610   : > { %v6596_v6 = vld [vmem:[%s7445_s9 + $0x34] sm:$0xf]  ;;  %v5616_v7 = vld [vmem:[%s7445_s9 + $0x3c] sm:$0xf0]  ;;  %v5647_v8 = vor.u32 %v6604_v1, %v5646_v63  ;;  %v5615_v9 = vor.u32 %v6597_v5, %v5614_v3  ;;  %v5634_v10 = vld [vmem:[%s7445_s9 + $0x50] sm:$0xf] }
 0x611   : > { %2662 = vmatpush.bf16.msra.mxu0 %v5651_v38  ;;  %2687 = vmatpush.bf16.msra.mxu2 %v5671_v52  ;;  %v6601_v11 = vld [vmem:[%s7445_s9 + $0x58] sm:$0xf0]  ;;  %v5619_v12 = vor.u32 %v6596_v6, %v5616_v7  ;;  %v5602_v46 = vld [vmem:[%s7445_s9 + $0x18] sm:$0xf]  ;;  %v6594_v13 = vld [vmem:[%s7445_s9 + $0x20] sm:$0xf0] }
 0x612   : > { %2675 = vmatpush.bf16.msra.mxu1 %v5655_v40  ;;  %v6593_v15 = vld [vmem:[%s7445_s9 + $0x1c] sm:$0xf]  ;;  %v5604_v16 = vld [vmem:[%s7445_s9 + $0x24] sm:$0xf0]  ;;  %v5635_v45 = vor.u32 %v6601_v11, %v5634_v10  ;;  %v5603_v17 = vor.u32 %v6594_v13, %v5602_v46  ;;  %v5622_v19 = vld [vmem:[%s7445_s9 + $0x38] sm:$0xf] }
 0x613   : > { %v6598_v4 = vld [vmem:[%s7445_s9 + $0x40] sm:$0xf0]  ;;  %v5607_v50 = vor.u32 %v6593_v15, %v5604_v16  ;;  %v5590_v20 = vld [vmem:[%s7445_s9] sm:$0xf]  ;;  %v6591_v22 = vld [vmem:[%s7445_s9 + $0x8] sm:$0xf0] }
 0x614   : > { %v6590_v14 = vld [vmem:[%s7445_s9 + $0x4] sm:$0xf]  ;;  %v5592_v23 = vld [vmem:[%s7445_s9 + $0xc] sm:$0xf0]  ;;  %v5623_v25 = vor.u32 %v6598_v4, %v5622_v19  ;;  %v5591_v18 = vor.u32 %v6591_v22, %v5590_v20  ;;  %v8012_v61 = vld [vmem:[#allocation2] sm:$0xff]  ;;  %v8040_v1 = vperm.slane %v7459_v0, 0 }
 0x615   : > { %2663 = vmatpush.bf16.msra.mxu0 %v5639_v53  ;;  %2688 = vmatpush.bf16.msra.mxu2 %v5659_v62  ;;  %v5610_v26 = vld [vmem:[%s7445_s9 + $0x20] sm:$0xf]  ;;  %v6595_v28 = vld [vmem:[%s7445_s9 + $0x28] sm:$0xf0]  ;;  %v5595_v21 = vor.u32 %v6590_v14, %v5592_v23  ;;  %v2492_v29 = vpack.c.bf16 %v8012_v61, %v8012_v61  ;;  %v5598_v31 = vld [vmem:[%s7445_s9 + $0x8] sm:$0xf] }
 0x616   : > { %2676 = vmatpush.bf16.msra.mxu1 %v5643_v41  ;;  %v5611_v60 = vor.u32 %v6595_v28, %v5610_v26  ;;  %v6592_v24 = vld [vmem:[%s7445_s9 + $0x10] sm:$0xf0]  ;;  %v5775_v33 = vld [vmem:[%s7445_s9 + $0xa8] sm:$0xf]  ;;  %v6635_v27 = vld [vmem:[%s7445_s9 + $0xac] sm:$0xf] }
 0x617   : > { %v5599_v32 = vor.u32 %v6592_v24, %v5598_v31  ;;  %v6636_v34 = vld [vmem:[%s7445_s9 + $0xb0] sm:$0xf0]  ;;  %v5777_v36 = vld [vmem:[%s7445_s9 + $0xb4] sm:$0xf0]  ;;  %v5783_v37 = vld [vmem:[%s7445_s9 + $0xb0] sm:$0xf] }
 0x618   : > { %v5776_v35 = vor.u32 %v6636_v34, %v5775_v33  ;;  %v6637_v38 = vld [vmem:[%s7445_s9 + $0xb8] sm:$0xf0]  ;;  %v5780_v39 = vor.u32 %v6635_v27, %v5777_v36  ;;  %v5763_v43 = vld [vmem:[%s7445_s9 + $0x90] sm:$0xf]  ;;  %v6632_v44 = vld [vmem:[%s7445_s9 + $0x94] sm:$0xf] }
 0x619   : > { %2664 = vmatpush.bf16.msra.mxu0 %v5627_v42  ;;  %2689 = vmatpush.bf16.msra.mxu2 %v5647_v8  ;;  %v5784_v40 = vor.u32 %v6637_v38, %v5783_v37  ;;  %v6633_v30 = vld [vmem:[%s7445_s9 + $0x98] sm:$0xf0]  ;;  %v5765_v48 = vld [vmem:[%s7445_s9 + $0x9c] sm:$0xf0]  ;;  %v5771_v49 = vld [vmem:[%s7445_s9 + $0x98] sm:$0xf] }
 0x61a   : > { %2677 = vmatpush.bf16.msra.mxu1 %v5631_v2  ;;  %2915 = vmatpush.bf16.msra.mxu3 %v5776_v35  ;;  %v5764_v47 = vor.u32 %v6633_v30, %v5763_v43  ;;  %v6634_v51 = vld [vmem:[%s7445_s9 + $0xa0] sm:$0xf0]  ;;  %v5768_v52 = vor.u32 %v6632_v44, %v5765_v48  ;;  %v5751_v54 = vld [vmem:[%s7445_s9 + $0x78] sm:$0xf]  ;;  %v6629_v41 = vld [vmem:[%s7445_s9 + $0x7c] sm:$0xf] }
 0x61b   : > { %v5772_v53 = vor.u32 %v6634_v51, %v5771_v49  ;;  %v6630_v55 = vld [vmem:[%s7445_s9 + $0x80] sm:$0xf0]  ;;  %v5753_v57 = vld [vmem:[%s7445_s9 + $0x84] sm:$0xf0]  ;;  %v5759_v58 = vld [vmem:[%s7445_s9 + $0x80] sm:$0xf] }
 0x61c   : > { %v5752_v56 = vor.u32 %v6630_v55, %v5751_v54  ;;  %v6631_v59 = vld [vmem:[%s7445_s9 + $0x88] sm:$0xf0]  ;;  %v5756_v62 = vor.u32 %v6629_v41, %v5753_v57  ;;  %v5586_v63 = vld [vmem:[%s7437_s29 + $0x54] sm:$0xff]  ;;  %v8043_v2 = vperm.slane %v7459_v0, 1  ;;  %v5739_v3 = vld [vmem:[%s7445_s9 + $0x60] sm:$0xf] }
 0x61d   : > { %2665 = vmatpush.bf16.msra.mxu0 %v5615_v9  ;;  %2690 = vmatpush.bf16.msra.mxu2 %v5635_v45  ;;  %v5760_v42 = vor.u32 %v6631_v59, %v5759_v58  ;;  %v6627_v5 = vld [vmem:[%s7445_s9 + $0x68] sm:$0xf0]  ;;  %v6626_v6 = vld [vmem:[%s7445_s9 + $0x64] sm:$0xf]  ;;  %v5741_v8 = vld [vmem:[%s7445_s9 + $0x6c] sm:$0xf0]  ;;  %v2489_v11 = vunpack.c.l.bf16 %v5586_v63  ;;  %v2490_v15 = vunpack.c.h.bf16 %v5586_v63 }
 0x61e   : > { %2678 = vmatpush.bf16.msra.mxu1 %v5619_v12  ;;  %2916 = vmatpush.bf16.msra.mxu3 %v5764_v47  ;;  %v5740_v7 = vor.u32 %v6627_v5, %v5739_v3  ;;  %v5747_v9 = vld [vmem:[%s7445_s9 + $0x68] sm:$0xf]  ;;  %v6628_v10 = vld [vmem:[%s7445_s9 + $0x70] sm:$0xf0]  ;;  %v5744_v12 = vor.u32 %v6626_v6, %v5741_v8  ;;  %v6623_v4 = vld [vmem:[%s7445_s9 + $0x4c] sm:$0xf] }
 0x61f   : > { %v5748_v46 = vor.u32 %v6628_v10, %v5747_v9  ;;  %v6624_v19 = vld [vmem:[%s7445_s9 + $0x50] sm:$0xf0]  ;;  %v5729_v22 = vld [vmem:[%s7445_s9 + $0x54] sm:$0xf0]  ;;  %v5735_v14 = vld [vmem:[%s7445_s9 + $0x50] sm:$0xf] }
 0x620   : > { %v6625_v23 = vld [vmem:[%s7445_s9 + $0x58] sm:$0xf0]  ;;  %v5717_v33 = vld [vmem:[%s7445_s9 + $0x3c] sm:$0xf0]  ;;  %v5723_v27 = vld [vmem:[%s7445_s9 + $0x38] sm:$0xf] }
 0x621   : > { %2666 = vmatpush.bf16.msra.mxu0 %v5603_v17  ;;  %2691 = vmatpush.bf16.msra.mxu2 %v5623_v25  ;;  %v5727_v17 = vld [vmem:[%s7445_s9 + $0x48] sm:$0xf]  ;;  %v5736_v26 = vor.u32 %v6625_v23, %v5735_v14  ;;  %v6622_v35 = vld [vmem:[%s7445_s9 + $0x40] sm:$0xf0]  ;;  %v5703_v36 = vld [vmem:[%s7445_s9 + $0x18] sm:$0xf] }
 0x622   : > { %2679 = vmatpush.bf16.msra.mxu1 %v5607_v50  ;;  %2917 = vmatpush.bf16.msra.mxu3 %v5752_v56  ;;  %v5728_v20 = vor.u32 %v6624_v19, %v5727_v17  ;;  %v5724_v38 = vor.u32 %v6622_v35, %v5723_v27  ;;  %v5705_v43 = vld [vmem:[%s7445_s9 + $0x24] sm:$0xf0]  ;;  %v5711_v48 = vld [vmem:[%s7445_s9 + $0x20] sm:$0xf]  ;;  %v6619_v49 = vld [vmem:[%s7445_s9 + $0x28] sm:$0xf0] }
 0x623   : > { %v5691_v51 = vld [vmem:[%s7445_s9] sm:$0xf]  ;;  %v6614_v54 = vld [vmem:[%s7445_s9 + $0x4] sm:$0xf]  ;;  %v5693_v55 = vld [vmem:[%s7445_s9 + $0xc] sm:$0xf0] }
 0x624   : > { %v5699_v41 = vld [vmem:[%s7445_s9 + $0x8] sm:$0xf]  ;;  %v6616_v56 = vld [vmem:[%s7445_s9 + $0x10] sm:$0xf0]  ;;  %v5587_v17 = vld [vmem:[%s7437_s29 + $0x5c] sm:$0xf] }
 0x625   : > { %2667 = vmatpush.bf16.msra.mxu0 %v5591_v18  ;;  %2692 = vmatpush.bf16.msra.mxu2 %v5611_v60  ;;  %v5732_v18 = vor.u32 %v6623_v4, %v5729_v22  ;;  %v6621_v60 = vld [vmem:[%s7445_s9 + $0x38] sm:$0xf0]  ;;  %v5700_v3 = vor.u32 %v6616_v56, %v5699_v41  ;;  %v5876_v27 = vld [vmem:[%s7445_s9 + $0xa8] sm:$0xf]  ;;  %v6660_v35 = vld [vmem:[%s7445_s9 + $0xb0] sm:$0xf0] }
 0x626   : > { %2680 = vmatpush.bf16.msra.mxu1 %v5595_v21  ;;  %2918 = vmatpush.bf16.msra.mxu3 %v5740_v7  ;;  %v5852_v56 = vld [vmem:[%s7445_s9 + $0x78] sm:$0xf] }
 0x628   : > { %2668 = vmatmul.bf16.vlgmr.msra.gmra.mxu0 %v2492_v29 }
 0x629   : > { %2681 = vmatmul.bf16.vlgmr.msra.gmra.mxu1 %v2492_v29  ;;  %2693 = vmatpush.bf16.msra.mxu2 %v5599_v32  ;;  %v6620_v32 = vld [vmem:[%s7445_s9 + $0x34] sm:$0xf] }
 0x62a   : > { %2928 = vmatpush.bf16.msrb.mxu0 %v5780_v39  ;;  %2941 = vmatpush.bf16.msrb.mxu1 %v5784_v40  ;;  %v5720_v34 = vor.u32 %v6620_v32, %v5717_v33  ;;  %v6618_v39 = vld [vmem:[%s7445_s9 + $0x20] sm:$0xf0]  ;;  %v6617_v40 = vld [vmem:[%s7445_s9 + $0x1c] sm:$0xf] }
 0x62b   : > { %2919 = vmatpush.bf16.msra.mxu3 %v5728_v20  ;;  %v5704_v44 = vor.u32 %v6618_v39, %v5703_v36  ;;  %v5708_v47 = vor.u32 %v6617_v40, %v5705_v43  ;;  %v2491_v20 = vunpack.c.l.bf16 %v5587_v17  ;;  %v6659_v36 = vld [vmem:[%s7445_s9 + $0xac] sm:$0xf]  ;;  %v6661_v39 = vld [vmem:[%s7445_s9 + $0xb8] sm:$0xf0] }
 0x62c   : > { %2694 = vmatmul.bf16.vlgmr.msra.gmra.mxu2 %v2492_v29  ;;  %v5715_v29 = vld [vmem:[%s7445_s9 + $0x30] sm:$0xf] }
 0x62d   : > { %v5716_v24 = vor.u32 %v6621_v60, %v5715_v29 }
 0x62e   : > { %2929 = vmatpush.bf16.msrb.mxu0 %v5768_v52  ;;  %2942 = vmatpush.bf16.msrb.mxu1 %v5772_v53  ;;  %v5712_v52 = vor.u32 %v6619_v49, %v5711_v48  ;;  %v6615_v53 = vld [vmem:[%s7445_s9 + $0x8] sm:$0xf0]  ;;  %v6656_v48 = vld [vmem:[%s7445_s9 + $0x94] sm:$0xf] }
 0x62f   : > { %2920 = vmatpush.bf16.msra.mxu3 %v5716_v24  ;;  %v5692_v57 = vor.u32 %v6615_v53, %v5691_v51  ;;  %v5866_v51 = vld [vmem:[%s7445_s9 + $0x9c] sm:$0xf0]  ;;  %v6658_v53 = vld [vmem:[%s7445_s9 + $0xa0] sm:$0xf0] }
 0x632   : > { %2930 = vmatpush.bf16.msrb.mxu0 %v5756_v62  ;;  %2943 = vmatpush.bf16.msrb.mxu1 %v5760_v42  ;;  %v5696_v62 = vor.u32 %v6614_v54, %v5693_v55  ;;  %v5869_v54 = vor.u32 %v6656_v48, %v5866_v51  ;;  %v5812_v48 = vld [vmem:[%s7445_s9 + $0x20] sm:$0xf] }
 0x633   : > { %2921 = vmatpush.bf16.msra.mxu3 %v5704_v44  ;;  %v5864_v44 = vld [vmem:[%s7445_s9 + $0x90] sm:$0xf] }
 0x636   : > { %2931 = vmatpush.bf16.msrb.mxu0 %v5744_v12  ;;  %2944 = vmatpush.bf16.msrb.mxu1 %v5748_v46 }
 0x637   : > { %2922 = vmatpush.bf16.msra.mxu3 %v5692_v57  ;;  %v6654_v57 = vld [vmem:[%s7445_s9 + $0x80] sm:$0xf0] }
 0x63a   : > { %2932 = vmatpush.bf16.msrb.mxu0 %v5732_v18  ;;  %2945 = vmatpush.bf16.msrb.mxu1 %v5736_v26 }
 0x63e   : > { %2933 = vmatpush.bf16.msrb.mxu0 %v5720_v34  ;;  %2946 = vmatpush.bf16.msrb.mxu1 %v5724_v38  ;;  %v5884_v38 = vld [vmem:[%s7445_s9 + $0xb0] sm:$0xf] }
 0x63f   : > { %v5885_v43 = vor.u32 %v6661_v39, %v5884_v38  ;;  %v5804_v38 = vld [vmem:[%s7445_s9 + $0x18] sm:$0xf] }
 0x642   : > { %2934 = vmatpush.bf16.msrb.mxu0 %v5708_v47  ;;  %2947 = vmatpush.bf16.msrb.mxu1 %v5712_v52  ;;  %v6657_v47 = vld [vmem:[%s7445_s9 + $0x98] sm:$0xf0]  ;;  %v5872_v52 = vld [vmem:[%s7445_s9 + $0x98] sm:$0xf] }
 0x643   : > { %v5865_v49 = vor.u32 %v6657_v47, %v5864_v44  ;;  %v5873_v55 = vor.u32 %v6658_v53, %v5872_v52  ;;  %v6641_v44 = vld [vmem:[%s7445_s9 + $0x1c] sm:$0xf]  ;;  %v5806_v47 = vld [vmem:[%s7445_s9 + $0x24] sm:$0xf0] }
 0x646   : > { %2935 = vmatpush.bf16.msrb.mxu0 %v5696_v62  ;;  %2948 = vmatpush.bf16.msrb.mxu1 %v5700_v3  ;;  %v5853_v62 = vor.u32 %v6654_v57, %v5852_v56  ;;  %v6655_v3 = vld [vmem:[%s7445_s9 + $0x88] sm:$0xf0]  ;;  %v5792_v56 = vld [vmem:[%s7445_s9] sm:$0xf] }
 0x647   : > { %v6639_v57 = vld [vmem:[%s7445_s9 + $0x8] sm:$0xf0] }
 0x64a   : > { %3196 = vmatpush.bf16.msra.mxu0 %v5885_v43 }
 0x64e   : > { %3197 = vmatpush.bf16.msra.mxu0 %v5873_v55  ;;  %v5809_v55 = vor.u32 %v6641_v44, %v5806_v47  ;;  %v5965_v44 = vld [vmem:[%s7445_s9 + $0x90] sm:$0xf]  ;;  %v6681_v47 = vld [vmem:[%s7445_s9 + $0x98] sm:$0xf0] }
 0x6a5   : > { %v2669_v13 = vpop.f32.mrf.mxu0 }
 0x6a6   : > { %v2670_v16 = vadd.f32 %v2669_v13, %v8040_v1  ;;  %v2682_v45 = vpop.f32.mrf.mxu1 }
 0x6a7   : > { %v2683_v50 = vadd.f32 %v2682_v45, %v8043_v2 }
 0x6a8   : > { %v2699_v25 = vadd.f32 %v2670_v16, %v2489_v11  ;;  %v8078_v11 = vperm.slane %v7459_v0, 2 }
 0x6a9   : > { %v2719_v28 = vadd.f32 %v2683_v50, %v2490_v15 }
 0x6aa   : > { %v5684_v21 = vmul.f32 -1.442695, %v2699_v25 }
 0x6ab   : > { %v5685_v31 = vmul.f32 -1.442695, %v2719_v28 }
 0x6ac   : > { %6958 = vpow2.f32 %v5684_v21 }
 0x6ad   : > { %6960 = vpow2.f32 %v5685_v31  ;;  %v2671_v37 = vpop.f32.mrf.mxu0 }
 0x6ae   : > { %v2684_v30 = vpop.f32.mrf.mxu1  ;;  %v5877_v37 = vor.u32 %v6660_v35, %v5876_v27  ;;  %v5818_v35 = vld [vmem:[%s7445_s9 + $0x3c] sm:$0xf0] }
 0x6af   : > { %v2695_v59 = vpop.f32.mrf.mxu2  ;;  %v8095_v30 = vld [vmem:[%s7437_s29 + $0x48] sm:$0xff] }
 0x6b0   : > { %v2696_v19 = vadd.f32 %v2695_v59, %v8078_v11  ;;  %3170 = vmatpush.bf16.msrb.mxu2 %v5877_v37  ;;  %v2753_v41 = vunpack.c.h.bf16 %v8095_v30  ;;  %v6646_v37 = vld [vmem:[%s7445_s9 + $0x40] sm:$0xf0] }
 0x6b2   : > { %v6959_v58 = vpop.eup %6958 }
 0x6b3   : > { %v6961_v42 = vpop.eup %6960  ;;  %v2703_v63 = vadd.f32 1.0, %v6959_v58  ;;  %v6653_v58 = vld [vmem:[%s7445_s9 + $0x7c] sm:$0xf] }
 0x6b4   : > { %v2723_v5 = vadd.f32 1.0, %v6961_v42  ;;  %3171 = vmatpush.bf16.msrb.mxu2 %v5865_v49  ;;  %v5854_v42 = vld [vmem:[%s7445_s9 + $0x84] sm:$0xf0]  ;;  %v6643_v49 = vld [vmem:[%s7445_s9 + $0x28] sm:$0xf0] }
 0x6b5   : > { %6962 = vrcp.f32 %v2703_v63  ;;  %v2715_v13 = vand.u32 2147483648, %v2703_v63  ;;  %v2713_v16 = vand.u32 2147483647, %v2703_v63  ;;  %vm2709_vm1 = vweird.f32 %v2703_v63 }
 0x6b6   : > { %6964 = vrcp.f32 %v2723_v5  ;;  %vm2729_vm4 = vweird.f32 %v2723_v5  ;;  %v2735_v25 = vand.u32 2147483648, %v2723_v5  ;;  %v2733_v18 = vand.u32 2147483647, %v2723_v5 }
 0x6b7   : > { %v2697_v6 = vpop.f32.mrf.mxu2  ;;  %v2716_v50 = vor.u32 1.1754944e-38, %v2715_v13  ;;  %vm2714_vm3 = vcmp.eq.f32.partialorder %v2713_v16, 8.507059e+37  ;;  %v5848_v16 = vld [vmem:[%s7445_s9 + $0x68] sm:$0xf] }
 0x6b8   : > { %v2736_v21 = vor.u32 1.1754944e-38, %v2735_v25  ;;  %vm2734_vm7 = vcmp.eq.f32.partialorder %v2733_v18, 8.507059e+37  ;;  %3172 = vmatpush.bf16.msrb.mxu2 %v5853_v62  ;;  %v5830_v18 = vld [vmem:[%s7445_s9 + $0x54] sm:$0xf0]  ;;  %v5800_v62 = vld [vmem:[%s7445_s9 + $0x8] sm:$0xf] }
 0x6bb   : > { %v6963_v7 = vpop.eup %6962 }
 0x6bc   : > { %v6965_v8 = vpop.eup %6964  ;;  %v2705_v9 = vmul.f32 %v6963_v7, %v2703_v63  ;;  %vm2710_vm0 = vweird.f32 %v6963_v7  ;;  %v5860_v63 = vld [vmem:[%s7445_s9 + $0x80] sm:$0xf] }
 0x6bd   : > { %v2725_v10 = vmul.f32 %v6965_v8, %v2723_v5  ;;  %vm2711_vm2 = vmor %vm2709_vm1, %vm2710_vm0  ;;  %vm2730_vm5 = vweird.f32 %v6965_v8 }
 0x6be   : > { %v2706_v12 = vsub.f32 1.0, %v2705_v9  ;;  %vm2731_vm6 = vmor %vm2729_vm4, %vm2730_vm5 }
 0x6bf   : > { %v2726_v46 = vsub.f32 1.0, %v2725_v10  ;;  %v5840_v10 = vld [vmem:[%s7445_s9 + $0x60] sm:$0xf] }
 0x6c0   : > { %v2707_v15 = vmul.f32 %v6963_v7, %v2706_v12  ;;  %v6651_v12 = vld [vmem:[%s7445_s9 + $0x68] sm:$0xf0] }
 0x6c1   : > { %v2727_v45 = vmul.f32 %v6965_v8, %v2726_v46  ;;  %v6650_v46 = vld [vmem:[%s7445_s9 + $0x64] sm:$0xf]  ;;  %v5841_v13 = vor.u32 %v6651_v12, %v5840_v10 }
 0x6c2   : > { %v2708_v4 = vadd.f32 %v6963_v7, %v2707_v15  ;;  %v5842_v15 = vld [vmem:[%s7445_s9 + $0x6c] sm:$0xf0] }
 0x6c3   : > { %v2728_v14 = vadd.f32 %v6965_v8, %v2727_v45  ;;  %v6652_v45 = vld [vmem:[%s7445_s9 + $0x70] sm:$0xf0]  ;;  %3173 = vmatpush.bf16.msrb.mxu2 %v5841_v13 }
 0x6c4   : > { %v2712_v22 = vsel %vm2711_vm2, %v6963_v7, %v2708_v4  ;;  %v5857_v7 = vor.u32 %v6653_v58, %v5854_v42  ;;  %v5845_v4 = vor.u32 %v6650_v46, %v5842_v15  ;;  %v6638_v58 = vld [vmem:[%s7445_s9 + $0x4] sm:$0xf]  ;;  %v6640_v42 = vld [vmem:[%s7445_s9 + $0x10] sm:$0xf0] }
 0x6c5   : > { %v2717_v0 = vsel %vm2714_vm3, %v2716_v50, %v2712_v22  ;;  %v2732_v28 = vsel %vm2731_vm6, %v6965_v8, %v2728_v14  ;;  %v5861_v8 = vor.u32 %v6655_v3, %v5860_v63  ;;  %v5849_v50 = vor.u32 %v6652_v45, %v5848_v16  ;;  %v5828_v22 = vld [vmem:[%s7445_s9 + $0x48] sm:$0xf]  ;;  %v6647_v14 = vld [vmem:[%s7445_s9 + $0x4c] sm:$0xf] }
 0x6c6   : > { %v2739_v23 = vmul.f32 %v2717_v0, %v2696_v19  ;;  %v2737_v29 = vsel %vm2734_vm7, %v2736_v21, %v2732_v28  ;;  %v2752_v19 = vunpack.c.l.bf16 %v8095_v30  ;;  %v6648_v0 = vld [vmem:[%s7445_s9 + $0x50] sm:$0xf0]  ;;  %v6649_v28 = vld [vmem:[%s7445_s9 + $0x58] sm:$0xf0]  ;;  %v6642_v30 = vld [vmem:[%s7445_s9 + $0x20] sm:$0xf0]  ;;  %v5793_v63 = vor.u32 %v6639_v57, %v5792_v56 }
 0x6c7   : > { %v2742_v60 = vsub.f32 1.0, %v2737_v29  ;;  %v2744_v32 = vmul.f32 %v2737_v29, %v8012_v61  ;;  %v5878_v61 = vld [vmem:[%s7445_s9 + $0xb4] sm:$0xf0]  ;;  %3198 = vmatpush.bf16.msra.mxu0 %v5861_v8  ;;  %v5829_v25 = vor.u32 %v6648_v0, %v5828_v22  ;;  %v5833_v29 = vor.u32 %v6647_v14, %v5830_v18  ;;  %v6678_v56 = vld [vmem:[%s7445_s9 + $0x80] sm:$0xf0] }
 0x6c8   : > { %v2740_v26 = vadd.f32 %v2739_v23, %v2491_v20  ;;  %v5881_v40 = vor.u32 %v6659_v36, %v5878_v61  ;;  %v5824_v36 = vld [vmem:[%s7445_s9 + $0x38] sm:$0xf]  ;;  %v6677_v57 = vld [vmem:[%s7445_s9 + $0x7c] sm:$0xf] }
 0x6c9   : > { %3174 = vmatpush.bf16.msrb.mxu2 %v5829_v25  ;;  %v5825_v43 = vor.u32 %v6646_v37, %v5824_v36  ;;  %v5977_v36 = vld [vmem:[%s7445_s9 + $0xa8] sm:$0xf]  ;;  %v6684_v37 = vld [vmem:[%s7445_s9 + $0xb0] sm:$0xf0] }
 0x6ca   : > { %6966 = vtanh.f32 %v2740_v26  ;;  %3183 = vmatpush.bf16.msrb.mxu3 %v5881_v40  ;;  %v5836_v26 = vld [vmem:[%s7445_s9 + $0x50] sm:$0xf] }
 0x6cb   : > { %3199 = vmatpush.bf16.msra.mxu0 %v5849_v50 }
 0x6ce   : > { %3184 = vmatpush.bf16.msrb.mxu3 %v5869_v54  ;;  %v5805_v54 = vor.u32 %v6642_v30, %v5804_v38  ;;  %v5978_v38 = vor.u32 %v6684_v37, %v5977_v36  ;;  %v5925_v36 = vld [vmem:[%s7445_s9 + $0x38] sm:$0xf]  ;;  %v6670_v37 = vld [vmem:[%s7445_s9 + $0x40] sm:$0xf0] }
 0x6d0   : > { %v6967_v31 = vpop.eup %6966  ;;  %3425 = vmatpush.bf16.msra.mxu1 %v5978_v38  ;;  %v5905_v38 = vld [vmem:[%s7445_s9 + $0x18] sm:$0xf] }
 0x6d1   : > { %v2743_v24 = vmul.f32 %v6967_v31, %v2742_v60  ;;  %v5837_v60 = vor.u32 %v6649_v28, %v5836_v26  ;;  %v5816_v31 = vld [vmem:[%s7445_s9 + $0x30] sm:$0xf] }
 0x6d2   : > { %3185 = vmatpush.bf16.msrb.mxu3 %v5857_v7  ;;  %v5801_v7 = vor.u32 %v6640_v42, %v5800_v62  ;;  %v5961_v62 = vld [vmem:[%s7445_s9 + $0x80] sm:$0xf]  ;;  %v6679_v42 = vld [vmem:[%s7445_s9 + $0x88] sm:$0xf0] }
 0x6d3   : > { %v8083_v33 = vadd.f32 %v2744_v32, %v2743_v24  ;;  %v6645_v24 = vld [vmem:[%s7445_s9 + $0x38] sm:$0xf0]  ;;  %v6644_v32 = vld [vmem:[%s7445_s9 + $0x34] sm:$0xf]  ;;  %3200 = vmatpush.bf16.msra.mxu0 %v5837_v60 }
 0x6d4   : > { %v5817_v61 = vor.u32 %v6645_v24, %v5816_v31  ;;  %v5821_v40 = vor.u32 %v6644_v32, %v5818_v35 }
 0x6d5   : > { %v2746_v34 = vpack.c.bf16 %v8083_v33, %v8083_v33 }
 0x6d6   : > { %3186 = vmatpush.bf16.msrb.mxu3 %v5845_v4  ;;  %3175 = vmatpush.bf16.msrb.mxu2 %v5817_v61  ;;  %v5688_v4 = vld [vmem:[%s7437_s29 + $0x50] sm:$0xf]  ;;  %v6683_v61 = vld [vmem:[%s7445_s9 + $0xac] sm:$0xf] }
 0x6d7   : > { %5686 = vst [vmem:[%s7461_s27 + $0x1c] sm:$0xf] %v2746_v34  ;;  %2923 = vmatmul.bf16.vlgmr.msra.gmra.mxu3 %v2746_v34  ;;  %2936 = vmatmul.bf16.vlgmr.msrb.gmra.mxu0 %v2746_v34  ;;  %v2754_v14 = vunpack.c.l.bf16 %v5688_v4 }
 0x6d8   : > { %2949 = vmatmul.bf16.vlgmr.msrb.gmra.mxu1 %v2746_v34  ;;  %3201 = vmatpush.bf16.msra.mxu0 %v5825_v43 }
 0x6da   : > { %3187 = vmatpush.bf16.msrb.mxu3 %v5833_v29  ;;  %3176 = vmatpush.bf16.msrb.mxu2 %v5805_v54 }
 0x6de   : > { %3188 = vmatpush.bf16.msrb.mxu3 %v5821_v40  ;;  %3177 = vmatpush.bf16.msrb.mxu2 %v5793_v63  ;;  %v6685_v40 = vld [vmem:[%s7445_s9 + $0xb8] sm:$0xf0] }
 0x6e2   : > { %3189 = vmatpush.bf16.msrb.mxu3 %v5809_v55 }
 0x754   : > { %v2937_v59 = vpop.f32.mrf.mxu0 }
 0x755   : > { %v2938_v5 = vadd.f32 %v2937_v59, %v8043_v2  ;;  %v8111_v6 = vpop.f32.mrf.mxu1  ;;  %v5794_v59 = vld [vmem:[%s7445_s9 + $0xc] sm:$0xf0] }
 0x756   : > { %v2951_v22 = vadd.f32 %v8111_v6, %v8078_v11 }
 0x757   : > { %v2974_v9 = vadd.f32 %v2938_v5, %v2753_v41  ;;  %v5813_v41 = vor.u32 %v6643_v49, %v5812_v48  ;;  %v5797_v5 = vor.u32 %v6638_v58, %v5794_v59  ;;  %v6680_v48 = vld [vmem:[%s7445_s9 + $0x94] sm:$0xf]  ;;  %v5966_v49 = vor.u32 %v6681_v47, %v5965_v44  ;;  %v5955_v59 = vld [vmem:[%s7445_s9 + $0x84] sm:$0xf0]  ;;  %v6665_v44 = vld [vmem:[%s7445_s9 + $0x1c] sm:$0xf] }
 0x758   : > { %v5907_v47 = vld [vmem:[%s7445_s9 + $0x24] sm:$0xf0] }
 0x759   : > { %v5786_v17 = vmul.f32 -1.442695, %v2974_v9  ;;  %3202 = vmatpush.bf16.msra.mxu0 %v5813_v41  ;;  %3190 = vmatpush.bf16.msrb.mxu3 %v5797_v5  ;;  %v5953_v41 = vld [vmem:[%s7445_s9 + $0x78] sm:$0xf]  ;;  %v5962_v5 = vor.u32 %v6679_v42, %v5961_v62  ;;  %v6664_v62 = vld [vmem:[%s7445_s9 + $0x10] sm:$0xf0] }
 0x75a   : > { %v2924_v20 = vpop.f32.mrf.mxu3  ;;  %3426 = vmatpush.bf16.msra.mxu1 %v5966_v49  ;;  %v5954_v58 = vor.u32 %v6678_v56, %v5953_v41  ;;  %v6667_v49 = vld [vmem:[%s7445_s9 + $0x28] sm:$0xf0]  ;;  %v5893_v41 = vld [vmem:[%s7445_s9] sm:$0xf] }
 0x75b   : > { %6968 = vpow2.f32 %v5786_v17  ;;  %v2925_v23 = vadd.f32 %v2924_v20, %v8040_v1  ;;  %v6663_v56 = vld [vmem:[%s7445_s9 + $0x8] sm:$0xf0] }
 0x75c   : > { %v2939_v21 = vpop.f32.mrf.mxu0  ;;  %v5894_v42 = vor.u32 %v6663_v56, %v5893_v41  ;;  %v6054_v56 = vld [vmem:[%s7445_s9 + $0x78] sm:$0xf] }
 0x75d   : > { %v2954_v34 = vadd.f32 %v2925_v23, %v2752_v19  ;;  %v2952_v27 = vpop.f32.mrf.mxu1  ;;  %3203 = vmatpush.bf16.msra.mxu0 %v5801_v7  ;;  %v5788_v7 = vld [vmem:[%s7437_s29 + $0x3c] sm:$0xff] }
 0x75e   : > { %3427 = vmatpush.bf16.msra.mxu1 %v5954_v58  ;;  %v5895_v58 = vld [vmem:[%s7445_s9 + $0xc] sm:$0xf0] }
 0x75f   : > { %v5785_v39 = vmul.f32 -1.442695, %v2954_v34 }
 0x761   : > { %v6969_v51 = vpop.eup %6968  ;;  %6970 = vpow2.f32 %v5785_v39  ;;  %v5985_v39 = vld [vmem:[%s7445_s9 + $0xb0] sm:$0xf] }
 0x762   : > { %v2978_v52 = vadd.f32 1.0, %v6969_v51  ;;  %v2926_v53 = vpop.f32.mrf.mxu3  ;;  %v5986_v30 = vor.u32 %v6685_v40, %v5985_v39  ;;  %v5967_v51 = vld [vmem:[%s7445_s9 + $0x9c] sm:$0xf0] }
 0x763   : > { %v6682_v53 = vld [vmem:[%s7445_s9 + $0xa0] sm:$0xf0]  ;;  %v5970_v54 = vor.u32 %v6680_v48, %v5967_v51  ;;  %v5913_v48 = vld [vmem:[%s7445_s9 + $0x20] sm:$0xf] }
 0x764   : > { %6972 = vrcp.f32 %v2978_v52  ;;  %v2990_v18 = vand.u32 2147483648, %v2978_v52  ;;  %vm2984_vm13 = vweird.f32 %v2978_v52  ;;  %v2988_v28 = vand.u32 2147483647, %v2978_v52  ;;  %3451 = vmatpush.bf16.msra.mxu3 %v5986_v30 }
 0x765   : > { %v5926_v30 = vor.u32 %v6670_v37, %v5925_v36 }
 0x766   : > { %v2991_v60 = vor.u32 1.1754944e-38, %v2990_v18  ;;  %vm2989_vm15 = vcmp.eq.f32.partialorder %v2988_v28, 8.507059e+37  ;;  %v5931_v18 = vld [vmem:[%s7445_s9 + $0x54] sm:$0xf0]  ;;  %v6673_v28 = vld [vmem:[%s7445_s9 + $0x58] sm:$0xf0] }
 0x767   : > { %v6971_v3 = vpop.eup %6970 }
 0x768   : > { %v2958_v8 = vadd.f32 1.0, %v6971_v3  ;;  %v5958_v3 = vor.u32 %v6677_v57, %v5955_v59  ;;  %v6662_v57 = vld [vmem:[%s7445_s9 + $0x4] sm:$0xf]  ;;  %v5901_v59 = vld [vmem:[%s7445_s9 + $0x8] sm:$0xf] }
 0x76a   : > { %6974 = vrcp.f32 %v2958_v8  ;;  %v6973_v9 = vpop.eup %6972  ;;  %v2970_v16 = vand.u32 2147483648, %v2958_v8  ;;  %v2968_v17 = vand.u32 2147483647, %v2958_v8  ;;  %vm2964_vm9 = vweird.f32 %v2958_v8 }
 0x76b   : > { %v2980_v10 = vmul.f32 %v6973_v9, %v2978_v52  ;;  %vm2985_vm12 = vweird.f32 %v6973_v9  ;;  %v5973_v52 = vld [vmem:[%s7445_s9 + $0x98] sm:$0xf] }
 0x76c   : > { %v2971_v20 = vor.u32 1.1754944e-38, %v2970_v16  ;;  %vm2969_vm11 = vcmp.eq.f32.partialorder %v2968_v17, 8.507059e+37  ;;  %vm2986_vm14 = vmor %vm2984_vm13, %vm2985_vm12  ;;  %v5974_v55 = vor.u32 %v6682_v53, %v5973_v52  ;;  %v3007_v16 = vunpack.c.l.bf16 %v5788_v7 }
 0x76d   : > { %v2981_v13 = vsub.f32 1.0, %v2980_v10  ;;  %v6674_v10 = vld [vmem:[%s7445_s9 + $0x64] sm:$0xf] }
 0x76e   : > { %3452 = vmatpush.bf16.msra.mxu3 %v5974_v55  ;;  %v5914_v55 = vor.u32 %v6667_v49, %v5913_v48  ;;  %v6705_v48 = vld [vmem:[%s7445_s9 + $0x98] sm:$0xf0]  ;;  %v6704_v49 = vld [vmem:[%s7445_s9 + $0x94] sm:$0xf] }
 0x76f   : > { %v2982_v19 = vmul.f32 %v6973_v9, %v2981_v13  ;;  %v5949_v13 = vld [vmem:[%s7445_s9 + $0x68] sm:$0xf] }
 0x770   : > { %v6975_v12 = vpop.eup %6974 }
 0x771   : > { %v2960_v46 = vmul.f32 %v6975_v12, %v2958_v8  ;;  %vm2965_vm8 = vweird.f32 %v6975_v12  ;;  %v2983_v25 = vadd.f32 %v6973_v9, %v2982_v19  ;;  %v5941_v8 = vld [vmem:[%s7445_s9 + $0x60] sm:$0xf] }
 0x772   : > { %vm2966_vm10 = vmor %vm2964_vm9, %vm2965_vm8  ;;  %3453 = vmatpush.bf16.msra.mxu3 %v5962_v5  ;;  %v5898_v5 = vor.u32 %v6662_v57, %v5895_v58  ;;  %v6702_v57 = vld [vmem:[%s7445_s9 + $0x80] sm:$0xf0]  ;;  %v6701_v58 = vld [vmem:[%s7445_s9 + $0x7c] sm:$0xf] }
 0x773   : > { %v2961_v15 = vsub.f32 1.0, %v2960_v46  ;;  %v2987_v29 = vsel %vm2986_vm14, %v6973_v9, %v2983_v25  ;;  %v6675_v9 = vld [vmem:[%s7445_s9 + $0x68] sm:$0xf0]  ;;  %v5943_v46 = vld [vmem:[%s7445_s9 + $0x6c] sm:$0xf0] }
 0x774   : > { %v2992_v6 = vsel %vm2989_vm15, %v2991_v60, %v2987_v29  ;;  %v5946_v17 = vor.u32 %v6674_v10, %v5943_v46  ;;  %v5917_v60 = vld [vmem:[%s7445_s9 + $0x30] sm:$0xf] }
 0x775   : > { %v2962_v45 = vmul.f32 %v6975_v12, %v2961_v15  ;;  %v2997_v31 = vsub.f32 1.0, %v2992_v6  ;;  %v2999_v34 = vmul.f32 %v2992_v6, %v8083_v33  ;;  %v5979_v33 = vld [vmem:[%s7445_s9 + $0xb4] sm:$0xf0]  ;;  %v6676_v15 = vld [vmem:[%s7445_s9 + $0x70] sm:$0xf0] }
 0x776   : > { %v5982_v43 = vor.u32 %v6683_v61, %v5979_v33  ;;  %v5950_v19 = vor.u32 %v6676_v15, %v5949_v13  ;;  %v6669_v6 = vld [vmem:[%s7445_s9 + $0x38] sm:$0xf0]  ;;  %v6666_v33 = vld [vmem:[%s7445_s9 + $0x20] sm:$0xf0] }
 0x777   : > { %v2963_v50 = vadd.f32 %v6975_v12, %v2962_v45  ;;  %v3008_v45 = vunpack.c.h.bf16 %v5788_v7  ;;  %v5918_v61 = vor.u32 %v6669_v6, %v5917_v60  ;;  %v5906_v53 = vor.u32 %v6666_v33, %v5905_v38  ;;  %v6708_v38 = vld [vmem:[%s7445_s9 + $0xb0] sm:$0xf0]  ;;  %v6707_v33 = vld [vmem:[%s7445_s9 + $0xac] sm:$0xf] }
 0x778   : > { %3438 = vmatpush.bf16.msra.mxu2 %v5982_v43  ;;  %3454 = vmatpush.bf16.msra.mxu3 %v5950_v19  ;;  %v5902_v7 = vor.u32 %v6664_v62, %v5901_v59  ;;  %v6055_v59 = vor.u32 %v6702_v57, %v6054_v56  ;;  %v6056_v62 = vld [vmem:[%s7445_s9 + $0x84] sm:$0xf0]  ;;  %v5996_v56 = vld [vmem:[%s7445_s9 + $0xc] sm:$0xf0] }
 0x779   : > { %v2967_v0 = vsel %vm2966_vm10, %v6975_v12, %v2963_v50  ;;  %v5942_v12 = vor.u32 %v6675_v9, %v5941_v8 }
 0x77a   : > { %v2972_v23 = vsel %vm2969_vm11, %v2971_v20, %v2967_v0  ;;  %v5929_v20 = vld [vmem:[%s7445_s9 + $0x48] sm:$0xf]  ;;  %v6671_v0 = vld [vmem:[%s7445_s9 + $0x4c] sm:$0xf] }
 0x77b   : > { %v2994_v26 = vmul.f32 %v2972_v23, %v2951_v22  ;;  %3428 = vmatpush.bf16.msra.mxu1 %v5942_v12  ;;  %v6672_v22 = vld [vmem:[%s7445_s9 + $0x50] sm:$0xf0] }
 0x77c   : > { %3439 = vmatpush.bf16.msra.mxu2 %v5970_v54  ;;  %v5930_v25 = vor.u32 %v6672_v22, %v5929_v20  ;;  %v5910_v54 = vor.u32 %v6665_v44, %v5907_v47  ;;  %v5789_v20 = vld [vmem:[%s7437_s29 + $0x44] sm:$0xf]  ;;  %v6066_v47 = vld [vmem:[%s7445_s9 + $0x90] sm:$0xf] }
 0x77d   : > { %v2995_v21 = vadd.f32 %v2994_v26, %v2754_v14  ;;  %v5937_v26 = vld [vmem:[%s7445_s9 + $0x50] sm:$0xf] }
 0x77e   : > { %v5938_v29 = vor.u32 %v6673_v28, %v5937_v26 }
 0x77f   : > { %6976 = vtanh.f32 %v2995_v21  ;;  %v5934_v21 = vor.u32 %v6671_v0, %v5931_v18  ;;  %3429 = vmatpush.bf16.msra.mxu1 %v5930_v25  ;;  %v3009_v25 = vunpack.c.l.bf16 %v5789_v20  ;;  %v6030_v20 = vld [vmem:[%s7445_s9 + $0x48] sm:$0xf] }
 0x780   : > { %3440 = vmatpush.bf16.msra.mxu2 %v5958_v3  ;;  %3455 = vmatpush.bf16.msra.mxu3 %v5938_v29 }
 0x783   : > { %3430 = vmatpush.bf16.msra.mxu1 %v5918_v61  ;;  %v6078_v61 = vld [vmem:[%s7445_s9 + $0xa8] sm:$0xf] }
 0x784   : > { %3441 = vmatpush.bf16.msra.mxu2 %v5946_v17  ;;  %3456 = vmatpush.bf16.msra.mxu3 %v5926_v30 }
 0x785   : > { %v6977_v24 = vpop.eup %6976 }
 0x786   : > { %v2998_v32 = vmul.f32 %v6977_v24, %v2997_v31  ;;  %v6668_v31 = vld [vmem:[%s7445_s9 + $0x34] sm:$0xf] }
 0x787   : > { %3431 = vmatpush.bf16.msra.mxu1 %v5906_v53  ;;  %v6074_v53 = vld [vmem:[%s7445_s9 + $0x98] sm:$0xf] }
 0x788   : > { %v8149_v27 = vadd.f32 %v2999_v34, %v2998_v32  ;;  %3442 = vmatpush.bf16.msra.mxu2 %v5934_v21  ;;  %3457 = vmatpush.bf16.msra.mxu3 %v5914_v55 }
 0x78a   : > { %v3001_v35 = vpack.c.bf16 %v8149_v27, %v8149_v27 }
 0x78b   : > { %3432 = vmatpush.bf16.msra.mxu1 %v5894_v42  ;;  %v6062_v42 = vld [vmem:[%s7445_s9 + $0x80] sm:$0xf] }
 0x78c   : > { %5787 = vst [vmem:[%s7461_s27 + $0x18] sm:$0xf] %v3001_v35  ;;  %3178 = vmatmul.bf16.vlgmr.msrb.gmra.mxu2 %v3001_v35  ;;  %3191 = vmatmul.bf16.vlgmr.msrb.gmra.mxu3 %v3001_v35 }
 0x78d   : > { %3204 = vmatmul.bf16.vlgmr.msra.gmra.mxu0 %v3001_v35  ;;  %v5919_v35 = vld [vmem:[%s7445_s9 + $0x3c] sm:$0xf0]  ;;  %3458 = vmatpush.bf16.msra.mxu3 %v5902_v7 }
 0x78e   : > { %v5922_v43 = vor.u32 %v6668_v31, %v5919_v35 }
 0x790   : > { %3443 = vmatpush.bf16.msra.mxu2 %v5922_v43  ;;  %v6709_v43 = vld [vmem:[%s7445_s9 + $0xb8] sm:$0xf0] }
 0x794   : > { %3444 = vmatpush.bf16.msra.mxu2 %v5910_v54  ;;  %v6706_v54 = vld [vmem:[%s7445_s9 + $0xa0] sm:$0xf0] }
 0x795   : > { %v6075_v41 = vor.u32 %v6706_v54, %v6074_v53  ;;  %v5994_v53 = vld [vmem:[%s7445_s9] sm:$0xf]  ;;  %v6687_v54 = vld [vmem:[%s7445_s9 + $0x8] sm:$0xf0] }
 0x798   : > { %3445 = vmatpush.bf16.msra.mxu2 %v5898_v5  ;;  %v6059_v5 = vor.u32 %v6701_v58, %v6056_v62  ;;  %v6002_v58 = vld [vmem:[%s7445_s9 + $0x8] sm:$0xf]  ;;  %v5995_v62 = vor.u32 %v6687_v54, %v5994_v53  ;;  %v6169_v53 = vld [vmem:[%s7445_s9 + $0x9c] sm:$0xf0]  ;;  %v6175_v54 = vld [vmem:[%s7445_s9 + $0x98] sm:$0xf] }
 0x80a   : > { %v8172_v63 = vpop.f32.mrf.mxu0 }
 0x80f   : > { %v3179_v4 = vpop.f32.mrf.mxu2  ;;  %v3192_v50 = vpop.f32.mrf.mxu3 }
 0x810   : > { %v3180_v14 = vadd.f32 %v3179_v4, %v8040_v1  ;;  %v3193_v23 = vadd.f32 %v3192_v50, %v8043_v2 }
 0x812   : > { %v3209_v24 = vadd.f32 %v3180_v14, %v3007_v16  ;;  %v3229_v32 = vadd.f32 %v3193_v23, %v3008_v45  ;;  %v3207_v34 = vpop.f32.mrf.mxu0  ;;  %v3206_v14 = vadd.f32 %v8172_v63, %v8078_v11 }
 0x814   : > { %v5886_v39 = vmul.f32 -1.442695, %v3209_v24  ;;  %v5887_v40 = vmul.f32 -1.442695, %v3229_v32 }
 0x816   : > { %6978 = vpow2.f32 %v5886_v39  ;;  %v6079_v39 = vor.u32 %v6708_v38, %v6078_v61 }
 0x817   : > { %6980 = vpow2.f32 %v5887_v40  ;;  %v3181_v51 = vpop.f32.mrf.mxu2  ;;  %v3194_v52 = vpop.f32.mrf.mxu3  ;;  %v6086_v40 = vld [vmem:[%s7445_s9 + $0xb0] sm:$0xf] }
 0x818   : > { %v6087_v44 = vor.u32 %v6709_v43, %v6086_v40  ;;  %3680 = vmatpush.bf16.msrb.mxu0 %v6079_v39  ;;  %v6067_v51 = vor.u32 %v6705_v48, %v6066_v47  ;;  %v6068_v52 = vld [vmem:[%s7445_s9 + $0x9c] sm:$0xf0]  ;;  %v6006_v39 = vld [vmem:[%s7445_s9 + $0x18] sm:$0xf]  ;;  %v6008_v47 = vld [vmem:[%s7445_s9 + $0x24] sm:$0xf0] }
 0x819   : > { %v6071_v55 = vor.u32 %v6704_v49, %v6068_v52  ;;  %v6014_v48 = vld [vmem:[%s7445_s9 + $0x20] sm:$0xf]  ;;  %v6691_v52 = vld [vmem:[%s7445_s9 + $0x28] sm:$0xf0] }
 0x81a   : > { %3706 = vmatpush.bf16.msrb.mxu2 %v6087_v44  ;;  %v6689_v44 = vld [vmem:[%s7445_s9 + $0x1c] sm:$0xf] }
 0x81c   : > { %v6979_v3 = vpop.eup %6978  ;;  %3681 = vmatpush.bf16.msrb.mxu0 %v6067_v51  ;;  %v6011_v51 = vor.u32 %v6689_v44, %v6008_v47 }
 0x81d   : > { %v6981_v8 = vpop.eup %6980  ;;  %v3213_v9 = vadd.f32 1.0, %v6979_v3  ;;  %v6703_v3 = vld [vmem:[%s7445_s9 + $0x88] sm:$0xf0] }
 0x81e   : > { %v3233_v10 = vadd.f32 1.0, %v6981_v8  ;;  %3707 = vmatpush.bf16.msrb.mxu2 %v6075_v41  ;;  %v6063_v7 = vor.u32 %v6703_v3, %v6062_v42  ;;  %v5889_v8 = vld [vmem:[%s7437_s29 + $0x30] sm:$0xff]  ;;  %v6686_v41 = vld [vmem:[%s7445_s9 + $0x4] sm:$0xf] }
 0x81f   : > { %6982 = vrcp.f32 %v3213_v9  ;;  %v3225_v45 = vand.u32 2147483648, %v3213_v9  ;;  %v3223_v4 = vand.u32 2147483647, %v3213_v9  ;;  %vm3219_vm1 = vweird.f32 %v3213_v9 }
 0x820   : > { %6984 = vrcp.f32 %v3233_v10  ;;  %v3245_v28 = vand.u32 2147483648, %v3233_v10  ;;  %vm3239_vm5 = vweird.f32 %v3233_v10  ;;  %v3243_v29 = vand.u32 2147483647, %v3233_v10  ;;  %3682 = vmatpush.bf16.msrb.mxu0 %v6055_v59  ;;  %v6688_v59 = vld [vmem:[%s7445_s9 + $0x10] sm:$0xf0] }
 0x821   : > { %v3226_v0 = vor.u32 1.1754944e-38, %v3225_v45  ;;  %vm3224_vm3 = vcmp.eq.f32.partialorder %v3223_v4, 8.507059e+37  ;;  %v3262_v45 = vunpack.c.l.bf16 %v5889_v8  ;;  %v5999_v3 = vor.u32 %v6686_v41, %v5996_v56 }
 0x822   : > { %v3246_v31 = vor.u32 1.1754944e-38, %v3245_v28  ;;  %vm3244_vm7 = vcmp.eq.f32.partialorder %v3243_v29, 8.507059e+37  ;;  %3708 = vmatpush.bf16.msrb.mxu2 %v6063_v7  ;;  %v6697_v28 = vld [vmem:[%s7445_s9 + $0x58] sm:$0xf0] }
 0x825   : > { %v6983_v12 = vpop.eup %6982 }
 0x826   : > { %v6985_v46 = vpop.eup %6984  ;;  %v3215_v13 = vmul.f32 %v6983_v12, %v3213_v9  ;;  %vm3220_vm0 = vweird.f32 %v6983_v12  ;;  %v6042_v9 = vld [vmem:[%s7445_s9 + $0x60] sm:$0xf] }
 0x827   : > { %v3235_v15 = vmul.f32 %v6985_v46, %v3233_v10  ;;  %vm3221_vm2 = vmor %vm3219_vm1, %vm3220_vm0  ;;  %vm3240_vm4 = vweird.f32 %v6985_v46  ;;  %v6699_v10 = vld [vmem:[%s7445_s9 + $0x68] sm:$0xf0] }
 0x828   : > { %v3216_v16 = vsub.f32 1.0, %v3215_v13  ;;  %vm3241_vm6 = vmor %vm3239_vm5, %vm3240_vm4  ;;  %v6044_v13 = vld [vmem:[%s7445_s9 + $0x6c] sm:$0xf0] }
 0x829   : > { %v3236_v17 = vsub.f32 1.0, %v3235_v15  ;;  %v6050_v15 = vld [vmem:[%s7445_s9 + $0x68] sm:$0xf] }
 0x82a   : > { %v3217_v19 = vmul.f32 %v6983_v12, %v3216_v16  ;;  %v6700_v16 = vld [vmem:[%s7445_s9 + $0x70] sm:$0xf0] }
 0x82b   : > { %v3237_v50 = vmul.f32 %v6985_v46, %v3236_v17 }
 0x82c   : > { %v3218_v22 = vadd.f32 %v6983_v12, %v3217_v19  ;;  %v6051_v19 = vor.u32 %v6700_v16, %v6050_v15 }
 0x82d   : > { %v3238_v26 = vadd.f32 %v6985_v46, %v3237_v50 }
 0x82e   : > { %v3222_v23 = vsel %vm3221_vm2, %v6983_v12, %v3218_v22  ;;  %v6698_v12 = vld [vmem:[%s7445_s9 + $0x64] sm:$0xf]  ;;  %3709 = vmatpush.bf16.msrb.mxu2 %v6051_v19  ;;  %v6696_v22 = vld [vmem:[%s7445_s9 + $0x50] sm:$0xf0] }
 0x82f   : > { %v3227_v18 = vsel %vm3224_vm3, %v3226_v0, %v3222_v23  ;;  %v3242_v6 = vsel %vm3241_vm6, %v6985_v46, %v3238_v26  ;;  %v6043_v46 = vor.u32 %v6699_v10, %v6042_v9  ;;  %v6047_v17 = vor.u32 %v6698_v12, %v6044_v13  ;;  %v6032_v23 = vld [vmem:[%s7445_s9 + $0x54] sm:$0xf0] }
 0x830   : > { %v3249_v21 = vmul.f32 %v3227_v18, %v3206_v14  ;;  %v3247_v63 = vsel %vm3244_vm7, %v3246_v31, %v3242_v6  ;;  %v6031_v0 = vor.u32 %v6696_v22, %v6030_v20  ;;  %v6695_v14 = vld [vmem:[%s7445_s9 + $0x4c] sm:$0xf]  ;;  %v6018_v6 = vld [vmem:[%s7445_s9 + $0x30] sm:$0xf]  ;;  %v6693_v31 = vld [vmem:[%s7445_s9 + $0x38] sm:$0xf0] }
 0x831   : > { %v3252_v24 = vsub.f32 1.0, %v3247_v63  ;;  %v3254_v35 = vmul.f32 %v3247_v63, %v8149_v27  ;;  %v6080_v27 = vld [vmem:[%s7445_s9 + $0xb4] sm:$0xf0]  ;;  %3683 = vmatpush.bf16.msrb.mxu0 %v6043_v46  ;;  %v6035_v26 = vor.u32 %v6695_v14, %v6032_v23 }
 0x832   : > { %v3250_v60 = vadd.f32 %v3249_v21, %v3009_v25  ;;  %v6083_v30 = vor.u32 %v6707_v33, %v6080_v27  ;;  %v6038_v25 = vld [vmem:[%s7445_s9 + $0x50] sm:$0xf]  ;;  %v6694_v33 = vld [vmem:[%s7445_s9 + $0x40] sm:$0xf0] }
 0x833   : > { %v6039_v21 = vor.u32 %v6697_v28, %v6038_v25  ;;  %v6690_v27 = vld [vmem:[%s7445_s9 + $0x20] sm:$0xf0] }
 0x834   : > { %6986 = vtanh.f32 %v3250_v60  ;;  %3693 = vmatpush.bf16.msrb.mxu1 %v6083_v30  ;;  %v3263_v60 = vunpack.c.h.bf16 %v5889_v8  ;;  %v6007_v30 = vor.u32 %v6690_v27, %v6006_v39  ;;  %v6003_v8 = vor.u32 %v6688_v59, %v6002_v58  ;;  %v6732_v39 = vld [vmem:[%s7445_s9 + $0xb0] sm:$0xf0]  ;;  %v6731_v27 = vld [vmem:[%s7445_s9 + $0xac] sm:$0xf]  ;;  %v6726_v58 = vld [vmem:[%s7445_s9 + $0x80] sm:$0xf0] }
 0x835   : > { %3684 = vmatpush.bf16.msrb.mxu0 %v6031_v0  ;;  %3710 = vmatpush.bf16.msrb.mxu2 %v6039_v21  ;;  %v6725_v59 = vld [vmem:[%s7445_s9 + $0x7c] sm:$0xf] }
 0x838   : > { %3694 = vmatpush.bf16.msrb.mxu1 %v6071_v55  ;;  %v6015_v55 = vor.u32 %v6691_v52, %v6014_v48  ;;  %v6167_v48 = vld [vmem:[%s7445_s9 + $0x90] sm:$0xf] }
 0x83a   : > { %v6987_v32 = vpop.eup %6986 }
 0x83b   : > { %v3253_v34 = vmul.f32 %v6987_v32, %v3252_v24  ;;  %v6019_v24 = vor.u32 %v6693_v31, %v6018_v6  ;;  %v6692_v32 = vld [vmem:[%s7445_s9 + $0x34] sm:$0xf] }
 0x83c   : > { %3695 = vmatpush.bf16.msrb.mxu1 %v6059_v5 }
 0x83d   : > { %v8211_v36 = vadd.f32 %v3254_v35, %v3253_v34  ;;  %v6020_v34 = vld [vmem:[%s7445_s9 + $0x3c] sm:$0xf0]  ;;  %v6026_v35 = vld [vmem:[%s7445_s9 + $0x38] sm:$0xf]  ;;  %3685 = vmatpush.bf16.msrb.mxu0 %v6019_v24 }
 0x83e   : > { %v6023_v38 = vor.u32 %v6692_v32, %v6020_v34  ;;  %v6027_v43 = vor.u32 %v6694_v33, %v6026_v35  ;;  %v6179_v33 = vld [vmem:[%s7445_s9 + $0xa8] sm:$0xf] }
 0x83f   : > { %v3256_v37 = vpack.c.bf16 %v8211_v36, %v8211_v36 }
 0x840   : > { %3696 = vmatpush.bf16.msrb.mxu1 %v6047_v17  ;;  %3711 = vmatpush.bf16.msrb.mxu2 %v6027_v43  ;;  %v6187_v43 = vld [vmem:[%s7445_s9 + $0xb0] sm:$0xf] }
 0x841   : > { %5888 = vst [vmem:[%s7461_s27 + $0x14] sm:$0xf] %v3256_v37  ;;  %3433 = vmatmul.bf16.vlgmr.msra.gmra.mxu1 %v3256_v37  ;;  %3446 = vmatmul.bf16.vlgmr.msra.gmra.mxu2 %v3256_v37 }
 0x842   : > { %3459 = vmatmul.bf16.vlgmr.msra.gmra.mxu3 %v3256_v37  ;;  %3686 = vmatpush.bf16.msrb.mxu0 %v6007_v30  ;;  %v6733_v30 = vld [vmem:[%s7445_s9 + $0xb8] sm:$0xf0] }
 0x843   : > { %v6188_v47 = vor.u32 %v6733_v30, %v6187_v43  ;;  %v6107_v43 = vld [vmem:[%s7445_s9 + $0x18] sm:$0xf] }
 0x844   : > { %3697 = vmatpush.bf16.msrb.mxu1 %v6035_v26  ;;  %3712 = vmatpush.bf16.msrb.mxu2 %v6015_v55  ;;  %v6730_v55 = vld [vmem:[%s7445_s9 + $0xa0] sm:$0xf0] }
 0x845   : > { %v6176_v56 = vor.u32 %v6730_v55, %v6175_v54  ;;  %v6115_v54 = vld [vmem:[%s7445_s9 + $0x20] sm:$0xf]  ;;  %v6715_v55 = vld [vmem:[%s7445_s9 + $0x28] sm:$0xf0] }
 0x846   : > { %3687 = vmatpush.bf16.msrb.mxu0 %v5995_v62 }
 0x848   : > { %3698 = vmatpush.bf16.msrb.mxu1 %v6023_v38  ;;  %3713 = vmatpush.bf16.msrb.mxu2 %v6003_v8 }
 0x84c   : > { %3699 = vmatpush.bf16.msrb.mxu1 %v6011_v51  ;;  %v6728_v51 = vld [vmem:[%s7445_s9 + $0x94] sm:$0xf] }
 0x84d   : > { %v6172_v41 = vor.u32 %v6728_v51, %v6169_v53  ;;  %v6109_v51 = vld [vmem:[%s7445_s9 + $0x24] sm:$0xf0] }
 0x850   : > { %3700 = vmatpush.bf16.msrb.mxu1 %v5999_v3  ;;  %v6163_v3 = vld [vmem:[%s7445_s9 + $0x80] sm:$0xf] }
 0x854   : > { %3961 = vmatpush.bf16.msra.mxu1 %v6188_v47 }
 0x858   : > { %3962 = vmatpush.bf16.msra.mxu1 %v6176_v56  ;;  %v6116_v56 = vor.u32 %v6715_v55, %v6115_v54  ;;  %v6270_v55 = vld [vmem:[%s7445_s9 + $0x9c] sm:$0xf0] }
 0x8be   : > { %v3434_v4 = vpop.f32.mrf.mxu1 }
 0x8bf   : > { %v3435_v50 = vadd.f32 %v3434_v4, %v8040_v1 }
 0x8c1   : > { %v3464_v18 = vadd.f32 %v3435_v50, %v3262_v45  ;;  %v5890_v45 = vld [vmem:[%s7437_s29 + $0x38] sm:$0xf] }
 0x8c2   : > { %v3264_v22 = vunpack.c.l.bf16 %v5890_v45  ;;  %v6724_v45 = vld [vmem:[%s7445_s9 + $0x70] sm:$0xf0] }
 0x8c3   : > { %v5987_v29 = vmul.f32 -1.442695, %v3464_v18 }
 0x8c4   : > { %v3447_v63 = vpop.f32.mrf.mxu2 }
 0x8c5   : > { %6988 = vpow2.f32 %v5987_v29  ;;  %v3448_v37 = vadd.f32 %v3447_v63, %v8043_v2  ;;  %v3460_v61 = vpop.f32.mrf.mxu3 }
 0x8c6   : > { %v3436_v40 = vpop.f32.mrf.mxu1  ;;  %v3461_v23 = vadd.f32 %v3460_v61, %v8078_v11 }
 0x8c7   : > { %v3484_v49 = vadd.f32 %v3448_v37, %v3263_v60  ;;  %v6180_v40 = vor.u32 %v6732_v39, %v6179_v33 }
 0x8c9   : > { %v5988_v57 = vmul.f32 -1.442695, %v3484_v49  ;;  %3935 = vmatpush.bf16.msrb.mxu3 %v6180_v40  ;;  %v6729_v49 = vld [vmem:[%s7445_s9 + $0x98] sm:$0xf0]  ;;  %v6127_v40 = vld [vmem:[%s7445_s9 + $0x38] sm:$0xf] }
 0x8ca   : > { %v6168_v52 = vor.u32 %v6729_v49, %v6167_v48  ;;  %v6714_v48 = vld [vmem:[%s7445_s9 + $0x20] sm:$0xf0]  ;;  %v6713_v49 = vld [vmem:[%s7445_s9 + $0x1c] sm:$0xf] }
 0x8cb   : > { %v6989_v42 = vpop.eup %6988  ;;  %6990 = vpow2.f32 %v5988_v57  ;;  %v6155_v57 = vld [vmem:[%s7445_s9 + $0x78] sm:$0xf]  ;;  %v6112_v53 = vor.u32 %v6713_v49, %v6109_v51  ;;  %v6268_v51 = vld [vmem:[%s7445_s9 + $0x90] sm:$0xf] }
 0x8cc   : > { %v3468_v5 = vadd.f32 1.0, %v6989_v42  ;;  %v3449_v7 = vpop.f32.mrf.mxu2  ;;  %v6156_v62 = vor.u32 %v6726_v58, %v6155_v57  ;;  %v6157_v42 = vld [vmem:[%s7445_s9 + $0x84] sm:$0xf0]  ;;  %v6711_v57 = vld [vmem:[%s7445_s9 + $0x8] sm:$0xf0]  ;;  %v8341_v49 = vld [vmem:[%s7437_s29 + $0x18] sm:$0xff] }
 0x8cd   : > { %v3462_v9 = vpop.f32.mrf.mxu3  ;;  %3936 = vmatpush.bf16.msrb.mxu3 %v6168_v52  ;;  %v6160_v7 = vor.u32 %v6725_v59, %v6157_v42  ;;  %v6108_v52 = vor.u32 %v6714_v48, %v6107_v43  ;;  %v6710_v58 = vld [vmem:[%s7445_s9 + $0x4] sm:$0xf]  ;;  %v6097_v59 = vld [vmem:[%s7445_s9 + $0xc] sm:$0xf0]  ;;  %v6712_v42 = vld [vmem:[%s7445_s9 + $0x10] sm:$0xf0] }
 0x8ce   : > { %6992 = vrcp.f32 %v3468_v5  ;;  %v3480_v16 = vand.u32 2147483648, %v3468_v5  ;;  %v3478_v19 = vand.u32 2147483647, %v3468_v5  ;;  %vm3474_vm9 = vweird.f32 %v3468_v5  ;;  %v5990_v9 = vld [vmem:[%s7437_s29 + $0x24] sm:$0xff] }
 0x8d0   : > { %v3481_v0 = vor.u32 1.1754944e-38, %v3480_v16  ;;  %vm3479_vm11 = vcmp.eq.f32.partialorder %v3478_v19, 8.507059e+37  ;;  %v6151_v16 = vld [vmem:[%s7445_s9 + $0x68] sm:$0xf]  ;;  %v3518_v19 = vunpack.c.h.bf16 %v5990_v9 }
 0x8d1   : > { %v6991_v10 = vpop.eup %6990  ;;  %3937 = vmatpush.bf16.msrb.mxu3 %v6156_v62  ;;  %v6103_v62 = vld [vmem:[%s7445_s9 + $0x8] sm:$0xf] }
 0x8d2   : > { %v3488_v12 = vadd.f32 1.0, %v6991_v10  ;;  %v6143_v10 = vld [vmem:[%s7445_s9 + $0x60] sm:$0xf] }
 0x8d4   : > { %v6993_v46 = vpop.eup %6992  ;;  %6994 = vrcp.f32 %v3488_v12  ;;  %v3500_v21 = vand.u32 2147483648, %v3488_v12  ;;  %v3498_v29 = vand.u32 2147483647, %v3488_v12  ;;  %vm3494_vm13 = vweird.f32 %v3488_v12 }
 0x8d5   : > { %v3470_v13 = vmul.f32 %v6993_v46, %v3468_v5  ;;  %vm3475_vm8 = vweird.f32 %v6993_v46  ;;  %v6727_v5 = vld [vmem:[%s7445_s9 + $0x88] sm:$0xf0] }
 0x8d6   : > { %vm3476_vm10 = vmor %vm3474_vm9, %vm3475_vm8  ;;  %v3501_v63 = vor.u32 1.1754944e-38, %v3500_v21  ;;  %vm3499_vm15 = vcmp.eq.f32.partialorder %v3498_v29, 8.507059e+37  ;;  %v6164_v8 = vor.u32 %v6727_v5, %v6163_v3  ;;  %v6139_v21 = vld [vmem:[%s7445_s9 + $0x50] sm:$0xf]  ;;  %v6721_v29 = vld [vmem:[%s7445_s9 + $0x58] sm:$0xf0] }
 0x8d7   : > { %v3471_v15 = vsub.f32 1.0, %v3470_v13 }
 0x8d8   : > { %3963 = vmatpush.bf16.msra.mxu1 %v6164_v8 }
 0x8d9   : > { %v3472_v17 = vmul.f32 %v6993_v46, %v3471_v15  ;;  %v6145_v15 = vld [vmem:[%s7445_s9 + $0x6c] sm:$0xf0] }
 0x8da   : > { %v6995_v4 = vpop.eup %6994 }
 0x8db   : > { %v3490_v50 = vmul.f32 %v6995_v4, %v3488_v12  ;;  %v3473_v20 = vadd.f32 %v6993_v46, %v3472_v17  ;;  %vm3495_vm12 = vweird.f32 %v6995_v4  ;;  %v6723_v12 = vld [vmem:[%s7445_s9 + $0x68] sm:$0xf0]  ;;  %v3517_v17 = vunpack.c.l.bf16 %v5990_v9 }
 0x8dc   : > { %vm3496_vm14 = vmor %vm3494_vm13, %vm3495_vm12  ;;  %v6144_v13 = vor.u32 %v6723_v12, %v6143_v10  ;;  %v6104_v10 = vor.u32 %v6712_v42, %v6103_v62  ;;  %v6256_v62 = vld [vmem:[%s7445_s9 + $0x78] sm:$0xf]  ;;  %v6750_v42 = vld [vmem:[%s7445_s9 + $0x80] sm:$0xf0] }
 0x8dd   : > { %v3491_v14 = vsub.f32 1.0, %v3490_v50  ;;  %v3477_v25 = vsel %vm3476_vm10, %v6993_v46, %v3473_v20  ;;  %v6722_v46 = vld [vmem:[%s7445_s9 + $0x64] sm:$0xf]  ;;  %v6152_v50 = vor.u32 %v6724_v45, %v6151_v16 }
 0x8de   : > { %v3482_v18 = vsel %vm3479_vm11, %v3481_v0, %v3477_v25  ;;  %3938 = vmatpush.bf16.msrb.mxu3 %v6144_v13  ;;  %v6720_v25 = vld [vmem:[%s7445_s9 + $0x50] sm:$0xf0] }
 0x8df   : > { %v3492_v26 = vmul.f32 %v6995_v4, %v3491_v14  ;;  %v3504_v28 = vmul.f32 %v3482_v18, %v3461_v23  ;;  %3964 = vmatpush.bf16.msra.mxu1 %v6152_v50  ;;  %v6131_v23 = vld [vmem:[%s7445_s9 + $0x48] sm:$0xf]  ;;  %v6719_v18 = vld [vmem:[%s7445_s9 + $0x4c] sm:$0xf] }
 0x8e1   : > { %v3505_v60 = vadd.f32 %v3504_v28, %v3264_v22  ;;  %v3493_v6 = vadd.f32 %v6995_v4, %v3492_v26  ;;  %v6132_v26 = vor.u32 %v6720_v25, %v6131_v23  ;;  %v6133_v28 = vld [vmem:[%s7445_s9 + $0x54] sm:$0xf0] }
 0x8e3   : > { %6996 = vtanh.f32 %v3505_v60  ;;  %v3497_v31 = vsel %vm3496_vm14, %v6995_v4, %v3493_v6  ;;  %v6148_v4 = vor.u32 %v6722_v46, %v6145_v15  ;;  %3939 = vmatpush.bf16.msrb.mxu3 %v6132_v26 }
 0x8e4   : > { %v3502_v24 = vsel %vm3499_vm15, %v3501_v63, %v3497_v31  ;;  %v6136_v31 = vor.u32 %v6719_v18, %v6133_v28  ;;  %v6140_v63 = vor.u32 %v6721_v29, %v6139_v21 }
 0x8e5   : > { %v3507_v32 = vsub.f32 1.0, %v3502_v24  ;;  %v3509_v37 = vmul.f32 %v3502_v24, %v8211_v36  ;;  %v6181_v36 = vld [vmem:[%s7445_s9 + $0xb4] sm:$0xf0] }
 0x8e6   : > { %v6184_v44 = vor.u32 %v6731_v27, %v6181_v36  ;;  %3965 = vmatpush.bf16.msra.mxu1 %v6140_v63  ;;  %v6718_v36 = vld [vmem:[%s7445_s9 + $0x40] sm:$0xf0] }
 0x8e7   : > { %v6128_v47 = vor.u32 %v6718_v36, %v6127_v40  ;;  %v6756_v40 = vld [vmem:[%s7445_s9 + $0xb0] sm:$0xf0]  ;;  %v6755_v36 = vld [vmem:[%s7445_s9 + $0xac] sm:$0xf] }
 0x8e8   : > { %3948 = vmatpush.bf16.msra.mxu0 %v6184_v44 }
 0x8e9   : > { %v6997_v34 = vpop.eup %6996 }
 0x8ea   : > { %v3508_v35 = vmul.f32 %v6997_v34, %v3507_v32  ;;  %v6119_v34 = vld [vmem:[%s7445_s9 + $0x30] sm:$0xf]  ;;  %3966 = vmatpush.bf16.msra.mxu1 %v6128_v47 }
 0x8ec   : > { %v8270_v61 = vadd.f32 %v3509_v37, %v3508_v35  ;;  %3949 = vmatpush.bf16.msra.mxu0 %v6172_v41  ;;  %v6717_v35 = vld [vmem:[%s7445_s9 + $0x38] sm:$0xf0]  ;;  %v6716_v37 = vld [vmem:[%s7445_s9 + $0x34] sm:$0xf]  ;;  %v6095_v41 = vld [vmem:[%s7445_s9] sm:$0xf] }
 0x8ed   : > { %v6120_v39 = vor.u32 %v6717_v35, %v6119_v34  ;;  %v6096_v5 = vor.u32 %v6711_v57, %v6095_v41  ;;  %v6276_v41 = vld [vmem:[%s7445_s9 + $0x98] sm:$0xf] }
 0x8ee   : > { %v3511_v38 = vpack.c.bf16 %v8270_v61, %v8270_v61  ;;  %3967 = vmatpush.bf16.msra.mxu1 %v6116_v56  ;;  %v6754_v56 = vld [vmem:[%s7445_s9 + $0xa0] sm:$0xf0] }
 0x8ef   : > { %3940 = vmatpush.bf16.msrb.mxu3 %v6120_v39 }
 0x8f0   : > { %5989 = vst [vmem:[%s7461_s27 + $0x10] sm:$0xf] %v3511_v38  ;;  %3688 = vmatmul.bf16.vlgmr.msrb.gmra.mxu0 %v3511_v38  ;;  %3701 = vmatmul.bf16.vlgmr.msrb.gmra.mxu1 %v3511_v38 }
 0x8f1   : > { %3714 = vmatmul.bf16.vlgmr.msrb.gmra.mxu2 %v3511_v38  ;;  %3950 = vmatpush.bf16.msra.mxu0 %v6160_v7  ;;  %v6121_v38 = vld [vmem:[%s7445_s9 + $0x3c] sm:$0xf0]  ;;  %v6100_v7 = vor.u32 %v6710_v58, %v6097_v59  ;;  %v6277_v58 = vor.u32 %v6754_v56, %v6276_v41  ;;  %v3773_v59 = vunpack.c.h.bf16 %v8341_v49 }
 0x8f2   : > { %v6124_v27 = vor.u32 %v6716_v37, %v6121_v38  ;;  %3968 = vmatpush.bf16.msra.mxu1 %v6104_v10  ;;  %v6751_v10 = vld [vmem:[%s7445_s9 + $0x88] sm:$0xf0] }
 0x8f3   : > { %3941 = vmatpush.bf16.msrb.mxu3 %v6108_v52  ;;  %v6753_v52 = vld [vmem:[%s7445_s9 + $0x98] sm:$0xf0] }
 0x8f4   : > { %v6269_v54 = vor.u32 %v6753_v52, %v6268_v51  ;;  %v6737_v51 = vld [vmem:[%s7445_s9 + $0x1c] sm:$0xf]  ;;  %v6210_v52 = vld [vmem:[%s7445_s9 + $0x24] sm:$0xf0] }
 0x8f5   : > { %3951 = vmatpush.bf16.msra.mxu0 %v6148_v4 }
 0x8f7   : > { %3942 = vmatpush.bf16.msrb.mxu3 %v6096_v5 }
 0x8f9   : > { %3952 = vmatpush.bf16.msra.mxu0 %v6136_v31 }
 0x8fd   : > { %3953 = vmatpush.bf16.msra.mxu0 %v6124_v27  ;;  %v6280_v27 = vld [vmem:[%s7445_s9 + $0xa8] sm:$0xf] }
 0x8fe   : > { %v6281_v43 = vor.u32 %v6756_v40, %v6280_v27  ;;  %v6222_v40 = vld [vmem:[%s7445_s9 + $0x3c] sm:$0xf0] }
 0x900   : > { %4190 = vmatpush.bf16.msra.mxu2 %v6281_v43  ;;  %v6742_v43 = vld [vmem:[%s7445_s9 + $0x40] sm:$0xf0] }
 0x901   : > { %3954 = vmatpush.bf16.msra.mxu0 %v6112_v53  ;;  %v6752_v53 = vld [vmem:[%s7445_s9 + $0x94] sm:$0xf] }
 0x902   : > { %v6273_v57 = vor.u32 %v6752_v53, %v6270_v55  ;;  %v6216_v53 = vld [vmem:[%s7445_s9 + $0x20] sm:$0xf] }
 0x904   : > { %4191 = vmatpush.bf16.msra.mxu2 %v6269_v54  ;;  %v6739_v54 = vld [vmem:[%s7445_s9 + $0x28] sm:$0xf0] }
 0x905   : > { %3955 = vmatpush.bf16.msra.mxu0 %v6100_v7  ;;  %v6257_v7 = vor.u32 %v6750_v42, %v6256_v62  ;;  %v6196_v62 = vld [vmem:[%s7445_s9] sm:$0xf]  ;;  %v6735_v42 = vld [vmem:[%s7445_s9 + $0x8] sm:$0xf0] }
 0x908   : > { %4192 = vmatpush.bf16.msra.mxu2 %v6257_v7  ;;  %v6204_v7 = vld [vmem:[%s7445_s9 + $0x8] sm:$0xf] }
 0x96d   : > { %v3689_v20 = vpop.f32.mrf.mxu0  ;;  %v3702_v22 = vpop.f32.mrf.mxu1 }
 0x96e   : > { %v3690_v0 = vadd.f32 %v3689_v20, %v8040_v1  ;;  %v3703_v14 = vadd.f32 %v3702_v22, %v8043_v2 }
 0x970   : > { %v3719_v60 = vadd.f32 %v3690_v0, %v3517_v17  ;;  %v3739_v6 = vadd.f32 %v3703_v14, %v3518_v19  ;;  %v5991_v0 = vld [vmem:[%s7437_s29 + $0x2c] sm:$0xf] }
 0x971   : > { %v3519_v25 = vunpack.c.l.bf16 %v5991_v0 }
 0x972   : > { %v6088_v24 = vmul.f32 -1.442695, %v3719_v60  ;;  %v6089_v32 = vmul.f32 -1.442695, %v3739_v6 }
 0x974   : > { %6998 = vpow2.f32 %v6088_v24  ;;  %v3715_v33 = vpop.f32.mrf.mxu2 }
 0x975   : > { %7000 = vpow2.f32 %v6089_v32  ;;  %v3691_v30 = vpop.f32.mrf.mxu0  ;;  %v3704_v44 = vpop.f32.mrf.mxu1  ;;  %v3716_v18 = vadd.f32 %v3715_v33, %v8078_v11 }
 0x976   : > { %v6288_v30 = vld [vmem:[%s7445_s9 + $0xb0] sm:$0xf]  ;;  %v6757_v44 = vld [vmem:[%s7445_s9 + $0xb8] sm:$0xf0] }
 0x977   : > { %v6289_v48 = vor.u32 %v6757_v44, %v6288_v30  ;;  %v6208_v30 = vld [vmem:[%s7445_s9 + $0x18] sm:$0xf] }
 0x979   : > { %4216 = vmatpush.bf16.msrb.mxu0 %v6289_v48 }
 0x97a   : > { %v6999_v3 = vpop.eup %6998 }
 0x97b   : > { %v7001_v8 = vpop.eup %7000  ;;  %v3723_v9 = vadd.f32 1.0, %v6999_v3  ;;  %v6749_v3 = vld [vmem:[%s7445_s9 + $0x7c] sm:$0xf] }
 0x97c   : > { %v3743_v12 = vadd.f32 1.0, %v7001_v8  ;;  %v3717_v46 = vpop.f32.mrf.mxu2  ;;  %v6258_v8 = vld [vmem:[%s7445_s9 + $0x84] sm:$0xf0] }
 0x97d   : > { %7002 = vrcp.f32 %v3723_v9  ;;  %v3735_v4 = vand.u32 2147483648, %v3723_v9  ;;  %v3733_v20 = vand.u32 2147483647, %v3723_v9  ;;  %vm3729_vm1 = vweird.f32 %v3723_v9  ;;  %4217 = vmatpush.bf16.msrb.mxu0 %v6277_v58 }
 0x97e   : > { %7004 = vrcp.f32 %v3743_v12  ;;  %v3755_v60 = vand.u32 2147483648, %v3743_v12  ;;  %vm3749_vm5 = vweird.f32 %v3743_v12  ;;  %v3753_v6 = vand.u32 2147483647, %v3743_v12 }
 0x97f   : > { %v3736_v23 = vor.u32 1.1754944e-38, %v3735_v4  ;;  %vm3734_vm3 = vcmp.eq.f32.partialorder %v3733_v20, 8.507059e+37  ;;  %v6252_v20 = vld [vmem:[%s7445_s9 + $0x68] sm:$0xf]  ;;  %v6213_v58 = vor.u32 %v6737_v51, %v6210_v52  ;;  %v6367_v51 = vld [vmem:[%s7445_s9 + $0x90] sm:$0xf] }
 0x980   : > { %v3756_v24 = vor.u32 1.1754944e-38, %v3755_v60  ;;  %vm3754_vm7 = vcmp.eq.f32.partialorder %v3753_v6, 8.507059e+37  ;;  %v6234_v6 = vld [vmem:[%s7445_s9 + $0x54] sm:$0xf0]  ;;  %v6777_v52 = vld [vmem:[%s7445_s9 + $0x98] sm:$0xf0] }
 0x983   : > { %v7003_v13 = vpop.eup %7002 }
 0x984   : > { %v7005_v15 = vpop.eup %7004  ;;  %v3725_v16 = vmul.f32 %v7003_v13, %v3723_v9  ;;  %vm3730_vm0 = vweird.f32 %v7003_v13  ;;  %v6264_v9 = vld [vmem:[%s7445_s9 + $0x80] sm:$0xf] }
 0x985   : > { %v3745_v45 = vmul.f32 %v7005_v15, %v3743_v12  ;;  %vm3731_vm2 = vmor %vm3729_vm1, %vm3730_vm0  ;;  %vm3750_vm4 = vweird.f32 %v7005_v15 }
 0x986   : > { %v3726_v17 = vsub.f32 1.0, %v3725_v16  ;;  %vm3751_vm6 = vmor %vm3749_vm5, %vm3750_vm4 }
 0x987   : > { %v3746_v19 = vsub.f32 1.0, %v3745_v45  ;;  %v6244_v45 = vld [vmem:[%s7445_s9 + $0x60] sm:$0xf] }
 0x988   : > { %v3727_v50 = vmul.f32 %v7003_v13, %v3726_v17  ;;  %v6747_v17 = vld [vmem:[%s7445_s9 + $0x68] sm:$0xf0] }
 0x989   : > { %v3747_v22 = vmul.f32 %v7005_v15, %v3746_v19  ;;  %v6746_v19 = vld [vmem:[%s7445_s9 + $0x64] sm:$0xf]  ;;  %v6245_v4 = vor.u32 %v6747_v17, %v6244_v45 }
 0x98a   : > { %v3728_v14 = vadd.f32 %v7003_v13, %v3727_v50  ;;  %v6246_v50 = vld [vmem:[%s7445_s9 + $0x6c] sm:$0xf0] }
 0x98b   : > { %v3748_v21 = vadd.f32 %v7005_v15, %v3747_v22  ;;  %v6748_v22 = vld [vmem:[%s7445_s9 + $0x70] sm:$0xf0]  ;;  %4193 = vmatpush.bf16.msra.mxu2 %v6245_v4 }
 0x98c   : > { %v3732_v26 = vsel %vm3731_vm2, %v7003_v13, %v3728_v14  ;;  %v6261_v13 = vor.u32 %v6749_v3, %v6258_v8  ;;  %v3772_v14 = vunpack.c.l.bf16 %v8341_v49  ;;  %v6738_v49 = vld [vmem:[%s7445_s9 + $0x20] sm:$0xf0]  ;;  %v6736_v8 = vld [vmem:[%s7445_s9 + $0x10] sm:$0xf0] }
 0x98d   : > { %v3737_v28 = vsel %vm3734_vm3, %v3736_v23, %v3732_v26  ;;  %v3752_v63 = vsel %vm3751_vm6, %v7005_v15, %v3748_v21  ;;  %v6265_v15 = vor.u32 %v6751_v10, %v6264_v9  ;;  %v6249_v23 = vor.u32 %v6746_v19, %v6246_v50  ;;  %v6232_v26 = vld [vmem:[%s7445_s9 + $0x48] sm:$0xf]  ;;  %v6743_v21 = vld [vmem:[%s7445_s9 + $0x4c] sm:$0xf]  ;;  %v6734_v3 = vld [vmem:[%s7445_s9 + $0x4] sm:$0xf] }
 0x98e   : > { %v3759_v29 = vmul.f32 %v3737_v28, %v3716_v18  ;;  %v3757_v32 = vsel %vm3754_vm7, %v3756_v24, %v3752_v63  ;;  %v6744_v28 = vld [vmem:[%s7445_s9 + $0x50] sm:$0xf0]  ;;  %v6745_v63 = vld [vmem:[%s7445_s9 + $0x58] sm:$0xf0]  ;;  %v6197_v9 = vor.u32 %v6735_v42, %v6196_v62  ;;  %v6774_v62 = vld [vmem:[%s7445_s9 + $0x80] sm:$0xf0] }
 0x98f   : > { %v3762_v34 = vsub.f32 1.0, %v3757_v32  ;;  %v3764_v38 = vmul.f32 %v3757_v32, %v8270_v61  ;;  %v6282_v61 = vld [vmem:[%s7445_s9 + $0xb4] sm:$0xf0]  ;;  %4218 = vmatpush.bf16.msrb.mxu0 %v6265_v15  ;;  %v6233_v60 = vor.u32 %v6744_v28, %v6232_v26  ;;  %v6237_v32 = vor.u32 %v6743_v21, %v6234_v6  ;;  %v6773_v42 = vld [vmem:[%s7445_s9 + $0x7c] sm:$0xf] }
 0x990   : > { %v3760_v31 = vadd.f32 %v3759_v29, %v3519_v25  ;;  %v6285_v47 = vor.u32 %v6755_v36, %v6282_v61  ;;  %v6253_v25 = vor.u32 %v6748_v22, %v6252_v20  ;;  %v6228_v36 = vld [vmem:[%s7445_s9 + $0x38] sm:$0xf] }
 0x991   : > { %4194 = vmatpush.bf16.msra.mxu2 %v6233_v60  ;;  %v6229_v48 = vor.u32 %v6742_v43, %v6228_v36  ;;  %v6379_v36 = vld [vmem:[%s7445_s9 + $0xa8] sm:$0xf]  ;;  %v6780_v43 = vld [vmem:[%s7445_s9 + $0xb0] sm:$0xf0] }
 0x992   : > { %7006 = vtanh.f32 %v3760_v31  ;;  %4203 = vmatpush.bf16.msra.mxu3 %v6285_v47  ;;  %v6240_v31 = vld [vmem:[%s7445_s9 + $0x50] sm:$0xf] }
 0x993   : > { %4219 = vmatpush.bf16.msrb.mxu0 %v6253_v25 }
 0x996   : > { %4204 = vmatpush.bf16.msra.mxu3 %v6273_v57  ;;  %v6209_v57 = vor.u32 %v6738_v49, %v6208_v30  ;;  %v6380_v30 = vor.u32 %v6780_v43, %v6379_v36  ;;  %v6327_v36 = vld [vmem:[%s7445_s9 + $0x38] sm:$0xf]  ;;  %v6766_v43 = vld [vmem:[%s7445_s9 + $0x40] sm:$0xf0] }
 0x998   : > { %v7007_v35 = vpop.eup %7006  ;;  %4444 = vmatpush.bf16.msrb.mxu1 %v6380_v30  ;;  %v6307_v30 = vld [vmem:[%s7445_s9 + $0x18] sm:$0xf] }
 0x999   : > { %v3763_v37 = vmul.f32 %v7007_v35, %v3762_v34  ;;  %v6241_v34 = vor.u32 %v6745_v63, %v6240_v31  ;;  %v6220_v35 = vld [vmem:[%s7445_s9 + $0x30] sm:$0xf] }
 0x99a   : > { %4205 = vmatpush.bf16.msra.mxu3 %v6261_v13  ;;  %v6205_v13 = vor.u32 %v6736_v8, %v6204_v7  ;;  %v6363_v7 = vld [vmem:[%s7445_s9 + $0x80] sm:$0xf]  ;;  %v6775_v8 = vld [vmem:[%s7445_s9 + $0x88] sm:$0xf0] }
 0x99b   : > { %v8329_v33 = vadd.f32 %v3764_v38, %v3763_v37  ;;  %v6741_v37 = vld [vmem:[%s7445_s9 + $0x38] sm:$0xf0]  ;;  %v6740_v38 = vld [vmem:[%s7445_s9 + $0x34] sm:$0xf]  ;;  %4220 = vmatpush.bf16.msrb.mxu0 %v6241_v34 }
 0x99c   : > { %v6221_v61 = vor.u32 %v6741_v37, %v6220_v35  ;;  %v6225_v47 = vor.u32 %v6740_v38, %v6222_v40 }
 0x99d   : > { %v3766_v39 = vpack.c.bf16 %v8329_v33, %v8329_v33 }
 0x99e   : > { %4206 = vmatpush.bf16.msra.mxu3 %v6249_v23  ;;  %4195 = vmatpush.bf16.msra.mxu2 %v6221_v61  ;;  %v6092_v23 = vld [vmem:[%s7437_s29 + $0x20] sm:$0xf]  ;;  %v6779_v61 = vld [vmem:[%s7445_s9 + $0xac] sm:$0xf] }
 0x99f   : > { %6090 = vst [vmem:[%s7461_s27 + $0xc] sm:$0xf] %v3766_v39  ;;  %3943 = vmatmul.bf16.vlgmr.msrb.gmra.mxu3 %v3766_v39  ;;  %3956 = vmatmul.bf16.vlgmr.msra.gmra.mxu0 %v3766_v39  ;;  %v3774_v21 = vunpack.c.l.bf16 %v6092_v23 }
 0x9a0   : > { %3969 = vmatmul.bf16.vlgmr.msra.gmra.mxu1 %v3766_v39  ;;  %4221 = vmatpush.bf16.msrb.mxu0 %v6229_v48 }
 0x9a2   : > { %4207 = vmatpush.bf16.msra.mxu3 %v6237_v32  ;;  %4196 = vmatpush.bf16.msra.mxu2 %v6209_v57 }
 0x9a6   : > { %4208 = vmatpush.bf16.msra.mxu3 %v6225_v47  ;;  %4197 = vmatpush.bf16.msra.mxu2 %v6197_v9  ;;  %v6781_v47 = vld [vmem:[%s7445_s9 + $0xb8] sm:$0xf0] }
 0x9aa   : > { %4209 = vmatpush.bf16.msra.mxu3 %v6213_v58 }
 0xa1c   : > { %v3957_v5 = vpop.f32.mrf.mxu0 }
 0xa1d   : > { %v3958_v12 = vadd.f32 %v3957_v5, %v8043_v2  ;;  %v8357_v46 = vpop.f32.mrf.mxu1  ;;  %v6198_v5 = vld [vmem:[%s7445_s9 + $0xc] sm:$0xf0] }
 0xa1e   : > { %v3971_v26 = vadd.f32 %v8357_v46, %v8078_v11 }
 0xa1f   : > { %v3994_v16 = vadd.f32 %v3958_v12, %v3773_v59  ;;  %v6217_v59 = vor.u32 %v6739_v54, %v6216_v53  ;;  %v6201_v12 = vor.u32 %v6734_v3, %v6198_v5  ;;  %v6776_v53 = vld [vmem:[%s7445_s9 + $0x94] sm:$0xf]  ;;  %v6368_v54 = vor.u32 %v6777_v52, %v6367_v51  ;;  %v6357_v5 = vld [vmem:[%s7445_s9 + $0x84] sm:$0xf0]  ;;  %v6761_v51 = vld [vmem:[%s7445_s9 + $0x1c] sm:$0xf] }
 0xa20   : > { %v6309_v52 = vld [vmem:[%s7445_s9 + $0x24] sm:$0xf0] }
 0xa21   : > { %v6190_v0 = vmul.f32 -1.442695, %v3994_v16  ;;  %4222 = vmatpush.bf16.msrb.mxu0 %v6217_v59  ;;  %4210 = vmatpush.bf16.msra.mxu3 %v6201_v12  ;;  %v6355_v59 = vld [vmem:[%s7445_s9 + $0x78] sm:$0xf]  ;;  %v6364_v12 = vor.u32 %v6775_v8, %v6363_v7  ;;  %v6760_v7 = vld [vmem:[%s7445_s9 + $0x10] sm:$0xf0] }
 0xa22   : > { %v3944_v18 = vpop.f32.mrf.mxu3  ;;  %4445 = vmatpush.bf16.msrb.mxu1 %v6368_v54  ;;  %v6356_v3 = vor.u32 %v6774_v62, %v6355_v59  ;;  %v6763_v54 = vld [vmem:[%s7445_s9 + $0x28] sm:$0xf0]  ;;  %v6295_v59 = vld [vmem:[%s7445_s9] sm:$0xf] }
 0xa23   : > { %7008 = vpow2.f32 %v6190_v0  ;;  %v3945_v29 = vadd.f32 %v3944_v18, %v8040_v1  ;;  %v6759_v62 = vld [vmem:[%s7445_s9 + $0x8] sm:$0xf0] }
 0xa24   : > { %v3959_v24 = vpop.f32.mrf.mxu0  ;;  %v6296_v8 = vor.u32 %v6759_v62, %v6295_v59 }
 0xa25   : > { %v3974_v39 = vadd.f32 %v3945_v29, %v3772_v14  ;;  %v3972_v27 = vpop.f32.mrf.mxu1  ;;  %4223 = vmatpush.bf16.msrb.mxu0 %v6205_v13  ;;  %v6192_v13 = vld [vmem:[%s7437_s29 + $0xc] sm:$0xff] }
 0xa26   : > { %4446 = vmatpush.bf16.msrb.mxu1 %v6356_v3  ;;  %v6297_v3 = vld [vmem:[%s7445_s9 + $0xc] sm:$0xf0] }
 0xa27   : > { %v6189_v44 = vmul.f32 -1.442695, %v3974_v39 }
 0xa29   : > { %v7009_v55 = vpop.eup %7008  ;;  %7010 = vpow2.f32 %v6189_v44  ;;  %v6387_v44 = vld [vmem:[%s7445_s9 + $0xb0] sm:$0xf] }
 0xa2a   : > { %v3998_v41 = vadd.f32 1.0, %v7009_v55  ;;  %v3946_v56 = vpop.f32.mrf.mxu3  ;;  %v6388_v49 = vor.u32 %v6781_v47, %v6387_v44  ;;  %v6369_v55 = vld [vmem:[%s7445_s9 + $0x9c] sm:$0xf0] }
 0xa2b   : > { %v6778_v56 = vld [vmem:[%s7445_s9 + $0xa0] sm:$0xf0]  ;;  %v6372_v57 = vor.u32 %v6776_v53, %v6369_v55  ;;  %v6315_v53 = vld [vmem:[%s7445_s9 + $0x20] sm:$0xf] }
 0xa2c   : > { %7012 = vrcp.f32 %v3998_v41  ;;  %v4010_v6 = vand.u32 2147483648, %v3998_v41  ;;  %vm4004_vm13 = vweird.f32 %v3998_v41  ;;  %v4008_v63 = vand.u32 2147483647, %v3998_v41  ;;  %4470 = vmatpush.bf16.msrb.mxu3 %v6388_v49 }
 0xa2d   : > { %v6328_v49 = vor.u32 %v6766_v43, %v6327_v36 }
 0xa2e   : > { %v4011_v34 = vor.u32 1.1754944e-38, %v4010_v6  ;;  %vm4009_vm15 = vcmp.eq.f32.partialorder %v4008_v63, 8.507059e+37  ;;  %v6333_v6 = vld [vmem:[%s7445_s9 + $0x54] sm:$0xf0]  ;;  %v6769_v63 = vld [vmem:[%s7445_s9 + $0x58] sm:$0xf0] }
 0xa2f   : > { %v7011_v10 = vpop.eup %7010 }
 0xa30   : > { %v3978_v15 = vadd.f32 1.0, %v7011_v10  ;;  %v6360_v10 = vor.u32 %v6773_v42, %v6357_v5  ;;  %v6758_v42 = vld [vmem:[%s7445_s9 + $0x4] sm:$0xf]  ;;  %v6303_v5 = vld [vmem:[%s7445_s9 + $0x8] sm:$0xf] }
 0xa32   : > { %7014 = vrcp.f32 %v3978_v15  ;;  %v7013_v16 = vpop.eup %7012  ;;  %v3990_v20 = vand.u32 2147483648, %v3978_v15  ;;  %v3988_v0 = vand.u32 2147483647, %v3978_v15  ;;  %vm3984_vm9 = vweird.f32 %v3978_v15 }
 0xa33   : > { %v4000_v45 = vmul.f32 %v7013_v16, %v3998_v41  ;;  %vm4005_vm12 = vweird.f32 %v7013_v16  ;;  %v6375_v41 = vld [vmem:[%s7445_s9 + $0x98] sm:$0xf] }
 0xa34   : > { %v3991_v18 = vor.u32 1.1754944e-38, %v3990_v20  ;;  %vm3989_vm11 = vcmp.eq.f32.partialorder %v3988_v0, 8.507059e+37  ;;  %vm4006_vm14 = vmor %vm4004_vm13, %vm4005_vm12  ;;  %v6376_v58 = vor.u32 %v6778_v56, %v6375_v41  ;;  %v4027_v20 = vunpack.c.l.bf16 %v6192_v13 }
 0xa35   : > { %v4001_v4 = vsub.f32 1.0, %v4000_v45  ;;  %v6770_v45 = vld [vmem:[%s7445_s9 + $0x64] sm:$0xf] }
 0xa36   : > { %4471 = vmatpush.bf16.msrb.mxu3 %v6376_v58  ;;  %v6316_v58 = vor.u32 %v6763_v54, %v6315_v53 }
 0xa37   : > { %v4002_v14 = vmul.f32 %v7013_v16, %v4001_v4  ;;  %v6351_v4 = vld [vmem:[%s7445_s9 + $0x68] sm:$0xf] }
 0xa38   : > { %v7015_v17 = vpop.eup %7014 }
 0xa39   : > { %v3980_v19 = vmul.f32 %v7015_v17, %v3978_v15  ;;  %vm3985_vm8 = vweird.f32 %v7015_v17  ;;  %v4003_v60 = vadd.f32 %v7013_v16, %v4002_v14  ;;  %v6343_v15 = vld [vmem:[%s7445_s9 + $0x60] sm:$0xf] }
 0xa3a   : > { %vm3986_vm10 = vmor %vm3984_vm9, %vm3985_vm8  ;;  %4472 = vmatpush.bf16.msrb.mxu3 %v6364_v12  ;;  %v6300_v12 = vor.u32 %v6758_v42, %v6297_v3 }
 0xa3b   : > { %v3981_v50 = vsub.f32 1.0, %v3980_v19  ;;  %v4007_v32 = vsel %vm4006_vm14, %v7013_v16, %v4003_v60  ;;  %v6771_v16 = vld [vmem:[%s7445_s9 + $0x68] sm:$0xf0]  ;;  %v6345_v19 = vld [vmem:[%s7445_s9 + $0x6c] sm:$0xf0] }
 0xa3c   : > { %v4012_v46 = vsel %vm4009_vm15, %v4011_v34, %v4007_v32  ;;  %v6348_v0 = vor.u32 %v6770_v45, %v6345_v19  ;;  %v6319_v34 = vld [vmem:[%s7445_s9 + $0x30] sm:$0xf] }
 0xa3d   : > { %v3982_v22 = vmul.f32 %v7015_v17, %v3981_v50  ;;  %v4017_v35 = vsub.f32 1.0, %v4012_v46  ;;  %v4019_v39 = vmul.f32 %v4012_v46, %v8329_v33  ;;  %v6381_v33 = vld [vmem:[%s7445_s9 + $0xb4] sm:$0xf0]  ;;  %v6772_v50 = vld [vmem:[%s7445_s9 + $0x70] sm:$0xf0] }
 0xa3e   : > { %v6384_v48 = vor.u32 %v6779_v61, %v6381_v33  ;;  %v6352_v14 = vor.u32 %v6772_v50, %v6351_v4  ;;  %v6765_v46 = vld [vmem:[%s7445_s9 + $0x38] sm:$0xf0]  ;;  %v6762_v33 = vld [vmem:[%s7445_s9 + $0x20] sm:$0xf0] }
 0xa3f   : > { %v3983_v25 = vadd.f32 %v7015_v17, %v3982_v22  ;;  %v4028_v22 = vunpack.c.h.bf16 %v6192_v13  ;;  %v6320_v61 = vor.u32 %v6765_v46, %v6319_v34  ;;  %v6308_v56 = vor.u32 %v6762_v33, %v6307_v30 }
 0xa40   : > { %4457 = vmatpush.bf16.msrb.mxu2 %v6384_v48  ;;  %4473 = vmatpush.bf16.msrb.mxu3 %v6352_v14  ;;  %v6304_v13 = vor.u32 %v6760_v7, %v6303_v5  ;;  %v4280_v7 = vld [vmem:[%s7437_s29 + $0x8] sm:$0xf] }
 0xa41   : > { %v3987_v28 = vsel %vm3986_vm10, %v7015_v17, %v3983_v25  ;;  %v6344_v17 = vor.u32 %v6771_v16, %v6343_v15 }
 0xa42   : > { %v3992_v29 = vsel %vm3989_vm11, %v3991_v18, %v3987_v28  ;;  %v6331_v18 = vld [vmem:[%s7445_s9 + $0x48] sm:$0xf]  ;;  %v6767_v28 = vld [vmem:[%s7445_s9 + $0x4c] sm:$0xf] }
 0xa43   : > { %v4014_v31 = vmul.f32 %v3992_v29, %v3971_v26  ;;  %4447 = vmatpush.bf16.msrb.mxu1 %v6344_v17  ;;  %v6768_v26 = vld [vmem:[%s7445_s9 + $0x50] sm:$0xf0] }
 0xa44   : > { %4458 = vmatpush.bf16.msrb.mxu2 %v6372_v57  ;;  %v6332_v60 = vor.u32 %v6768_v26, %v6331_v18  ;;  %v6312_v57 = vor.u32 %v6761_v51, %v6309_v52  ;;  %v6193_v18 = vld [vmem:[%s7437_s29 + $0x14] sm:$0xf] }
 0xa45   : > { %v4015_v24 = vadd.f32 %v4014_v31, %v3774_v21  ;;  %v6339_v31 = vld [vmem:[%s7445_s9 + $0x50] sm:$0xf] }
 0xa46   : > { %v6340_v32 = vor.u32 %v6769_v63, %v6339_v31 }
 0xa47   : > { %7016 = vtanh.f32 %v4015_v24  ;;  %v6336_v24 = vor.u32 %v6767_v28, %v6333_v6  ;;  %4448 = vmatpush.bf16.msrb.mxu1 %v6332_v60  ;;  %v4029_v60 = vunpack.c.l.bf16 %v6193_v18 }
 0xa48   : > { %4459 = vmatpush.bf16.msrb.mxu2 %v6360_v10  ;;  %4474 = vmatpush.bf16.msrb.mxu3 %v6340_v32 }
 0xa4b   : > { %4449 = vmatpush.bf16.msrb.mxu1 %v6320_v61  ;;  %v4279_v61 = vld [vmem:[%s7437_s29] sm:$0xff] }
 0xa4c   : > { %4460 = vmatpush.bf16.msrb.mxu2 %v6348_v0  ;;  %4475 = vmatpush.bf16.msrb.mxu3 %v6328_v49  ;;  %v4281_v30 = vunpack.c.l.bf16 %v4279_v61  ;;  %v4282_v49 = vunpack.c.h.bf16 %v4279_v61 }
 0xa4d   : > { %v7017_v37 = vpop.eup %7016 }
 0xa4e   : > { %v4018_v38 = vmul.f32 %v7017_v37, %v4017_v35  ;;  %v6764_v35 = vld [vmem:[%s7445_s9 + $0x34] sm:$0xf] }
 0xa4f   : > { %4450 = vmatpush.bf16.msrb.mxu1 %v6308_v56 }
 0xa50   : > { %v8395_v27 = vadd.f32 %v4019_v39, %v4018_v38  ;;  %4461 = vmatpush.bf16.msrb.mxu2 %v6336_v24  ;;  %4476 = vmatpush.bf16.msrb.mxu3 %v6316_v58 }
 0xa52   : > { %v4021_v40 = vpack.c.bf16 %v8395_v27, %v8395_v27 }
 0xa53   : > { %4451 = vmatpush.bf16.msrb.mxu1 %v6296_v8 }
 0xa54   : > { %6191 = vst [vmem:[%s7461_s27 + $0x8] sm:$0xf] %v4021_v40  ;;  %4198 = vmatmul.bf16.vlgmr.msra.gmra.mxu2 %v4021_v40  ;;  %4211 = vmatmul.bf16.vlgmr.msra.gmra.mxu3 %v4021_v40 }
 0xa55   : > { %4224 = vmatmul.bf16.vlgmr.msrb.gmra.mxu0 %v4021_v40  ;;  %v6321_v40 = vld [vmem:[%s7445_s9 + $0x3c] sm:$0xf0]  ;;  %4477 = vmatpush.bf16.msrb.mxu3 %v6304_v13 }
 0xa56   : > { %v6324_v48 = vor.u32 %v6764_v35, %v6321_v40 }
 0xa58   : > { %4462 = vmatpush.bf16.msrb.mxu2 %v6324_v48 }
 0xa5c   : > { %4463 = vmatpush.bf16.msrb.mxu2 %v6312_v57 }
 0xa60   : > { %4464 = vmatpush.bf16.msrb.mxu2 %v6300_v12 }
 0xad2   : > { %v8418_v9 = vpop.f32.mrf.mxu0 }
 0xad7   : > { %v4199_v23 = vpop.f32.mrf.mxu2  ;;  %v4212_v25 = vpop.f32.mrf.mxu3 }
 0xad8   : > { %v4200_v21 = vadd.f32 %v4199_v23, %v8040_v1  ;;  %v4213_v29 = vadd.f32 %v4212_v25, %v8043_v2 }
 0xada   : > { %v4229_v37 = vadd.f32 %v4200_v21, %v4027_v20  ;;  %v4249_v38 = vadd.f32 %v4213_v29, %v4028_v22  ;;  %v4227_v39 = vpop.f32.mrf.mxu0  ;;  %v4226_v21 = vadd.f32 %v8418_v9, %v8078_v11 }
 0xadc   : > { %v6290_v44 = vmul.f32 -1.442695, %v4229_v37  ;;  %v6291_v47 = vmul.f32 -1.442695, %v4249_v38 }
 0xade   : > { %7018 = vpow2.f32 %v6290_v44 }
 0xadf   : > { %7020 = vpow2.f32 %v6291_v47  ;;  %v4201_v55 = vpop.f32.mrf.mxu2  ;;  %v4214_v41 = vpop.f32.mrf.mxu3 }
 0xae4   : > { %v7019_v10 = vpop.eup %7018 }
 0xae5   : > { %v7021_v15 = vpop.eup %7020  ;;  %v4233_v16 = vadd.f32 1.0, %v7019_v10 }
 0xae6   : > { %v4253_v45 = vadd.f32 1.0, %v7021_v15  ;;  %v4283_v15 = vunpack.c.l.bf16 %v4280_v7 }
 0xae7   : > { %7022 = vrcp.f32 %v4233_v16  ;;  %v4245_v22 = vand.u32 2147483648, %v4233_v16  ;;  %v4243_v23 = vand.u32 2147483647, %v4233_v16  ;;  %vm4239_vm1 = vweird.f32 %v4233_v16 }
 0xae8   : > { %7024 = vrcp.f32 %v4253_v45  ;;  %v4265_v63 = vand.u32 2147483648, %v4253_v45  ;;  %vm4259_vm5 = vweird.f32 %v4253_v45  ;;  %v4263_v32 = vand.u32 2147483647, %v4253_v45 }
 0xae9   : > { %v4246_v28 = vor.u32 1.1754944e-38, %v4245_v22  ;;  %vm4244_vm3 = vcmp.eq.f32.partialorder %v4243_v23, 8.507059e+37 }
 0xaea   : > { %v4266_v35 = vor.u32 1.1754944e-38, %v4265_v63  ;;  %vm4264_vm7 = vcmp.eq.f32.partialorder %v4263_v32, 8.507059e+37 }
 0xaed   : > { %v7023_v17 = vpop.eup %7022 }
 0xaee   : > { %v7025_v19 = vpop.eup %7024  ;;  %v4235_v4 = vmul.f32 %v7023_v17, %v4233_v16  ;;  %vm4240_vm0 = vweird.f32 %v7023_v17 }
 0xaef   : > { %v4255_v50 = vmul.f32 %v7025_v19, %v4253_v45  ;;  %vm4241_vm2 = vmor %vm4239_vm1, %vm4240_vm0  ;;  %vm4260_vm4 = vweird.f32 %v7025_v19 }
 0xaf0   : > { %v4236_v20 = vsub.f32 1.0, %v4235_v4  ;;  %vm4261_vm6 = vmor %vm4259_vm5, %vm4260_vm4 }
 0xaf1   : > { %v4256_v0 = vsub.f32 1.0, %v4255_v50 }
 0xaf2   : > { %v4237_v14 = vmul.f32 %v7023_v17, %v4236_v20 }
 0xaf3   : > { %v4257_v25 = vmul.f32 %v7025_v19, %v4256_v0 }
 0xaf4   : > { %v4238_v26 = vadd.f32 %v7023_v17, %v4237_v14 }
 0xaf5   : > { %v4258_v31 = vadd.f32 %v7025_v19, %v4257_v25 }
 0xaf6   : > { %v4242_v29 = vsel %vm4241_vm2, %v7023_v17, %v4238_v26 }
 0xaf7   : > { %v4247_v6 = vsel %vm4244_vm3, %v4246_v28, %v4242_v29  ;;  %v4262_v46 = vsel %vm4261_vm6, %v7025_v19, %v4258_v31 }
 0xaf8   : > { %v4269_v24 = vmul.f32 %v4247_v6, %v4226_v21  ;;  %v4267_v37 = vsel %vm4264_vm7, %v4266_v35, %v4262_v46 }
 0xaf9   : > { %v4272_v9 = vsub.f32 1.0, %v4267_v37  ;;  %v4274_v40 = vmul.f32 %v4267_v37, %v8395_v27 }
 0xafa   : > { %v4270_v34 = vadd.f32 %v4269_v24, %v4029_v60 }
 0xafc   : > { %7026 = vtanh.f32 %v4270_v34 }
 0xb02   : > { %v7027_v38 = vpop.eup %7026 }
 0xb03   : > { %v4273_v39 = vmul.f32 %v7027_v38, %v4272_v9 }
 0xb05   : > { %v8457_v36 = vadd.f32 %v4274_v40, %v4273_v39 }
 0xb07   : > { %v4276_v43 = vpack.c.bf16 %v8457_v36, %v8457_v36 }
 0xb09   : > { %6292 = vst [vmem:[%s7461_s27 + $0x4] sm:$0xf] %v4276_v43  ;;  %4452 = vmatmul.bf16.vlgmr.msrb.gmra.mxu1 %v4276_v43  ;;  %4465 = vmatmul.bf16.vlgmr.msrb.gmra.mxu2 %v4276_v43 }
 0xb0a   : > { %4478 = vmatmul.bf16.vlgmr.msrb.gmra.mxu3 %v4276_v43 }
 0xb86   : > { %v4453_v33 = vpop.f32.mrf.mxu1 }
 0xb87   : > { %v4454_v44 = vadd.f32 %v4453_v33, %v8040_v1 }
 0xb89   : > { %v4483_v47 = vadd.f32 %v4454_v44, %v4281_v30 }
 0xb8b   : > { %v6389_v48 = vmul.f32 -1.442695, %v4483_v47 }
 0xb8c   : > { %v4466_v51 = vpop.f32.mrf.mxu2 }
 0xb8d   : > { %7028 = vpow2.f32 %v6389_v48  ;;  %v4467_v27 = vadd.f32 %v4466_v51, %v8043_v2  ;;  %v4479_v52 = vpop.f32.mrf.mxu3 }
 0xb8e   : > { %v4455_v53 = vpop.f32.mrf.mxu1  ;;  %v4480_v17 = vadd.f32 %v4479_v52, %v8078_v11 }
 0xb8f   : > { %v4503_v54 = vadd.f32 %v4467_v27, %v4282_v49 }
 0xb91   : > { %v6390_v55 = vmul.f32 -1.442695, %v4503_v54 }
 0xb93   : > { %v7029_v41 = vpop.eup %7028  ;;  %7030 = vpow2.f32 %v6390_v55 }
 0xb94   : > { %v4487_v56 = vadd.f32 1.0, %v7029_v41  ;;  %v4468_v57 = vpop.f32.mrf.mxu2 }
 0xb95   : > { %v4481_v58 = vpop.f32.mrf.mxu3 }
 0xb96   : > { %7032 = vrcp.f32 %v4487_v56  ;;  %v4499_v5 = vand.u32 2147483648, %v4487_v56  ;;  %v4497_v8 = vand.u32 2147483647, %v4487_v56  ;;  %vm4493_vm9 = vweird.f32 %v4487_v56 }
 0xb98   : > { %v4500_v16 = vor.u32 1.1754944e-38, %v4499_v5  ;;  %vm4498_vm11 = vcmp.eq.f32.partialorder %v4497_v8, 8.507059e+37 }
 0xb99   : > { %v7031_v59 = vpop.eup %7030 }
 0xb9a   : > { %v4507_v1 = vadd.f32 1.0, %v7031_v59 }
 0xb9c   : > { %v7033_v62 = vpop.eup %7032  ;;  %7034 = vrcp.f32 %v4507_v1  ;;  %v4519_v20 = vand.u32 2147483648, %v4507_v1  ;;  %v4517_v0 = vand.u32 2147483647, %v4507_v1  ;;  %vm4513_vm13 = vweird.f32 %v4507_v1 }
 0xb9d   : > { %v4489_v42 = vmul.f32 %v7033_v62, %v4487_v56  ;;  %vm4494_vm8 = vweird.f32 %v7033_v62 }
 0xb9e   : > { %vm4495_vm10 = vmor %vm4493_vm9, %vm4494_vm8  ;;  %v4520_v25 = vor.u32 1.1754944e-38, %v4519_v20  ;;  %vm4518_vm15 = vcmp.eq.f32.partialorder %v4517_v0, 8.507059e+37 }
 0xb9f   : > { %v4490_v3 = vsub.f32 1.0, %v4489_v42 }
 0xba1   : > { %v4491_v2 = vmul.f32 %v7033_v62, %v4490_v3 }
 0xba2   : > { %v7035_v10 = vpop.eup %7034 }
 0xba3   : > { %v4509_v12 = vmul.f32 %v7035_v10, %v4507_v1  ;;  %v4492_v13 = vadd.f32 %v7033_v62, %v4491_v2  ;;  %vm4514_vm12 = vweird.f32 %v7035_v10 }
 0xba4   : > { %vm4515_vm14 = vmor %vm4513_vm13, %vm4514_vm12 }
 0xba5   : > { %v4510_v45 = vsub.f32 1.0, %v4509_v12  ;;  %v4496_v19 = vsel %vm4495_vm10, %v7033_v62, %v4492_v13 }
 0xba6   : > { %v4501_v4 = vsel %vm4498_vm11, %v4500_v16, %v4496_v19 }
 0xba7   : > { %v4511_v50 = vmul.f32 %v7035_v10, %v4510_v45  ;;  %v4523_v22 = vmul.f32 %v4501_v4, %v4480_v17 }
 0xba9   : > { %v4512_v14 = vadd.f32 %v7035_v10, %v4511_v50  ;;  %v4524_v23 = vadd.f32 %v4523_v22, %v4283_v15 }
 0xbab   : > { %v4516_v18 = vsel %vm4515_vm14, %v7035_v10, %v4512_v14  ;;  %7036 = vtanh.f32 %v4524_v23 }
 0xbac   : > { %v4521_v26 = vsel %vm4518_vm15, %v4520_v25, %v4516_v18 }
 0xbad   : > { %v4526_v28 = vsub.f32 1.0, %v4521_v26  ;;  %v4528_v29 = vmul.f32 %v4521_v26, %v8457_v36 }
 0xbb1   : > { %v7037_v11 = vpop.eup %7036 }
 0xbb2   : > { %v4527_v21 = vmul.f32 %v7037_v11, %v4526_v28 }
 0xbb4   : > { %v4529_v60 = vadd.f32 %v4528_v29, %v4527_v21 }
 0xbb6   : > { %v4530_v6 = vpack.c.bf16 %v4529_v60, %v4529_v60  ;;  %4532 = vst [vmem:[#allocation2] sm:$0xff] %v4529_v60 }
 0xbb8   : > { %4531 = vst [vmem:[%s7461_s27] sm:$0xf] %v4530_v6 }
 0xbb9 PF: > { %s6782_s30 = sshll.u32 %s7272_s21, 5  ;;  %s8557_s17 = sld [smem:[#allocation27_spill]] }
 0xbba   : > { %s4562_s1 = sshll.u32 %s7461_s27, 4  ;;  %s4539_s23 = scalar_lea.sflag [#allocation5], %s7433_s4  ;;  %s4563_s1 = int_to_ptr.vmem [resolvable:$true] %s4562_s1 }
 0xbbd   : > { %v4536_v31 = vld [vmem:[#allocation2] sm:$0xff] }
 0xbbe   : > { %4537 = vst [vmem:[%s7463_s16] sm:$0xff] %v4536_v31 }
 0xbbf   : > { %s4561_s11 = scalar_lea.hbm %s8557_s17, %s6782_s30  ;;  %s7178_s0 = scalar_lea.hbm %s8557_s17, 64 }
 0xbc0   : > { %s4564_s20 = sshll.u32 %s4561_s11, 4  ;;  %s4565_s20 = int_to_ptr.hbm [resolvable:$true] %s4564_s20 }
 0xbc1   : > { %s7172_s26 = sshra.s32 %s4565_s20, 4  ;;  %s7173_s26 = int_to_ptr.hbm [resolvable:$true] %s7172_s26 }
 0xbc2   : > { %s7174_s5 = scalar_lea.hbm %s7173_s26, 32  ;;  %p7179_p10 = scmp.lt.s32.totalorder %s7173_s26, %s8557_s17 }
 0xbc3   : > { %p7175_p6 = scmp.ne.s32.totalorder %s7173_s26, %s7174_s5  ;;  %p7180_p13 = scmp.lt.s32.totalorder %s7178_s0, %s7174_s5 }
 0xbc5   : > { %p7176_p7 = pnand %p7175_p6, %p7371_p9  ;;  %p7181_p0 = por %p7180_p13, %p7179_p10 }
 0xbc7   : > { %p7177_p8 = pneg %p7176_p7 }
 0xbc9   : > { %p7182_p1 = pnand %p7181_p0, %p7177_p8 }
 0xbcb   : > { %7185 = shalt.err (!%p7182_p1)
}
 0xbcc   : > { %s7284_s9 = smov 64   ;;  %s7285_s10 = smov 4  }
 0xbcd   : > { %6800 = dma.vmem_to_hbm [thread:$0]  (%p7371_p9), %s4563_s1, 512, %s4565_s20, %s4539_s23, %s7284_s9, %s7284_s9, %s7285_s10  }
 0xbce   : > { %s6395_s28 = sshll.u32 %s7272_s21, 3  ;;  %s4579_s12 = sshll.u32 %s7463_s16, 4  ;;  %s4580_s12 = int_to_ptr.vmem [resolvable:$true] %s4579_s12 }
 0xbcf   : > { %s8558_s24 = sld [smem:[#allocation28_spill]]  ;;  %s4544_s13 = scalar_lea.sflag [#allocation13], %s7433_s4 }
 0xbd5   : > { %s4577_s27 = scalar_lea.hbm %s8558_s24, %s6395_s28  ;;  %s7206_s21 = scalar_lea.hbm %s8558_s24, 16 }
 0xbd6   : > { %s4581_s30 = sshll.u32 %s4577_s27, 4  ;;  %s4582_s30 = int_to_ptr.hbm [resolvable:$true] %s4581_s30 }
 0xbd7   : > { %s7200_s14 = sshra.s32 %s4582_s30, 4  ;;  %s7201_s14 = int_to_ptr.hbm [resolvable:$true] %s7200_s14 }
 0xbd8   : > { %s7202_s11 = scalar_lea.hbm %s7201_s14, 8  ;;  %p7207_p5 = scmp.lt.s32.totalorder %s7201_s14, %s8558_s24 }
 0xbd9   : > { %p7203_p2 = scmp.ne.s32.totalorder %s7201_s14, %s7202_s11  ;;  %p7208_p6 = scmp.lt.s32.totalorder %s7206_s21, %s7202_s11 }
 0xbdb   : > { %p7204_p3 = pnand %p7203_p2, %p7371_p9  ;;  %p7209_p7 = por %p7208_p6, %p7207_p5 }
 0xbdd   : > { %p7205_p4 = pneg %p7204_p3 }
 0xbdf   : > { %p7210_p8 = pnand %p7209_p7, %p7205_p4 }
 0xbe1   : > { %7213 = shalt.err (!%p7210_p8)
}
 0xbe2   : > { %6801 = dma.vmem_to_hbm [thread:$0]  (%p7371_p9), %s4580_s12, 128, %s4582_s30, %s4544_s13  }
 0xbe3 PF: > { %s8559_s4 = sld [smem:[#allocation19_spill]]  ;;  %p6818_p10 = pnand %p4770_p12, %p7378_p11 }
 0xbe4   : > { %s8561_s23 = sld [smem:[#allocation21_spill]] }
 0xbe5   : > { %p6819_p13 = pneg %p6818_p10 }
 0xbe9   : > { %s4593_s8 = sand.u32 1, %s8559_s4  }
 0xbea   : > { %s4594_s29 = scalar_lea.sflag [#allocation5], %s4593_s8 }
 0xbeb   : > { %7251 = dma.done.wait (%p6819_p13), %s4594_s29, 512  }
 0xbec   : > { %7253 = vsyncadd (%p6819_p13), %s4594_s29, 4294966784  ;;  %s4604_s0 = scalar_lea.sflag [#allocation13], %s4593_s8 }
 0xbed   : > { %7255 = dma.done.wait (%p6819_p13), %s4604_s0, 128  }
 0xbee   : > { %7257 = vsyncadd (%p6819_p13), %s4604_s0, 4294967168  ;;  %s31_s23 = sadd.s32 1, %s8561_s23   ;;  %s8562_s6 = sld [smem:[#allocation20_spill]] }
 0xbef   : > { %p28_p0 = scmp.ge.s32.totalorder %s31_s23, 4   ;;  %s8563_s20 = sld [smem:[#allocation23_spill]] }
 0xbf0   : > { %s8564_s7 = sld [smem:[#allocation22_spill]]  ;;  %s8565_s18 = smov %s7264_s19 }
 0xbf1   : > { %s8567_s21 = smov %s7276_s22 }
 0xbf2   :  { %30 = sbr.rel (!%p28_p0) target bundleno = 17 (0x11), region = 179 }
 0xbf4   : > { %s8566_s19 = smov %s8562_s6 }
 0xbf6   : > { %s8568_s22 = smov %s8564_s7 }
 0xbf7   :  { %4610 = vsyncpa [#allocation4], 1 }
 0xbf8   :  { %4612 = vsyncpa [#allocation4 + $0x1], 1 }
 0xbf9   :  { %4613 = vsyncpa [#allocation7], 1 }
 0xbfa   :  { %4615 = vsyncpa [#allocation7 + $0x1], 1 }
 0xbfb   :  { %4616 = vsyncpa [#allocation10], 1 }
 0xbfc   :  { %4618 = vsyncpa [#allocation10 + $0x1], 1 }
 0xbfd   :  { %4619 = vsyncpa [#allocation5], 1 }
 0xbfe   :  { %4621 = vsyncpa [#allocation5 + $0x1], 1 }
 0xbff   :  { %4622 = vsyncpa [#allocation13], 1 }
 0xc00   :  { %4624 = vsyncpa [#allocation13 + $0x1], 1 }

</bundles_post_ra>
